<compile_context>
chip_gen: v6e
topology: v6e:2x2x1
jax: 0.10.0
libtpu: 0.0.40
codegen_flags: <defaults>
</compile_context>

<pallas_src>
import functools

import jax
import jax.numpy as jnp
import numpy as np
from jax import lax
from jax.experimental import pallas as pl
from jax.experimental.pallas import tpu as pltpu


# --------------------------------------------------------------------------
# Small helpers
# --------------------------------------------------------------------------
def _round_up(x, m):
    return ((x + m - 1) // m) * m


def _pick_tm(M):
    """Row tile: as large as possible, but keep >=2 parallel grid steps (v7x has
    two TensorCores) when the split stays sublane-aligned (multiple of 8)."""
    if M >= 512:
        return 256
    half = M // 2
    if M % 2 == 0 and half % 8 == 0:
        return half
    return M


@functools.lru_cache(maxsize=None)
def _rope_tables_np(seq_len, head_dim, heads, base=10000.0):
    """Interleaved RoPE cos/sin tables, tiled across heads to (S, heads*head_dim)."""
    exponent = np.arange(0, head_dim, 2, dtype=np.float32) / head_dim
    theta = 1.0 / np.power(base, exponent)                   # (head_dim/2,)
    pos = np.arange(seq_len, dtype=np.float32)
    enc = np.einsum("t,e->te", pos, theta)                   # (S, head_dim/2)
    enc = np.repeat(enc, 2, axis=-1)                         # (S, head_dim), interleaved
    cos = np.tile(np.cos(enc), (1, heads)).astype(np.float32)
    sin = np.tile(np.sin(enc), (1, heads)).astype(np.float32)
    return cos, sin


@functools.lru_cache(maxsize=None)
def _rotate_half_matrix_np(dim):
    """rotate_half(x) == x @ R with R a signed pair-swap permutation.
    out[:, 2i] = -x[:, 2i+1]; out[:, 2i+1] = x[:, 2i]."""
    R = np.zeros((dim, dim), dtype=np.float32)
    for i in range(0, dim, 2):
        R[i + 1, i] = -1.0
        R[i, i + 1] = 1.0
    return R


@functools.lru_cache(maxsize=None)
def _head_blockdiag_ones_np(E, heads):
    """Block-diagonal ones: (e @ M)[:, j] = sum over lanes in j's head."""
    Dh = E // heads
    M = np.zeros((E, E), dtype=np.float32)
    for h in range(heads):
        M[h * Dh:(h + 1) * Dh, h * Dh:(h + 1) * Dh] = 1.0
    return M


# --------------------------------------------------------------------------
# Kernel: fused linear  y = act(x @ W (+ b))
# --------------------------------------------------------------------------
def _apply_act(y, act, scale):
    if act == "none":
        return y
    if act == "silu":
        return y * (1.0 / (1.0 + jnp.exp(-y)))
    if act == "sigmoid":
        return 1.0 / (1.0 + jnp.exp(-y))
    if act == "tanh_scale_floor":
        # quantizer encode: forward value of the STE = floor(scale * tanh(y))
        return jnp.floor(scale * jnp.tanh(y))
    if act == "leaky_relu":
        return jnp.where(y >= 0.0, y, 0.01 * y)
    raise ValueError(act)


def _linear_kernel(x_ref, w_ref, *rest, act, scale, has_bias):
    if has_bias:
        b_ref, o_ref = rest
    else:
        (o_ref,) = rest
    y = jnp.dot(x_ref[...], w_ref[...], preferred_element_type=jnp.float32)
    if has_bias:
        y = y + b_ref[...]
    o_ref[...] = _apply_act(y, act, scale).astype(o_ref.dtype)


def linear(x, w, b=None, *, act="none", scale=1.0):
    """y = act(x @ w (+ b)); x: (..., K), w: (K, N), b: (N,) or None.
    Narrow N is padded to 128 lanes inside the kernel (lane-dense stores)."""
    orig_shape = x.shape
    K = orig_shape[-1]
    N = w.shape[1]
    x2 = x.reshape(-1, K)
    M = x2.shape[0]
    tm = _pick_tm(M)

    N_pad = _round_up(N, 128)
    if N_pad != N:
        w = jnp.pad(w, ((0, 0), (0, N_pad - N)))
        if b is not None:
            b = jnp.pad(b, (0, N_pad - N))
    has_bias = b is not None

    args = [x2, w]
    in_specs = [
        pl.BlockSpec((tm, K), lambda i: (i, 0)),
        pl.BlockSpec((K, N_pad), lambda i: (0, 0)),
    ]
    if has_bias:
        args.append(b.reshape(1, N_pad))
        in_specs.append(pl.BlockSpec((1, N_pad), lambda i: (0, 0)))

    out = pl.pallas_call(
        functools.partial(_linear_kernel, act=act, scale=scale, has_bias=has_bias),
        out_shape=jax.ShapeDtypeStruct((M, N_pad), x.dtype),
        grid=(M // tm,),
        in_specs=in_specs,
        out_specs=pl.BlockSpec((tm, N_pad), lambda i: (i, 0)),
        compiler_params=pltpu.CompilerParams(dimension_semantics=("parallel",)),
    )(*args)
    if N_pad != N:
        out = out[:, :N]
    return out.reshape(orig_shape[:-1] + (N,))


# --------------------------------------------------------------------------
# Kernel: fused LayerNorm + attention + residual-add  (one (S, E) tile per batch)
# --------------------------------------------------------------------------
def _attn_residual_kernel(x_ref, g_ref, beta_ref, wq_ref, wo_ref,
                          cos_ref, sin_ref, rot_ref, seg_ref, o_ref):
    x = x_ref[...]                                            # (S, E)
    # LayerNorm (the PyTorch module applies layer_norm_1 before attention).
    mu = jnp.mean(x, axis=-1, keepdims=True)
    xc = x - mu
    var = jnp.mean(xc * xc, axis=-1, keepdims=True)
    h = (xc * lax.rsqrt(var + 1e-5)) * g_ref[...] + beta_ref[...]

    # q projection only.  In `linear_attention`, softmax(score) rows sum to 1,
    # so einsum('bhnk,bhkc->bhnk', q/4, score) == q/4: the k/v path is a no-op
    # and is elided (differences are at float-rounding level).
    q = jnp.dot(h, wq_ref[...], preferred_element_type=jnp.float32)

    # RoPE on all heads at once; rotate_half is a signed pair-swap permutation
    # (pairs never straddle a head boundary) expressed as one constant matmul.
    q = q * cos_ref[...] + jnp.dot(q, rot_ref[...],
                                   preferred_element_type=jnp.float32) * sin_ref[...]
    q = q * 0.25

    # Per-head softmax over the lane axis, lane-dense (no slicing / reshaping):
    # subtract the per-row global max (shift-invariant per head), then broadcast
    # the per-head sums with a block-diagonal-ones matmul.
    m = jnp.max(q, axis=-1, keepdims=True)
    e = jnp.exp(q - m)
    denom = jnp.dot(e, seg_ref[...], preferred_element_type=jnp.float32)
    att = e / denom                                           # (S, E), heads packed

    out = jnp.dot(att, wo_ref[...], preferred_element_type=jnp.float32)
    o_ref[...] = (x + out).astype(o_ref.dtype)


def attention_residual(x, ln_g, ln_b, w_qkv, w_out, heads):
    """x + Attention(LayerNorm(x)); x: (B, S, E)."""
    B, S, E = x.shape
    Dh = E // heads
    w_q = w_qkv[:, :E]                                        # k/v projections unused
    cos_np, sin_np = _rope_tables_np(S, Dh, heads)
    rot_np = _rotate_half_matrix_np(E)
    seg_np = _head_blockdiag_ones_np(E, heads)

    full2d = lambda i: (0, 0)
    return pl.pallas_call(
        _attn_residual_kernel,
        out_shape=jax.ShapeDtypeStruct((B, S, E), x.dtype),
        grid=(B,),
        in_specs=[
            pl.BlockSpec((None, S, E), lambda b: (b, 0, 0)),
            pl.BlockSpec((1, E), full2d),
            pl.BlockSpec((1, E), full2d),
            pl.BlockSpec((E, E), full2d),
            pl.BlockSpec((E, E), full2d),
            pl.BlockSpec((S, E), full2d),
            pl.BlockSpec((S, E), full2d),
            pl.BlockSpec((E, E), full2d),
            pl.BlockSpec((E, E), full2d),
        ],
        out_specs=pl.BlockSpec((None, S, E), lambda b: (b, 0, 0)),
        compiler_params=pltpu.CompilerParams(dimension_semantics=("parallel",)),
    )(x, ln_g.reshape(1, E), ln_b.reshape(1, E), w_q, w_out,
      jnp.asarray(cos_np), jnp.asarray(sin_np), jnp.asarray(rot_np),
      jnp.asarray(seg_np))


# --------------------------------------------------------------------------
# Kernel: fused LayerNorm + MLP(silu) + residual-add
# --------------------------------------------------------------------------
def _mlp_residual_kernel(x_ref, g_ref, beta_ref, w1_ref, b1_ref, w2_ref, b2_ref, o_ref):
    x = x_ref[...]                                            # (S, E)
    mu = jnp.mean(x, axis=-1, keepdims=True)
    xc = x - mu
    var = jnp.mean(xc * xc, axis=-1, keepdims=True)
    h = (xc * lax.rsqrt(var + 1e-5)) * g_ref[...] + beta_ref[...]
    m = jnp.dot(h, w1_ref[...], preferred_element_type=jnp.float32) + b1_ref[...]
    m = m * (1.0 / (1.0 + jnp.exp(-m)))                        # SiLU
    y = jnp.dot(m, w2_ref[...], preferred_element_type=jnp.float32) + b2_ref[...]
    o_ref[...] = (x + y).astype(o_ref.dtype)


def mlp_residual(x, ln_g, ln_b, w1, b1, w2, b2):
    """x + MLP(LayerNorm(x)); x: (B, S, E); hidden 3E stays in VMEM."""
    B, S, E = x.shape
    H = w1.shape[1]
    full2d = lambda i: (0, 0)
    return pl.pallas_call(
        _mlp_residual_kernel,
        out_shape=jax.ShapeDtypeStruct((B, S, E), x.dtype),
        grid=(B,),
        in_specs=[
            pl.BlockSpec((None, S, E), lambda b: (b, 0, 0)),
            pl.BlockSpec((1, E), full2d),
            pl.BlockSpec((1, E), full2d),
            pl.BlockSpec((E, H), full2d),
            pl.BlockSpec((1, H), full2d),
            pl.BlockSpec((H, E), full2d),
            pl.BlockSpec((1, E), full2d),
        ],
        out_specs=pl.BlockSpec((None, S, E), lambda b: (b, 0, 0)),
        compiler_params=pltpu.CompilerParams(dimension_semantics=("parallel",)),
    )(x, ln_g.reshape(1, E), ln_b.reshape(1, E), w1, b1.reshape(1, H),
      w2, b2.reshape(1, E))


# --------------------------------------------------------------------------
# Kernel: fused quantizer decode  (linear + LeakyReLU + LayerNorm)
# --------------------------------------------------------------------------
def _qdec_kernel(z_ref, w_ref, b_ref, g_ref, beta_ref, o_ref):
    h = jnp.dot(z_ref[...], w_ref[...], preferred_element_type=jnp.float32) + b_ref[...]
    h = jnp.where(h >= 0.0, h, 0.01 * h)                       # LeakyReLU(0.01)
    mu = jnp.mean(h, axis=-1, keepdims=True)
    hc = h - mu
    var = jnp.mean(hc * hc, axis=-1, keepdims=True)
    o_ref[...] = ((hc * lax.rsqrt(var + 1e-5)) * g_ref[...] + beta_ref[...]).astype(o_ref.dtype)


def quantizer_decode(qp, z):
    orig = z.shape
    K = orig[-1]
    E = qp["dec"]["w"].shape[1]
    z2 = z.reshape(-1, K)
    M = z2.shape[0]
    tm = _pick_tm(M)
    out = pl.pallas_call(
        _qdec_kernel,
        out_shape=jax.ShapeDtypeStruct((M, E), z.dtype),
        grid=(M // tm,),
        in_specs=[
            pl.BlockSpec((tm, K), lambda i: (i, 0)),
            pl.BlockSpec((K, E), lambda i: (0, 0)),
            pl.BlockSpec((1, E), lambda i: (0, 0)),
            pl.BlockSpec((1, E), lambda i: (0, 0)),
            pl.BlockSpec((1, E), lambda i: (0, 0)),
        ],
        out_specs=pl.BlockSpec((tm, E), lambda i: (i, 0)),
        compiler_params=pltpu.CompilerParams(dimension_semantics=("parallel",)),
    )(z2, qp["dec"]["w"], qp["dec"]["b"].reshape(1, E),
      qp["ln"]["g"].reshape(1, E), qp["ln"]["b"].reshape(1, E))
    return out.reshape(orig[:-1] + (E,))


# --------------------------------------------------------------------------
# Model glue (plain JAX under jit)
# --------------------------------------------------------------------------
def residual_block_forward(p, x, heads):
    # NOTE: the PyTorch module uses layer_norm_1 for BOTH sub-blocks; preserved.
    x = attention_residual(x, p["ln1"]["g"], p["ln1"]["b"],
                           p["attention"]["linear_1"]["w"],
                           p["attention"]["linear_2"]["w"], heads)
    x = mlp_residual(x, p["ln1"]["g"], p["ln1"]["b"],
                     p["mlp1"]["w"], p["mlp1"]["b"],
                     p["mlp2"]["w"], p["mlp2"]["b"])
    return x


def down_block_forward(p, x, heads):
    B, S, E = x.shape
    T = S // 2
    # rearrange '... (n t) e -> ... t (n e)', n=2
    xx = x.reshape(B, 2, T, E).transpose(0, 2, 1, 3).reshape(B, T, 2 * E)
    x = linear(xx, p["down"]["w"])
    x = residual_block_forward(p["res1"], x, heads)
    x = residual_block_forward(p["res2"], x, heads)
    return x


def up_block_forward(p, x, heads):
    B, T, E = x.shape
    y = linear(x, p["up"]["w"])                                # (B, T, 2E)
    # rearrange '... t (n e) -> ... (n t) e', n=2
    y = y.reshape(B, T, 2, E).transpose(0, 2, 1, 3).reshape(B, 2 * T, E)
    y = residual_block_forward(p["res1"], y, heads)
    y = residual_block_forward(p["res2"], y, heads)
    return y


def autoencoder_forward(params, x, cfg):
    heads = cfg["heads"]
    scale = float(2 ** cfg["quantizer_bits"] // 2)
    # encode
    h = linear(x, params["embedding"]["w"])
    for blk in params["encoder"]:
        h = down_block_forward(blk, h, heads)
    # TODO(synk): straight-through estimator gradient (x + (floor(x)-x).detach())
    # has no backward path here; only the forward value floor(scale*tanh(.)) is kept.
    z = linear(h, params["quantizer"]["enc"]["w"], params["quantizer"]["enc"]["b"],
               act="tanh_scale_floor", scale=scale)
    # decode
    h = quantizer_decode(params["quantizer"], z)
    for blk in params["decoder"]:
        h = up_block_forward(blk, h, heads)
    x_out = linear(h, params["unembedding"]["w"], act="sigmoid")
    return x_out, z


# --------------------------------------------------------------------------
# Deterministic parameter init (synthetic; not loading a checkpoint)
# --------------------------------------------------------------------------
def init_params(key, cfg):
    E = cfg["embedding_dimension"]
    qd = cfg["quantizer_dimension"]
    in_dim = cfg["input_dimension"]
    layers = cfg["layers"]

    def lin(k, fi, fo, bias):
        kw, kb = jax.random.split(k)
        p = {"w": jax.random.normal(kw, (fi, fo), jnp.float32) / jnp.sqrt(fi)}
        p["b"] = (0.01 * jax.random.normal(kb, (fo,), jnp.float32)) if bias else None
        return p

    def ln():
        return {"g": jnp.ones((E,), jnp.float32), "b": jnp.zeros((E,), jnp.float32)}

    def res_block(k):
        k1, k2, k3, k4 = jax.random.split(k, 4)
        return {
            "attention": {"linear_1": lin(k1, E, 3 * E, False),
                          "linear_2": lin(k2, E, E, False)},
            "mlp1": lin(k3, E, 3 * E, True),
            "mlp2": lin(k4, 3 * E, E, True),
            "ln1": ln(),
            # layer_norm_2 exists in the PyTorch module but is never used in forward
        }

    keys = jax.random.split(key, 5 + 2 * layers)
    params = {
        "embedding": lin(keys[0], in_dim, E, False),
        "unembedding": lin(keys[1], E, in_dim, False),
        "quantizer": {
            "enc": lin(keys[2], E, qd, True),
            "dec": lin(keys[3], qd, E, True),
            "ln": ln(),
        },
        "encoder": [],
        "decoder": [],
    }
    for i in range(layers):
        kd, kr1, kr2 = jax.random.split(keys[5 + i], 3)
        params["encoder"].append({"down": lin(kd, 2 * E, E, False),
                                  "res1": res_block(kr1),
                                  "res2": res_block(kr2)})
    for i in range(layers):
        ku, kr1, kr2 = jax.random.split(keys[5 + layers + i], 3)
        params["decoder"].append({"up": lin(ku, E, 2 * E, False),
                                  "res1": res_block(kr1),
                                  "res2": res_block(kr2)})
    return params


# --------------------------------------------------------------------------
if __name__ == "__main__":
    cfg = dict(
        input_dimension=8,
        embedding_dimension=128,
        quantizer_dimension=8,
        quantizer_bits=5,
        heads=4,
        layers=2,
    )
    key = jax.random.PRNGKey(0)
    kp, kx = jax.random.split(key)
    params = init_params(kp, cfg)

    B, S = 2, 32  # S must be divisible by 2**layers
    x = jax.random.normal(kx, (B, S, cfg["input_dimension"]), jnp.float32)

    fwd = jax.jit(lambda p, inp: autoencoder_forward(p, inp, cfg))
    x_out, z = fwd(params, x)
    jax.block_until_ready((x_out, z))

    assert x_out.shape == (B, S, cfg["input_dimension"])
    assert z.shape == (B, S // (2 ** cfg["layers"]), cfg["quantizer_dimension"])
    assert bool(jnp.all(jnp.isfinite(x_out))) and bool(jnp.all(jnp.isfinite(z)))
    print("KERNEL_OK")
</pallas_src>

<mosaic_0001>
module attributes {stable_mosaic.version = 11 : i64} {
  func.func @_linear_kernel(%arg0: i32, %arg1: memref<32x8xf32, #tpu.memory_space<vmem>>, %arg2: memref<8x128xf32, #tpu.memory_space<vmem>>, %arg3: memref<32x128xf32, #tpu.memory_space<vmem>>) attributes {dimension_semantics = [#tpu.dimension_semantics<parallel>], iteration_bounds = array<i64: 2>, scalar_prefetch = 0 : i64, scratch_operands = 0 : i64, tpu.core_type = #tpu.core_type<tc>, window_params = [{transform_indices = @transform_0, window_bounds = array<i64: 32, 8>}, {pipeline_mode = #tpu.pipeline_mode<synchronous>, transform_indices = @transform_1, window_bounds = array<i64: 8, 128>}, {transform_indices = @transform_2, window_bounds = array<i64: 32, 128>}]} {
    %c0 = arith.constant 0 : index
    %c0_0 = arith.constant 0 : index
    %0 = vector.load %arg1[%c0, %c0_0] : memref<32x8xf32, #tpu.memory_space<vmem>>, vector<32x8xf32>
    %c0_1 = arith.constant 0 : index
    %c0_2 = arith.constant 0 : index
    %1 = vector.load %arg2[%c0_1, %c0_2] : memref<8x128xf32, #tpu.memory_space<vmem>>, vector<8x128xf32>
    %cst = arith.constant dense<0.000000e+00> : vector<32x128xf32>
    %2 = tpu.matmul %0, %1, %cst {dimension_numbers = #tpu.dot_dimension_numbers<[1], [0], [0], [1], [0, 0, 1, 1], [], []>} : vector<32x8xf32>, vector<8x128xf32>, vector<32x128xf32> -> vector<32x128xf32>
    %c0_3 = arith.constant 0 : index
    %c0_4 = arith.constant 0 : index
    %3 = vector.load %arg3[%c0_3, %c0_4] : memref<32x128xf32, #tpu.memory_space<vmem>>, vector<32x128xf32>
    tpu.vector_store %arg3[%c0_3, %c0_4], %2 {strides = array<i32>} : memref<32x128xf32, #tpu.memory_space<vmem>>, vector<32x128xf32>,
    return
  }
  func.func @transform_0(%arg0: i32) -> (i32, i32) {
    %c0_i32 = arith.constant 0 : i32
    %c0_i32_0 = arith.constant 0 : i32
    return %arg0, %c0_i32 : i32, i32
  }
  func.func @transform_1(%arg0: i32) -> (i32, i32) {
    %c0_i32 = arith.constant 0 : i32
    %c0_i32_0 = arith.constant 0 : i32
    %c0_i32_1 = arith.constant 0 : i32
    return %c0_i32, %c0_i32_0 : i32, i32
  }
  func.func @transform_2(%arg0: i32) -> (i32, i32) {
    %c0_i32 = arith.constant 0 : i32
    %c0_i32_0 = arith.constant 0 : i32
    return %arg0, %c0_i32 : i32, i32
  }
}

module attributes {stable_mosaic.version = 11 : i64} {
  func.func @_linear_kernel(%arg0: i32, %arg1: memref<16x256xf32, #tpu.memory_space<vmem>>, %arg2: memref<256x128xf32, #tpu.memory_space<vmem>>, %arg3: memref<16x128xf32, #tpu.memory_space<vmem>>) attributes {dimension_semantics = [#tpu.dimension_semantics<parallel>], iteration_bounds = array<i64: 2>, scalar_prefetch = 0 : i64, scratch_operands = 0 : i64, tpu.core_type = #tpu.core_type<tc>, window_params = [{transform_indices = @transform_0, window_bounds = array<i64: 16, 256>}, {pipeline_mode = #tpu.pipeline_mode<synchronous>, transform_indices = @transform_1, window_bounds = array<i64: 256, 128>}, {transform_indices = @transform_2, window_bounds = array<i64: 16, 128>}]} {
    %c0 = arith.constant 0 : index
    %c0_0 = arith.constant 0 : index
    %0 = vector.load %arg1[%c0, %c0_0] : memref<16x256xf32, #tpu.memory_space<vmem>>, vector<16x256xf32>
    %c0_1 = arith.constant 0 : index
    %c0_2 = arith.constant 0 : index
    %1 = vector.load %arg2[%c0_1, %c0_2] : memref<256x128xf32, #tpu.memory_space<vmem>>, vector<256x128xf32>
    %cst = arith.constant dense<0.000000e+00> : vector<16x128xf32>
    %2 = tpu.matmul %0, %1, %cst {dimension_numbers = #tpu.dot_dimension_numbers<[1], [0], [0], [1], [0, 0, 1, 1], [], []>} : vector<16x256xf32>, vector<256x128xf32>, vector<16x128xf32> -> vector<16x128xf32>
    %c0_3 = arith.constant 0 : index
    %c0_4 = arith.constant 0 : index
    %3 = vector.load %arg3[%c0_3, %c0_4] : memref<16x128xf32, #tpu.memory_space<vmem>>, vector<16x128xf32>
    tpu.vector_store %arg3[%c0_3, %c0_4], %2 {strides = array<i32>} : memref<16x128xf32, #tpu.memory_space<vmem>>, vector<16x128xf32>,
    return
  }
  func.func @transform_0(%arg0: i32) -> (i32, i32) {
    %c0_i32 = arith.constant 0 : i32
    %c0_i32_0 = arith.constant 0 : i32
    return %arg0, %c0_i32 : i32, i32
  }
  func.func @transform_1(%arg0: i32) -> (i32, i32) {
    %c0_i32 = arith.constant 0 : i32
    %c0_i32_0 = arith.constant 0 : i32
    %c0_i32_1 = arith.constant 0 : i32
    return %c0_i32, %c0_i32_0 : i32, i32
  }
  func.func @transform_2(%arg0: i32) -> (i32, i32) {
    %c0_i32 = arith.constant 0 : i32
    %c0_i32_0 = arith.constant 0 : i32
    return %arg0, %c0_i32 : i32, i32
  }
}

module attributes {stable_mosaic.version = 11 : i64} {
  func.func @_attn_residual_kernel(%arg0: i32, %arg1: memref<1x16x128xf32, #tpu.memory_space<vmem>>, %arg2: memref<1x128xf32, #tpu.memory_space<vmem>>, %arg3: memref<1x128xf32, #tpu.memory_space<vmem>>, %arg4: memref<128x128xf32, #tpu.memory_space<vmem>>, %arg5: memref<128x128xf32, #tpu.memory_space<vmem>>, %arg6: memref<16x128xf32, #tpu.memory_space<vmem>>, %arg7: memref<16x128xf32, #tpu.memory_space<vmem>>, %arg8: memref<128x128xf32, #tpu.memory_space<vmem>>, %arg9: memref<128x128xf32, #tpu.memory_space<vmem>>, %arg10: memref<1x16x128xf32, #tpu.memory_space<vmem>>) attributes {dimension_semantics = [#tpu.dimension_semantics<parallel>], iteration_bounds = array<i64: 2>, scalar_prefetch = 0 : i64, scratch_operands = 0 : i64, tpu.core_type = #tpu.core_type<tc>, window_params = [{transform_indices = @transform_0, window_bounds = array<i64: 1, 16, 128>}, {pipeline_mode = #tpu.pipeline_mode<synchronous>, transform_indices = @transform_1, window_bounds = array<i64: 1, 128>}, {pipeline_mode = #tpu.pipeline_mode<synchronous>, transform_indices = @transform_2, window_bounds = array<i64: 1, 128>}, {pipeline_mode = #tpu.pipeline_mode<synchronous>, transform_indices = @transform_3, window_bounds = array<i64: 128, 128>}, {pipeline_mode = #tpu.pipeline_mode<synchronous>, transform_indices = @transform_4, window_bounds = array<i64: 128, 128>}, {pipeline_mode = #tpu.pipeline_mode<synchronous>, transform_indices = @transform_5, window_bounds = array<i64: 16, 128>}, {pipeline_mode = #tpu.pipeline_mode<synchronous>, transform_indices = @transform_6, window_bounds = array<i64: 16, 128>}, {pipeline_mode = #tpu.pipeline_mode<synchronous>, transform_indices = @transform_7, window_bounds = array<i64: 128, 128>}, {pipeline_mode = #tpu.pipeline_mode<synchronous>, transform_indices = @transform_8, window_bounds = array<i64: 128, 128>}, {transform_indices = @transform_9, window_bounds = array<i64: 1, 16, 128>}]} {
    %c0 = arith.constant 0 : index
    %c0_0 = arith.constant 0 : index
    %c0_1 = arith.constant 0 : index
    %0 = vector.load %arg1[%c0, %c0_0, %c0_1] : memref<1x16x128xf32, #tpu.memory_space<vmem>>, vector<1x16x128xf32>
    %1 = vector.shape_cast %0 : vector<1x16x128xf32> to vector<16x128xf32>
    %cst = arith.constant dense<0.000000e+00> : vector<16xf32>
    %2 = vector.multi_reduction <add>, %1, %cst [1] : vector<16x128xf32> to vector<16xf32>
    %3 = vector.shape_cast %2 : vector<16xf32> to vector<16x1xf32>
    %cst_2 = arith.constant 1.280000e+02 : f32
    %4 = vector.broadcast %cst_2 : f32 to vector<16x1xf32>
    %5 = arith.divf %3, %4 : vector<16x1xf32>
    %6 = vector.broadcast %5 : vector<16x1xf32> to vector<16x128xf32>
    %7 = arith.subf %1, %6 : vector<16x128xf32>
    %8 = arith.mulf %7, %7 : vector<16x128xf32>
    %cst_3 = arith.constant dense<0.000000e+00> : vector<16xf32>
    %9 = vector.multi_reduction <add>, %8, %cst_3 [1] : vector<16x128xf32> to vector<16xf32>
    %10 = vector.shape_cast %9 : vector<16xf32> to vector<16x1xf32>
    %cst_4 = arith.constant 1.280000e+02 : f32
    %11 = vector.broadcast %cst_4 : f32 to vector<16x1xf32>
    %12 = arith.divf %10, %11 : vector<16x1xf32>
    %cst_5 = arith.constant 9.99999974E-6 : f32
    %13 = vector.broadcast %cst_5 : f32 to vector<16x1xf32>
    %14 = arith.addf %12, %13 : vector<16x1xf32>
    %15 = math.rsqrt %14 : vector<16x1xf32>
    %16 = vector.broadcast %15 : vector<16x1xf32> to vector<16x128xf32>
    %17 = arith.mulf %7, %16 : vector<16x128xf32>
    %c0_6 = arith.constant 0 : index
    %c0_7 = arith.constant 0 : index
    %18 = vector.load %arg2[%c0_6, %c0_7] : memref<1x128xf32, #tpu.memory_space<vmem>>, vector<1x128xf32>
    %19 = vector.broadcast %18 : vector<1x128xf32> to vector<16x128xf32>
    %20 = arith.mulf %17, %19 : vector<16x128xf32>
    %c0_8 = arith.constant 0 : index
    %c0_9 = arith.constant 0 : index
    %21 = vector.load %arg3[%c0_8, %c0_9] : memref<1x128xf32, #tpu.memory_space<vmem>>, vector<1x128xf32>
    %22 = vector.broadcast %21 : vector<1x128xf32> to vector<16x128xf32>
    %23 = arith.addf %20, %22 : vector<16x128xf32>
    %c0_10 = arith.constant 0 : index
    %c0_11 = arith.constant 0 : index
    %24 = vector.load %arg4[%c0_10, %c0_11] : memref<128x128xf32, #tpu.memory_space<vmem>>, vector<128x128xf32>
    %cst_12 = arith.constant dense<0.000000e+00> : vector<16x128xf32>
    %25 = tpu.matmul %23, %24, %cst_12 {dimension_numbers = #tpu.dot_dimension_numbers<[1], [0], [0], [1], [0, 0, 1, 1], [], []>} : vector<16x128xf32>, vector<128x128xf32>, vector<16x128xf32> -> vector<16x128xf32>
    %c0_13 = arith.constant 0 : index
    %c0_14 = arith.constant 0 : index
    %26 = vector.load %arg6[%c0_13, %c0_14] : memref<16x128xf32, #tpu.memory_space<vmem>>, vector<16x128xf32>
    %27 = arith.mulf %25, %26 : vector<16x128xf32>
    %c0_15 = arith.constant 0 : index
    %c0_16 = arith.constant 0 : index
    %28 = vector.load %arg8[%c0_15, %c0_16] : memref<128x128xf32, #tpu.memory_space<vmem>>, vector<128x128xf32>
    %cst_17 = arith.constant dense<0.000000e+00> : vector<16x128xf32>
    %29 = tpu.matmul %25, %28, %cst_17 {dimension_numbers = #tpu.dot_dimension_numbers<[1], [0], [0], [1], [0, 0, 1, 1], [], []>} : vector<16x128xf32>, vector<128x128xf32>, vector<16x128xf32> -> vector<16x128xf32>
    %c0_18 = arith.constant 0 : index
    %c0_19 = arith.constant 0 : index
    %30 = vector.load %arg7[%c0_18, %c0_19] : memref<16x128xf32, #tpu.memory_space<vmem>>, vector<16x128xf32>
    %31 = arith.mulf %29, %30 : vector<16x128xf32>
    %32 = arith.addf %27, %31 : vector<16x128xf32>
    %cst_20 = arith.constant 2.500000e-01 : f32
    %33 = vector.broadcast %cst_20 : f32 to vector<16x128xf32>
    %34 = arith.mulf %32, %33 : vector<16x128xf32>
    %cst_21 = arith.constant dense<0xFF800000> : vector<16xf32>
    %35 = vector.multi_reduction <maximumf>, %34, %cst_21 [1] : vector<16x128xf32> to vector<16xf32>
    %36 = vector.shape_cast %35 : vector<16xf32> to vector<16x1xf32>
    %37 = vector.broadcast %36 : vector<16x1xf32> to vector<16x128xf32>
    %38 = arith.subf %34, %37 : vector<16x128xf32>
    %39 = math.exp %38 : vector<16x128xf32>
    %c0_22 = arith.constant 0 : index
    %c0_23 = arith.constant 0 : index
    %40 = vector.load %arg9[%c0_22, %c0_23] : memref<128x128xf32, #tpu.memory_space<vmem>>, vector<128x128xf32>
    %cst_24 = arith.constant dense<0.000000e+00> : vector<16x128xf32>
    %41 = tpu.matmul %39, %40, %cst_24 {dimension_numbers = #tpu.dot_dimension_numbers<[1], [0], [0], [1], [0, 0, 1, 1], [], []>} : vector<16x128xf32>, vector<128x128xf32>, vector<16x128xf32> -> vector<16x128xf32>
    %42 = arith.divf %39, %41 : vector<16x128xf32>
    %c0_25 = arith.constant 0 : index
    %c0_26 = arith.constant 0 : index
    %43 = vector.load %arg5[%c0_25, %c0_26] : memref<128x128xf32, #tpu.memory_space<vmem>>, vector<128x128xf32>
    %cst_27 = arith.constant dense<0.000000e+00> : vector<16x128xf32>
    %44 = tpu.matmul %42, %43, %cst_27 {dimension_numbers = #tpu.dot_dimension_numbers<[1], [0], [0], [1], [0, 0, 1, 1], [], []>} : vector<16x128xf32>, vector<128x128xf32>, vector<16x128xf32> -> vector<16x128xf32>
    %45 = arith.addf %1, %44 : vector<16x128xf32>
    %c0_28 = arith.constant 0 : index
    %c0_29 = arith.constant 0 : index
    %c0_30 = arith.constant 0 : index
    %46 = vector.load %arg10[%c0_28, %c0_29, %c0_30] : memref<1x16x128xf32, #tpu.memory_space<vmem>>, vector<1x16x128xf32>
    %47 = vector.shape_cast %46 : vector<1x16x128xf32> to vector<16x128xf32>
    %48 = vector.shape_cast %45 : vector<16x128xf32> to vector<1x16x128xf32>
    tpu.vector_store %arg10[%c0_28, %c0_29, %c0_30], %48 {strides = array<i32>} : memref<1x16x128xf32, #tpu.memory_space<vmem>>, vector<1x16x128xf32>,
    return
  }
  func.func @transform_0(%arg0: i32) -> (i32, i32, i32) {
    %c0_i32 = arith.constant 0 : i32
    %c0_i32_0 = arith.constant 0 : i32
    %c0_i32_1 = arith.constant 0 : i32
    return %arg0, %c0_i32, %c0_i32_0 : i32, i32, i32
  }
  func.func @transform_1(%arg0: i32) -> (i32, i32) {
    %c0_i32 = arith.constant 0 : i32
    %c0_i32_0 = arith.constant 0 : i32
    %c0_i32_1 = arith.constant 0 : i32
    return %c0_i32, %c0_i32_0 : i32, i32
  }
  func.func @transform_2(%arg0: i32) -> (i32, i32) {
    %c0_i32 = arith.constant 0 : i32
    %c0_i32_0 = arith.constant 0 : i32
    %c0_i32_1 = arith.constant 0 : i32
    return %c0_i32, %c0_i32_0 : i32, i32
  }
  func.func @transform_3(%arg0: i32) -> (i32, i32) {
    %c0_i32 = arith.constant 0 : i32
    %c0_i32_0 = arith.constant 0 : i32
    %c0_i32_1 = arith.constant 0 : i32
    return %c0_i32, %c0_i32_0 : i32, i32
  }
  func.func @transform_4(%arg0: i32) -> (i32, i32) {
    %c0_i32 = arith.constant 0 : i32
    %c0_i32_0 = arith.constant 0 : i32
    %c0_i32_1 = arith.constant 0 : i32
    return %c0_i32, %c0_i32_0 : i32, i32
  }
  func.func @transform_5(%arg0: i32) -> (i32, i32) {
    %c0_i32 = arith.constant 0 : i32
    %c0_i32_0 = arith.constant 0 : i32
    %c0_i32_1 = arith.constant 0 : i32
    return %c0_i32, %c0_i32_0 : i32, i32
  }
  func.func @transform_6(%arg0: i32) -> (i32, i32) {
    %c0_i32 = arith.constant 0 : i32
    %c0_i32_0 = arith.constant 0 : i32
    %c0_i32_1 = arith.constant 0 : i32
    return %c0_i32, %c0_i32_0 : i32, i32
  }
  func.func @transform_7(%arg0: i32) -> (i32, i32) {
    %c0_i32 = arith.constant 0 : i32
    %c0_i32_0 = arith.constant 0 : i32
    %c0_i32_1 = arith.constant 0 : i32
    return %c0_i32, %c0_i32_0 : i32, i32
  }
  func.func @transform_8(%arg0: i32) -> (i32, i32) {
    %c0_i32 = arith.constant 0 : i32
    %c0_i32_0 = arith.constant 0 : i32
    %c0_i32_1 = arith.constant 0 : i32
    return %c0_i32, %c0_i32_0 : i32, i32
  }
  func.func @transform_9(%arg0: i32) -> (i32, i32, i32) {
    %c0_i32 = arith.constant 0 : i32
    %c0_i32_0 = arith.constant 0 : i32
    %c0_i32_1 = arith.constant 0 : i32
    return %arg0, %c0_i32, %c0_i32_0 : i32, i32, i32
  }
}

module attributes {stable_mosaic.version = 11 : i64} {
  func.func @_mlp_residual_kernel(%arg0: i32, %arg1: memref<1x16x128xf32, #tpu.memory_space<vmem>>, %arg2: memref<1x128xf32, #tpu.memory_space<vmem>>, %arg3: memref<1x128xf32, #tpu.memory_space<vmem>>, %arg4: memref<128x384xf32, #tpu.memory_space<vmem>>, %arg5: memref<1x384xf32, #tpu.memory_space<vmem>>, %arg6: memref<384x128xf32, #tpu.memory_space<vmem>>, %arg7: memref<1x128xf32, #tpu.memory_space<vmem>>, %arg8: memref<1x16x128xf32, #tpu.memory_space<vmem>>) attributes {dimension_semantics = [#tpu.dimension_semantics<parallel>], iteration_bounds = array<i64: 2>, scalar_prefetch = 0 : i64, scratch_operands = 0 : i64, tpu.core_type = #tpu.core_type<tc>, window_params = [{transform_indices = @transform_0, window_bounds = array<i64: 1, 16, 128>}, {pipeline_mode = #tpu.pipeline_mode<synchronous>, transform_indices = @transform_1, window_bounds = array<i64: 1, 128>}, {pipeline_mode = #tpu.pipeline_mode<synchronous>, transform_indices = @transform_2, window_bounds = array<i64: 1, 128>}, {pipeline_mode = #tpu.pipeline_mode<synchronous>, transform_indices = @transform_3, window_bounds = array<i64: 128, 384>}, {pipeline_mode = #tpu.pipeline_mode<synchronous>, transform_indices = @transform_4, window_bounds = array<i64: 1, 384>}, {pipeline_mode = #tpu.pipeline_mode<synchronous>, transform_indices = @transform_5, window_bounds = array<i64: 384, 128>}, {pipeline_mode = #tpu.pipeline_mode<synchronous>, transform_indices = @transform_6, window_bounds = array<i64: 1, 128>}, {transform_indices = @transform_7, window_bounds = array<i64: 1, 16, 128>}]} {
    %c0 = arith.constant 0 : index
    %c0_0 = arith.constant 0 : index
    %c0_1 = arith.constant 0 : index
    %0 = vector.load %arg1[%c0, %c0_0, %c0_1] : memref<1x16x128xf32, #tpu.memory_space<vmem>>, vector<1x16x128xf32>
    %1 = vector.shape_cast %0 : vector<1x16x128xf32> to vector<16x128xf32>
    %cst = arith.constant dense<0.000000e+00> : vector<16xf32>
    %2 = vector.multi_reduction <add>, %1, %cst [1] : vector<16x128xf32> to vector<16xf32>
    %3 = vector.shape_cast %2 : vector<16xf32> to vector<16x1xf32>
    %cst_2 = arith.constant 1.280000e+02 : f32
    %4 = vector.broadcast %cst_2 : f32 to vector<16x1xf32>
    %5 = arith.divf %3, %4 : vector<16x1xf32>
    %6 = vector.broadcast %5 : vector<16x1xf32> to vector<16x128xf32>
    %7 = arith.subf %1, %6 : vector<16x128xf32>
    %8 = arith.mulf %7, %7 : vector<16x128xf32>
    %cst_3 = arith.constant dense<0.000000e+00> : vector<16xf32>
    %9 = vector.multi_reduction <add>, %8, %cst_3 [1] : vector<16x128xf32> to vector<16xf32>
    %10 = vector.shape_cast %9 : vector<16xf32> to vector<16x1xf32>
    %cst_4 = arith.constant 1.280000e+02 : f32
    %11 = vector.broadcast %cst_4 : f32 to vector<16x1xf32>
    %12 = arith.divf %10, %11 : vector<16x1xf32>
    %cst_5 = arith.constant 9.99999974E-6 : f32
    %13 = vector.broadcast %cst_5 : f32 to vector<16x1xf32>
    %14 = arith.addf %12, %13 : vector<16x1xf32>
    %15 = math.rsqrt %14 : vector<16x1xf32>
    %16 = vector.broadcast %15 : vector<16x1xf32> to vector<16x128xf32>
    %17 = arith.mulf %7, %16 : vector<16x128xf32>
    %c0_6 = arith.constant 0 : index
    %c0_7 = arith.constant 0 : index
    %18 = vector.load %arg2[%c0_6, %c0_7] : memref<1x128xf32, #tpu.memory_space<vmem>>, vector<1x128xf32>
    %19 = vector.broadcast %18 : vector<1x128xf32> to vector<16x128xf32>
    %20 = arith.mulf %17, %19 : vector<16x128xf32>
    %c0_8 = arith.constant 0 : index
    %c0_9 = arith.constant 0 : index
    %21 = vector.load %arg3[%c0_8, %c0_9] : memref<1x128xf32, #tpu.memory_space<vmem>>, vector<1x128xf32>
    %22 = vector.broadcast %21 : vector<1x128xf32> to vector<16x128xf32>
    %23 = arith.addf %20, %22 : vector<16x128xf32>
    %c0_10 = arith.constant 0 : index
    %c0_11 = arith.constant 0 : index
    %24 = vector.load %arg4[%c0_10, %c0_11] : memref<128x384xf32, #tpu.memory_space<vmem>>, vector<128x384xf32>
    %cst_12 = arith.constant dense<0.000000e+00> : vector<16x384xf32>
    %25 = tpu.matmul %23, %24, %cst_12 {dimension_numbers = #tpu.dot_dimension_numbers<[1], [0], [0], [1], [0, 0, 1, 1], [], []>} : vector<16x128xf32>, vector<128x384xf32>, vector<16x384xf32> -> vector<16x384xf32>
    %c0_13 = arith.constant 0 : index
    %c0_14 = arith.constant 0 : index
    %26 = vector.load %arg5[%c0_13, %c0_14] : memref<1x384xf32, #tpu.memory_space<vmem>>, vector<1x384xf32>
    %27 = vector.broadcast %26 : vector<1x384xf32> to vector<16x384xf32>
    %28 = arith.addf %25, %27 : vector<16x384xf32>
    %cst_15 = arith.constant 0.000000e+00 : f32
    %29 = vector.broadcast %cst_15 : f32 to vector<16x384xf32>
    %30 = arith.subf %29, %28 : vector<16x384xf32>
    %31 = math.exp %30 : vector<16x384xf32>
    %cst_16 = arith.constant 1.000000e+00 : f32
    %32 = vector.broadcast %cst_16 : f32 to vector<16x384xf32>
    %33 = arith.addf %32, %31 : vector<16x384xf32>
    %cst_17 = arith.constant 1.000000e+00 : f32
    %34 = vector.broadcast %cst_17 : f32 to vector<16x384xf32>
    %35 = arith.divf %34, %33 : vector<16x384xf32>
    %36 = arith.mulf %28, %35 : vector<16x384xf32>
    %c0_18 = arith.constant 0 : index
    %c0_19 = arith.constant 0 : index
    %37 = vector.load %arg6[%c0_18, %c0_19] : memref<384x128xf32, #tpu.memory_space<vmem>>, vector<384x128xf32>
    %cst_20 = arith.constant dense<0.000000e+00> : vector<16x128xf32>
    %38 = tpu.matmul %36, %37, %cst_20 {dimension_numbers = #tpu.dot_dimension_numbers<[1], [0], [0], [1], [0, 0, 1, 1], [], []>} : vector<16x384xf32>, vector<384x128xf32>, vector<16x128xf32> -> vector<16x128xf32>
    %c0_21 = arith.constant 0 : index
    %c0_22 = arith.constant 0 : index
    %39 = vector.load %arg7[%c0_21, %c0_22] : memref<1x128xf32, #tpu.memory_space<vmem>>, vector<1x128xf32>
    %40 = vector.broadcast %39 : vector<1x128xf32> to vector<16x128xf32>
    %41 = arith.addf %38, %40 : vector<16x128xf32>
    %42 = arith.addf %1, %41 : vector<16x128xf32>
    %c0_23 = arith.constant 0 : index
    %c0_24 = arith.constant 0 : index
    %c0_25 = arith.constant 0 : index
    %43 = vector.load %arg8[%c0_23, %c0_24, %c0_25] : memref<1x16x128xf32, #tpu.memory_space<vmem>>, vector<1x16x128xf32>
    %44 = vector.shape_cast %43 : vector<1x16x128xf32> to vector<16x128xf32>
    %45 = vector.shape_cast %42 : vector<16x128xf32> to vector<1x16x128xf32>
    tpu.vector_store %arg8[%c0_23, %c0_24, %c0_25], %45 {strides = array<i32>} : memref<1x16x128xf32, #tpu.memory_space<vmem>>, vector<1x16x128xf32>,
    return
  }
  func.func @transform_0(%arg0: i32) -> (i32, i32, i32) {
    %c0_i32 = arith.constant 0 : i32
    %c0_i32_0 = arith.constant 0 : i32
    %c0_i32_1 = arith.constant 0 : i32
    return %arg0, %c0_i32, %c0_i32_0 : i32, i32, i32
  }
  func.func @transform_1(%arg0: i32) -> (i32, i32) {
    %c0_i32 = arith.constant 0 : i32
    %c0_i32_0 = arith.constant 0 : i32
    %c0_i32_1 = arith.constant 0 : i32
    return %c0_i32, %c0_i32_0 : i32, i32
  }
  func.func @transform_2(%arg0: i32) -> (i32, i32) {
    %c0_i32 = arith.constant 0 : i32
    %c0_i32_0 = arith.constant 0 : i32
    %c0_i32_1 = arith.constant 0 : i32
    return %c0_i32, %c0_i32_0 : i32, i32
  }
  func.func @transform_3(%arg0: i32) -> (i32, i32) {
    %c0_i32 = arith.constant 0 : i32
    %c0_i32_0 = arith.constant 0 : i32
    %c0_i32_1 = arith.constant 0 : i32
    return %c0_i32, %c0_i32_0 : i32, i32
  }
  func.func @transform_4(%arg0: i32) -> (i32, i32) {
    %c0_i32 = arith.constant 0 : i32
    %c0_i32_0 = arith.constant 0 : i32
    %c0_i32_1 = arith.constant 0 : i32
    return %c0_i32, %c0_i32_0 : i32, i32
  }
  func.func @transform_5(%arg0: i32) -> (i32, i32) {
    %c0_i32 = arith.constant 0 : i32
    %c0_i32_0 = arith.constant 0 : i32
    %c0_i32_1 = arith.constant 0 : i32
    return %c0_i32, %c0_i32_0 : i32, i32
  }
  func.func @transform_6(%arg0: i32) -> (i32, i32) {
    %c0_i32 = arith.constant 0 : i32
    %c0_i32_0 = arith.constant 0 : i32
    %c0_i32_1 = arith.constant 0 : i32
    return %c0_i32, %c0_i32_0 : i32, i32
  }
  func.func @transform_7(%arg0: i32) -> (i32, i32, i32) {
    %c0_i32 = arith.constant 0 : i32
    %c0_i32_0 = arith.constant 0 : i32
    %c0_i32_1 = arith.constant 0 : i32
    return %arg0, %c0_i32, %c0_i32_0 : i32, i32, i32
  }
}

module attributes {stable_mosaic.version = 11 : i64} {
  func.func @_linear_kernel(%arg0: i32, %arg1: memref<8x256xf32, #tpu.memory_space<vmem>>, %arg2: memref<256x128xf32, #tpu.memory_space<vmem>>, %arg3: memref<8x128xf32, #tpu.memory_space<vmem>>) attributes {dimension_semantics = [#tpu.dimension_semantics<parallel>], iteration_bounds = array<i64: 2>, scalar_prefetch = 0 : i64, scratch_operands = 0 : i64, tpu.core_type = #tpu.core_type<tc>, window_params = [{transform_indices = @transform_0, window_bounds = array<i64: 8, 256>}, {pipeline_mode = #tpu.pipeline_mode<synchronous>, transform_indices = @transform_1, window_bounds = array<i64: 256, 128>}, {transform_indices = @transform_2, window_bounds = array<i64: 8, 128>}]} {
    %c0 = arith.constant 0 : index
    %c0_0 = arith.constant 0 : index
    %0 = vector.load %arg1[%c0, %c0_0] : memref<8x256xf32, #tpu.memory_space<vmem>>, vector<8x256xf32>
    %c0_1 = arith.constant 0 : index
    %c0_2 = arith.constant 0 : index
    %1 = vector.load %arg2[%c0_1, %c0_2] : memref<256x128xf32, #tpu.memory_space<vmem>>, vector<256x128xf32>
    %cst = arith.constant dense<0.000000e+00> : vector<8x128xf32>
    %2 = tpu.matmul %0, %1, %cst {dimension_numbers = #tpu.dot_dimension_numbers<[1], [0], [0], [1], [0, 0, 1, 1], [], []>} : vector<8x256xf32>, vector<256x128xf32>, vector<8x128xf32> -> vector<8x128xf32>
    %c0_3 = arith.constant 0 : index
    %c0_4 = arith.constant 0 : index
    %3 = vector.load %arg3[%c0_3, %c0_4] : memref<8x128xf32, #tpu.memory_space<vmem>>, vector<8x128xf32>
    tpu.vector_store %arg3[%c0_3, %c0_4], %2 {strides = array<i32>} : memref<8x128xf32, #tpu.memory_space<vmem>>, vector<8x128xf32>,
    return
  }
  func.func @transform_0(%arg0: i32) -> (i32, i32) {
    %c0_i32 = arith.constant 0 : i32
    %c0_i32_0 = arith.constant 0 : i32
    return %arg0, %c0_i32 : i32, i32
  }
  func.func @transform_1(%arg0: i32) -> (i32, i32) {
    %c0_i32 = arith.constant 0 : i32
    %c0_i32_0 = arith.constant 0 : i32
    %c0_i32_1 = arith.constant 0 : i32
    return %c0_i32, %c0_i32_0 : i32, i32
  }
  func.func @transform_2(%arg0: i32) -> (i32, i32) {
    %c0_i32 = arith.constant 0 : i32
    %c0_i32_0 = arith.constant 0 : i32
    return %arg0, %c0_i32 : i32, i32
  }
}

module attributes {stable_mosaic.version = 11 : i64} {
  func.func @_attn_residual_kernel(%arg0: i32, %arg1: memref<1x8x128xf32, #tpu.memory_space<vmem>>, %arg2: memref<1x128xf32, #tpu.memory_space<vmem>>, %arg3: memref<1x128xf32, #tpu.memory_space<vmem>>, %arg4: memref<128x128xf32, #tpu.memory_space<vmem>>, %arg5: memref<128x128xf32, #tpu.memory_space<vmem>>, %arg6: memref<8x128xf32, #tpu.memory_space<vmem>>, %arg7: memref<8x128xf32, #tpu.memory_space<vmem>>, %arg8: memref<128x128xf32, #tpu.memory_space<vmem>>, %arg9: memref<128x128xf32, #tpu.memory_space<vmem>>, %arg10: memref<1x8x128xf32, #tpu.memory_space<vmem>>) attributes {dimension_semantics = [#tpu.dimension_semantics<parallel>], iteration_bounds = array<i64: 2>, scalar_prefetch = 0 : i64, scratch_operands = 0 : i64, tpu.core_type = #tpu.core_type<tc>, window_params = [{transform_indices = @transform_0, window_bounds = array<i64: 1, 8, 128>}, {pipeline_mode = #tpu.pipeline_mode<synchronous>, transform_indices = @transform_1, window_bounds = array<i64: 1, 128>}, {pipeline_mode = #tpu.pipeline_mode<synchronous>, transform_indices = @transform_2, window_bounds = array<i64: 1, 128>}, {pipeline_mode = #tpu.pipeline_mode<synchronous>, transform_indices = @transform_3, window_bounds = array<i64: 128, 128>}, {pipeline_mode = #tpu.pipeline_mode<synchronous>, transform_indices = @transform_4, window_bounds = array<i64: 128, 128>}, {pipeline_mode = #tpu.pipeline_mode<synchronous>, transform_indices = @transform_5, window_bounds = array<i64: 8, 128>}, {pipeline_mode = #tpu.pipeline_mode<synchronous>, transform_indices = @transform_6, window_bounds = array<i64: 8, 128>}, {pipeline_mode = #tpu.pipeline_mode<synchronous>, transform_indices = @transform_7, window_bounds = array<i64: 128, 128>}, {pipeline_mode = #tpu.pipeline_mode<synchronous>, transform_indices = @transform_8, window_bounds = array<i64: 128, 128>}, {transform_indices = @transform_9, window_bounds = array<i64: 1, 8, 128>}]} {
    %c0 = arith.constant 0 : index
    %c0_0 = arith.constant 0 : index
    %c0_1 = arith.constant 0 : index
    %0 = vector.load %arg1[%c0, %c0_0, %c0_1] : memref<1x8x128xf32, #tpu.memory_space<vmem>>, vector<1x8x128xf32>
    %1 = vector.shape_cast %0 : vector<1x8x128xf32> to vector<8x128xf32>
    %cst = arith.constant dense<0.000000e+00> : vector<8xf32>
    %2 = vector.multi_reduction <add>, %1, %cst [1] : vector<8x128xf32> to vector<8xf32>
    %3 = vector.shape_cast %2 : vector<8xf32> to vector<8x1xf32>
    %cst_2 = arith.constant 1.280000e+02 : f32
    %4 = vector.broadcast %cst_2 : f32 to vector<8x1xf32>
    %5 = arith.divf %3, %4 : vector<8x1xf32>
    %6 = vector.broadcast %5 : vector<8x1xf32> to vector<8x128xf32>
    %7 = arith.subf %1, %6 : vector<8x128xf32>
    %8 = arith.mulf %7, %7 : vector<8x128xf32>
    %cst_3 = arith.constant dense<0.000000e+00> : vector<8xf32>
    %9 = vector.multi_reduction <add>, %8, %cst_3 [1] : vector<8x128xf32> to vector<8xf32>
    %10 = vector.shape_cast %9 : vector<8xf32> to vector<8x1xf32>
    %cst_4 = arith.constant 1.280000e+02 : f32
    %11 = vector.broadcast %cst_4 : f32 to vector<8x1xf32>
    %12 = arith.divf %10, %11 : vector<8x1xf32>
    %cst_5 = arith.constant 9.99999974E-6 : f32
    %13 = vector.broadcast %cst_5 : f32 to vector<8x1xf32>
    %14 = arith.addf %12, %13 : vector<8x1xf32>
    %15 = math.rsqrt %14 : vector<8x1xf32>
    %16 = vector.broadcast %15 : vector<8x1xf32> to vector<8x128xf32>
    %17 = arith.mulf %7, %16 : vector<8x128xf32>
    %c0_6 = arith.constant 0 : index
    %c0_7 = arith.constant 0 : index
    %18 = vector.load %arg2[%c0_6, %c0_7] : memref<1x128xf32, #tpu.memory_space<vmem>>, vector<1x128xf32>
    %19 = vector.broadcast %18 : vector<1x128xf32> to vector<8x128xf32>
    %20 = arith.mulf %17, %19 : vector<8x128xf32>
    %c0_8 = arith.constant 0 : index
    %c0_9 = arith.constant 0 : index
    %21 = vector.load %arg3[%c0_8, %c0_9] : memref<1x128xf32, #tpu.memory_space<vmem>>, vector<1x128xf32>
    %22 = vector.broadcast %21 : vector<1x128xf32> to vector<8x128xf32>
    %23 = arith.addf %20, %22 : vector<8x128xf32>
    %c0_10 = arith.constant 0 : index
    %c0_11 = arith.constant 0 : index
    %24 = vector.load %arg4[%c0_10, %c0_11] : memref<128x128xf32, #tpu.memory_space<vmem>>, vector<128x128xf32>
    %cst_12 = arith.constant dense<0.000000e+00> : vector<8x128xf32>
    %25 = tpu.matmul %23, %24, %cst_12 {dimension_numbers = #tpu.dot_dimension_numbers<[1], [0], [0], [1], [0, 0, 1, 1], [], []>} : vector<8x128xf32>, vector<128x128xf32>, vector<8x128xf32> -> vector<8x128xf32>
    %c0_13 = arith.constant 0 : index
    %c0_14 = arith.constant 0 : index
    %26 = vector.load %arg6[%c0_13, %c0_14] : memref<8x128xf32, #tpu.memory_space<vmem>>, vector<8x128xf32>
    %27 = arith.mulf %25, %26 : vector<8x128xf32>
    %c0_15 = arith.constant 0 : index
    %c0_16 = arith.constant 0 : index
    %28 = vector.load %arg8[%c0_15, %c0_16] : memref<128x128xf32, #tpu.memory_space<vmem>>, vector<128x128xf32>
    %cst_17 = arith.constant dense<0.000000e+00> : vector<8x128xf32>
    %29 = tpu.matmul %25, %28, %cst_17 {dimension_numbers = #tpu.dot_dimension_numbers<[1], [0], [0], [1], [0, 0, 1, 1], [], []>} : vector<8x128xf32>, vector<128x128xf32>, vector<8x128xf32> -> vector<8x128xf32>
    %c0_18 = arith.constant 0 : index
    %c0_19 = arith.constant 0 : index
    %30 = vector.load %arg7[%c0_18, %c0_19] : memref<8x128xf32, #tpu.memory_space<vmem>>, vector<8x128xf32>
    %31 = arith.mulf %29, %30 : vector<8x128xf32>
    %32 = arith.addf %27, %31 : vector<8x128xf32>
    %cst_20 = arith.constant 2.500000e-01 : f32
    %33 = vector.broadcast %cst_20 : f32 to vector<8x128xf32>
    %34 = arith.mulf %32, %33 : vector<8x128xf32>
    %cst_21 = arith.constant dense<0xFF800000> : vector<8xf32>
    %35 = vector.multi_reduction <maximumf>, %34, %cst_21 [1] : vector<8x128xf32> to vector<8xf32>
    %36 = vector.shape_cast %35 : vector<8xf32> to vector<8x1xf32>
    %37 = vector.broadcast %36 : vector<8x1xf32> to vector<8x128xf32>
    %38 = arith.subf %34, %37 : vector<8x128xf32>
    %39 = math.exp %38 : vector<8x128xf32>
    %c0_22 = arith.constant 0 : index
    %c0_23 = arith.constant 0 : index
    %40 = vector.load %arg9[%c0_22, %c0_23] : memref<128x128xf32, #tpu.memory_space<vmem>>, vector<128x128xf32>
    %cst_24 = arith.constant dense<0.000000e+00> : vector<8x128xf32>
    %41 = tpu.matmul %39, %40, %cst_24 {dimension_numbers = #tpu.dot_dimension_numbers<[1], [0], [0], [1], [0, 0, 1, 1], [], []>} : vector<8x128xf32>, vector<128x128xf32>, vector<8x128xf32> -> vector<8x128xf32>
    %42 = arith.divf %39, %41 : vector<8x128xf32>
    %c0_25 = arith.constant 0 : index
    %c0_26 = arith.constant 0 : index
    %43 = vector.load %arg5[%c0_25, %c0_26] : memref<128x128xf32, #tpu.memory_space<vmem>>, vector<128x128xf32>
    %cst_27 = arith.constant dense<0.000000e+00> : vector<8x128xf32>
    %44 = tpu.matmul %42, %43, %cst_27 {dimension_numbers = #tpu.dot_dimension_numbers<[1], [0], [0], [1], [0, 0, 1, 1], [], []>} : vector<8x128xf32>, vector<128x128xf32>, vector<8x128xf32> -> vector<8x128xf32>
    %45 = arith.addf %1, %44 : vector<8x128xf32>
    %c0_28 = arith.constant 0 : index
    %c0_29 = arith.constant 0 : index
    %c0_30 = arith.constant 0 : index
    %46 = vector.load %arg10[%c0_28, %c0_29, %c0_30] : memref<1x8x128xf32, #tpu.memory_space<vmem>>, vector<1x8x128xf32>
    %47 = vector.shape_cast %46 : vector<1x8x128xf32> to vector<8x128xf32>
    %48 = vector.shape_cast %45 : vector<8x128xf32> to vector<1x8x128xf32>
    tpu.vector_store %arg10[%c0_28, %c0_29, %c0_30], %48 {strides = array<i32>} : memref<1x8x128xf32, #tpu.memory_space<vmem>>, vector<1x8x128xf32>,
    return
  }
  func.func @transform_0(%arg0: i32) -> (i32, i32, i32) {
    %c0_i32 = arith.constant 0 : i32
    %c0_i32_0 = arith.constant 0 : i32
    %c0_i32_1 = arith.constant 0 : i32
    return %arg0, %c0_i32, %c0_i32_0 : i32, i32, i32
  }
  func.func @transform_1(%arg0: i32) -> (i32, i32) {
    %c0_i32 = arith.constant 0 : i32
    %c0_i32_0 = arith.constant 0 : i32
    %c0_i32_1 = arith.constant 0 : i32
    return %c0_i32, %c0_i32_0 : i32, i32
  }
  func.func @transform_2(%arg0: i32) -> (i32, i32) {
    %c0_i32 = arith.constant 0 : i32
    %c0_i32_0 = arith.constant 0 : i32
    %c0_i32_1 = arith.constant 0 : i32
    return %c0_i32, %c0_i32_0 : i32, i32
  }
  func.func @transform_3(%arg0: i32) -> (i32, i32) {
    %c0_i32 = arith.constant 0 : i32
    %c0_i32_0 = arith.constant 0 : i32
    %c0_i32_1 = arith.constant 0 : i32
    return %c0_i32, %c0_i32_0 : i32, i32
  }
  func.func @transform_4(%arg0: i32) -> (i32, i32) {
    %c0_i32 = arith.constant 0 : i32
    %c0_i32_0 = arith.constant 0 : i32
    %c0_i32_1 = arith.constant 0 : i32
    return %c0_i32, %c0_i32_0 : i32, i32
  }
  func.func @transform_5(%arg0: i32) -> (i32, i32) {
    %c0_i32 = arith.constant 0 : i32
    %c0_i32_0 = arith.constant 0 : i32
    %c0_i32_1 = arith.constant 0 : i32
    return %c0_i32, %c0_i32_0 : i32, i32
  }
  func.func @transform_6(%arg0: i32) -> (i32, i32) {
    %c0_i32 = arith.constant 0 : i32
    %c0_i32_0 = arith.constant 0 : i32
    %c0_i32_1 = arith.constant 0 : i32
    return %c0_i32, %c0_i32_0 : i32, i32
  }
  func.func @transform_7(%arg0: i32) -> (i32, i32) {
    %c0_i32 = arith.constant 0 : i32
    %c0_i32_0 = arith.constant 0 : i32
    %c0_i32_1 = arith.constant 0 : i32
    return %c0_i32, %c0_i32_0 : i32, i32
  }
  func.func @transform_8(%arg0: i32) -> (i32, i32) {
    %c0_i32 = arith.constant 0 : i32
    %c0_i32_0 = arith.constant 0 : i32
    %c0_i32_1 = arith.constant 0 : i32
    return %c0_i32, %c0_i32_0 : i32, i32
  }
  func.func @transform_9(%arg0: i32) -> (i32, i32, i32) {
    %c0_i32 = arith.constant 0 : i32
    %c0_i32_0 = arith.constant 0 : i32
    %c0_i32_1 = arith.constant 0 : i32
    return %arg0, %c0_i32, %c0_i32_0 : i32, i32, i32
  }
}

module attributes {stable_mosaic.version = 11 : i64} {
  func.func @_mlp_residual_kernel(%arg0: i32, %arg1: memref<1x8x128xf32, #tpu.memory_space<vmem>>, %arg2: memref<1x128xf32, #tpu.memory_space<vmem>>, %arg3: memref<1x128xf32, #tpu.memory_space<vmem>>, %arg4: memref<128x384xf32, #tpu.memory_space<vmem>>, %arg5: memref<1x384xf32, #tpu.memory_space<vmem>>, %arg6: memref<384x128xf32, #tpu.memory_space<vmem>>, %arg7: memref<1x128xf32, #tpu.memory_space<vmem>>, %arg8: memref<1x8x128xf32, #tpu.memory_space<vmem>>) attributes {dimension_semantics = [#tpu.dimension_semantics<parallel>], iteration_bounds = array<i64: 2>, scalar_prefetch = 0 : i64, scratch_operands = 0 : i64, tpu.core_type = #tpu.core_type<tc>, window_params = [{transform_indices = @transform_0, window_bounds = array<i64: 1, 8, 128>}, {pipeline_mode = #tpu.pipeline_mode<synchronous>, transform_indices = @transform_1, window_bounds = array<i64: 1, 128>}, {pipeline_mode = #tpu.pipeline_mode<synchronous>, transform_indices = @transform_2, window_bounds = array<i64: 1, 128>}, {pipeline_mode = #tpu.pipeline_mode<synchronous>, transform_indices = @transform_3, window_bounds = array<i64: 128, 384>}, {pipeline_mode = #tpu.pipeline_mode<synchronous>, transform_indices = @transform_4, window_bounds = array<i64: 1, 384>}, {pipeline_mode = #tpu.pipeline_mode<synchronous>, transform_indices = @transform_5, window_bounds = array<i64: 384, 128>}, {pipeline_mode = #tpu.pipeline_mode<synchronous>, transform_indices = @transform_6, window_bounds = array<i64: 1, 128>}, {transform_indices = @transform_7, window_bounds = array<i64: 1, 8, 128>}]} {
    %c0 = arith.constant 0 : index
    %c0_0 = arith.constant 0 : index
    %c0_1 = arith.constant 0 : index
    %0 = vector.load %arg1[%c0, %c0_0, %c0_1] : memref<1x8x128xf32, #tpu.memory_space<vmem>>, vector<1x8x128xf32>
    %1 = vector.shape_cast %0 : vector<1x8x128xf32> to vector<8x128xf32>
    %cst = arith.constant dense<0.000000e+00> : vector<8xf32>
    %2 = vector.multi_reduction <add>, %1, %cst [1] : vector<8x128xf32> to vector<8xf32>
    %3 = vector.shape_cast %2 : vector<8xf32> to vector<8x1xf32>
    %cst_2 = arith.constant 1.280000e+02 : f32
    %4 = vector.broadcast %cst_2 : f32 to vector<8x1xf32>
    %5 = arith.divf %3, %4 : vector<8x1xf32>
    %6 = vector.broadcast %5 : vector<8x1xf32> to vector<8x128xf32>
    %7 = arith.subf %1, %6 : vector<8x128xf32>
    %8 = arith.mulf %7, %7 : vector<8x128xf32>
    %cst_3 = arith.constant dense<0.000000e+00> : vector<8xf32>
    %9 = vector.multi_reduction <add>, %8, %cst_3 [1] : vector<8x128xf32> to vector<8xf32>
    %10 = vector.shape_cast %9 : vector<8xf32> to vector<8x1xf32>
    %cst_4 = arith.constant 1.280000e+02 : f32
    %11 = vector.broadcast %cst_4 : f32 to vector<8x1xf32>
    %12 = arith.divf %10, %11 : vector<8x1xf32>
    %cst_5 = arith.constant 9.99999974E-6 : f32
    %13 = vector.broadcast %cst_5 : f32 to vector<8x1xf32>
    %14 = arith.addf %12, %13 : vector<8x1xf32>
    %15 = math.rsqrt %14 : vector<8x1xf32>
    %16 = vector.broadcast %15 : vector<8x1xf32> to vector<8x128xf32>
    %17 = arith.mulf %7, %16 : vector<8x128xf32>
    %c0_6 = arith.constant 0 : index
    %c0_7 = arith.constant 0 : index
    %18 = vector.load %arg2[%c0_6, %c0_7] : memref<1x128xf32, #tpu.memory_space<vmem>>, vector<1x128xf32>
    %19 = vector.broadcast %18 : vector<1x128xf32> to vector<8x128xf32>
    %20 = arith.mulf %17, %19 : vector<8x128xf32>
    %c0_8 = arith.constant 0 : index
    %c0_9 = arith.constant 0 : index
    %21 = vector.load %arg3[%c0_8, %c0_9] : memref<1x128xf32, #tpu.memory_space<vmem>>, vector<1x128xf32>
    %22 = vector.broadcast %21 : vector<1x128xf32> to vector<8x128xf32>
    %23 = arith.addf %20, %22 : vector<8x128xf32>
    %c0_10 = arith.constant 0 : index
    %c0_11 = arith.constant 0 : index
    %24 = vector.load %arg4[%c0_10, %c0_11] : memref<128x384xf32, #tpu.memory_space<vmem>>, vector<128x384xf32>
    %cst_12 = arith.constant dense<0.000000e+00> : vector<8x384xf32>
    %25 = tpu.matmul %23, %24, %cst_12 {dimension_numbers = #tpu.dot_dimension_numbers<[1], [0], [0], [1], [0, 0, 1, 1], [], []>} : vector<8x128xf32>, vector<128x384xf32>, vector<8x384xf32> -> vector<8x384xf32>
    %c0_13 = arith.constant 0 : index
    %c0_14 = arith.constant 0 : index
    %26 = vector.load %arg5[%c0_13, %c0_14] : memref<1x384xf32, #tpu.memory_space<vmem>>, vector<1x384xf32>
    %27 = vector.broadcast %26 : vector<1x384xf32> to vector<8x384xf32>
    %28 = arith.addf %25, %27 : vector<8x384xf32>
    %cst_15 = arith.constant 0.000000e+00 : f32
    %29 = vector.broadcast %cst_15 : f32 to vector<8x384xf32>
    %30 = arith.subf %29, %28 : vector<8x384xf32>
    %31 = math.exp %30 : vector<8x384xf32>
    %cst_16 = arith.constant 1.000000e+00 : f32
    %32 = vector.broadcast %cst_16 : f32 to vector<8x384xf32>
    %33 = arith.addf %32, %31 : vector<8x384xf32>
    %cst_17 = arith.constant 1.000000e+00 : f32
    %34 = vector.broadcast %cst_17 : f32 to vector<8x384xf32>
    %35 = arith.divf %34, %33 : vector<8x384xf32>
    %36 = arith.mulf %28, %35 : vector<8x384xf32>
    %c0_18 = arith.constant 0 : index
    %c0_19 = arith.constant 0 : index
    %37 = vector.load %arg6[%c0_18, %c0_19] : memref<384x128xf32, #tpu.memory_space<vmem>>, vector<384x128xf32>
    %cst_20 = arith.constant dense<0.000000e+00> : vector<8x128xf32>
    %38 = tpu.matmul %36, %37, %cst_20 {dimension_numbers = #tpu.dot_dimension_numbers<[1], [0], [0], [1], [0, 0, 1, 1], [], []>} : vector<8x384xf32>, vector<384x128xf32>, vector<8x128xf32> -> vector<8x128xf32>
    %c0_21 = arith.constant 0 : index
    %c0_22 = arith.constant 0 : index
    %39 = vector.load %arg7[%c0_21, %c0_22] : memref<1x128xf32, #tpu.memory_space<vmem>>, vector<1x128xf32>
    %40 = vector.broadcast %39 : vector<1x128xf32> to vector<8x128xf32>
    %41 = arith.addf %38, %40 : vector<8x128xf32>
    %42 = arith.addf %1, %41 : vector<8x128xf32>
    %c0_23 = arith.constant 0 : index
    %c0_24 = arith.constant 0 : index
    %c0_25 = arith.constant 0 : index
    %43 = vector.load %arg8[%c0_23, %c0_24, %c0_25] : memref<1x8x128xf32, #tpu.memory_space<vmem>>, vector<1x8x128xf32>
    %44 = vector.shape_cast %43 : vector<1x8x128xf32> to vector<8x128xf32>
    %45 = vector.shape_cast %42 : vector<8x128xf32> to vector<1x8x128xf32>
    tpu.vector_store %arg8[%c0_23, %c0_24, %c0_25], %45 {strides = array<i32>} : memref<1x8x128xf32, #tpu.memory_space<vmem>>, vector<1x8x128xf32>,
    return
  }
  func.func @transform_0(%arg0: i32) -> (i32, i32, i32) {
    %c0_i32 = arith.constant 0 : i32
    %c0_i32_0 = arith.constant 0 : i32
    %c0_i32_1 = arith.constant 0 : i32
    return %arg0, %c0_i32, %c0_i32_0 : i32, i32, i32
  }
  func.func @transform_1(%arg0: i32) -> (i32, i32) {
    %c0_i32 = arith.constant 0 : i32
    %c0_i32_0 = arith.constant 0 : i32
    %c0_i32_1 = arith.constant 0 : i32
    return %c0_i32, %c0_i32_0 : i32, i32
  }
  func.func @transform_2(%arg0: i32) -> (i32, i32) {
    %c0_i32 = arith.constant 0 : i32
    %c0_i32_0 = arith.constant 0 : i32
    %c0_i32_1 = arith.constant 0 : i32
    return %c0_i32, %c0_i32_0 : i32, i32
  }
  func.func @transform_3(%arg0: i32) -> (i32, i32) {
    %c0_i32 = arith.constant 0 : i32
    %c0_i32_0 = arith.constant 0 : i32
    %c0_i32_1 = arith.constant 0 : i32
    return %c0_i32, %c0_i32_0 : i32, i32
  }
  func.func @transform_4(%arg0: i32) -> (i32, i32) {
    %c0_i32 = arith.constant 0 : i32
    %c0_i32_0 = arith.constant 0 : i32
    %c0_i32_1 = arith.constant 0 : i32
    return %c0_i32, %c0_i32_0 : i32, i32
  }
  func.func @transform_5(%arg0: i32) -> (i32, i32) {
    %c0_i32 = arith.constant 0 : i32
    %c0_i32_0 = arith.constant 0 : i32
    %c0_i32_1 = arith.constant 0 : i32
    return %c0_i32, %c0_i32_0 : i32, i32
  }
  func.func @transform_6(%arg0: i32) -> (i32, i32) {
    %c0_i32 = arith.constant 0 : i32
    %c0_i32_0 = arith.constant 0 : i32
    %c0_i32_1 = arith.constant 0 : i32
    return %c0_i32, %c0_i32_0 : i32, i32
  }
  func.func @transform_7(%arg0: i32) -> (i32, i32, i32) {
    %c0_i32 = arith.constant 0 : i32
    %c0_i32_0 = arith.constant 0 : i32
    %c0_i32_1 = arith.constant 0 : i32
    return %arg0, %c0_i32, %c0_i32_0 : i32, i32, i32
  }
}

module attributes {stable_mosaic.version = 11 : i64} {
  func.func @_linear_kernel(%arg0: i32, %arg1: memref<8x128xf32, #tpu.memory_space<vmem>>, %arg2: memref<128x128xf32, #tpu.memory_space<vmem>>, %arg3: memref<1x128xf32, #tpu.memory_space<vmem>>, %arg4: memref<8x128xf32, #tpu.memory_space<vmem>>) attributes {dimension_semantics = [#tpu.dimension_semantics<parallel>], iteration_bounds = array<i64: 2>, scalar_prefetch = 0 : i64, scratch_operands = 0 : i64, tpu.core_type = #tpu.core_type<tc>, window_params = [{transform_indices = @transform_0, window_bounds = array<i64: 8, 128>}, {pipeline_mode = #tpu.pipeline_mode<synchronous>, transform_indices = @transform_1, window_bounds = array<i64: 128, 128>}, {pipeline_mode = #tpu.pipeline_mode<synchronous>, transform_indices = @transform_2, window_bounds = array<i64: 1, 128>}, {transform_indices = @transform_3, window_bounds = array<i64: 8, 128>}]} {
    %c0 = arith.constant 0 : index
    %c0_0 = arith.constant 0 : index
    %0 = vector.load %arg1[%c0, %c0_0] : memref<8x128xf32, #tpu.memory_space<vmem>>, vector<8x128xf32>
    %c0_1 = arith.constant 0 : index
    %c0_2 = arith.constant 0 : index
    %1 = vector.load %arg2[%c0_1, %c0_2] : memref<128x128xf32, #tpu.memory_space<vmem>>, vector<128x128xf32>
    %cst = arith.constant dense<0.000000e+00> : vector<8x128xf32>
    %2 = tpu.matmul %0, %1, %cst {dimension_numbers = #tpu.dot_dimension_numbers<[1], [0], [0], [1], [0, 0, 1, 1], [], []>} : vector<8x128xf32>, vector<128x128xf32>, vector<8x128xf32> -> vector<8x128xf32>
    %c0_3 = arith.constant 0 : index
    %c0_4 = arith.constant 0 : index
    %3 = vector.load %arg3[%c0_3, %c0_4] : memref<1x128xf32, #tpu.memory_space<vmem>>, vector<1x128xf32>
    %4 = vector.broadcast %3 : vector<1x128xf32> to vector<8x128xf32>
    %5 = arith.addf %2, %4 : vector<8x128xf32>
    %6 = math.tanh %5 : vector<8x128xf32>
    %cst_5 = arith.constant 1.600000e+01 : f32
    %7 = vector.broadcast %cst_5 : f32 to vector<8x128xf32>
    %8 = arith.mulf %7, %6 : vector<8x128xf32>
    %9 = math.floor %8 : vector<8x128xf32>
    %c0_6 = arith.constant 0 : index
    %c0_7 = arith.constant 0 : index
    %10 = vector.load %arg4[%c0_6, %c0_7] : memref<8x128xf32, #tpu.memory_space<vmem>>, vector<8x128xf32>
    tpu.vector_store %arg4[%c0_6, %c0_7], %9 {strides = array<i32>} : memref<8x128xf32, #tpu.memory_space<vmem>>, vector<8x128xf32>,
    return
  }
  func.func @transform_0(%arg0: i32) -> (i32, i32) {
    %c0_i32 = arith.constant 0 : i32
    %c0_i32_0 = arith.constant 0 : i32
    return %arg0, %c0_i32 : i32, i32
  }
  func.func @transform_1(%arg0: i32) -> (i32, i32) {
    %c0_i32 = arith.constant 0 : i32
    %c0_i32_0 = arith.constant 0 : i32
    %c0_i32_1 = arith.constant 0 : i32
    return %c0_i32, %c0_i32_0 : i32, i32
  }
  func.func @transform_2(%arg0: i32) -> (i32, i32) {
    %c0_i32 = arith.constant 0 : i32
    %c0_i32_0 = arith.constant 0 : i32
    %c0_i32_1 = arith.constant 0 : i32
    return %c0_i32, %c0_i32_0 : i32, i32
  }
  func.func @transform_3(%arg0: i32) -> (i32, i32) {
    %c0_i32 = arith.constant 0 : i32
    %c0_i32_0 = arith.constant 0 : i32
    return %arg0, %c0_i32 : i32, i32
  }
}

module attributes {stable_mosaic.version = 11 : i64} {
  func.func @_qdec_kernel(%arg0: i32, %arg1: memref<8x8xf32, #tpu.memory_space<vmem>>, %arg2: memref<8x128xf32, #tpu.memory_space<vmem>>, %arg3: memref<1x128xf32, #tpu.memory_space<vmem>>, %arg4: memref<1x128xf32, #tpu.memory_space<vmem>>, %arg5: memref<1x128xf32, #tpu.memory_space<vmem>>, %arg6: memref<8x128xf32, #tpu.memory_space<vmem>>) attributes {dimension_semantics = [#tpu.dimension_semantics<parallel>], iteration_bounds = array<i64: 2>, scalar_prefetch = 0 : i64, scratch_operands = 0 : i64, tpu.core_type = #tpu.core_type<tc>, window_params = [{transform_indices = @transform_0, window_bounds = array<i64: 8, 8>}, {pipeline_mode = #tpu.pipeline_mode<synchronous>, transform_indices = @transform_1, window_bounds = array<i64: 8, 128>}, {pipeline_mode = #tpu.pipeline_mode<synchronous>, transform_indices = @transform_2, window_bounds = array<i64: 1, 128>}, {pipeline_mode = #tpu.pipeline_mode<synchronous>, transform_indices = @transform_3, window_bounds = array<i64: 1, 128>}, {pipeline_mode = #tpu.pipeline_mode<synchronous>, transform_indices = @transform_4, window_bounds = array<i64: 1, 128>}, {transform_indices = @transform_5, window_bounds = array<i64: 8, 128>}]} {
    %c0 = arith.constant 0 : index
    %c0_0 = arith.constant 0 : index
    %0 = vector.load %arg1[%c0, %c0_0] : memref<8x8xf32, #tpu.memory_space<vmem>>, vector<8x8xf32>
    %c0_1 = arith.constant 0 : index
    %c0_2 = arith.constant 0 : index
    %1 = vector.load %arg2[%c0_1, %c0_2] : memref<8x128xf32, #tpu.memory_space<vmem>>, vector<8x128xf32>
    %cst = arith.constant dense<0.000000e+00> : vector<8x128xf32>
    %2 = tpu.matmul %0, %1, %cst {dimension_numbers = #tpu.dot_dimension_numbers<[1], [0], [0], [1], [0, 0, 1, 1], [], []>} : vector<8x8xf32>, vector<8x128xf32>, vector<8x128xf32> -> vector<8x128xf32>
    %c0_3 = arith.constant 0 : index
    %c0_4 = arith.constant 0 : index
    %3 = vector.load %arg3[%c0_3, %c0_4] : memref<1x128xf32, #tpu.memory_space<vmem>>, vector<1x128xf32>
    %4 = vector.broadcast %3 : vector<1x128xf32> to vector<8x128xf32>
    %5 = arith.addf %2, %4 : vector<8x128xf32>
    %cst_5 = arith.constant 0.000000e+00 : f32
    %6 = vector.broadcast %cst_5 : f32 to vector<8x128xf32>
    %7 = arith.cmpf oge, %5, %6 : vector<8x128xf32>
    %cst_6 = arith.constant 0.00999999977 : f32
    %8 = vector.broadcast %cst_6 : f32 to vector<8x128xf32>
    %9 = arith.mulf %8, %5 : vector<8x128xf32>
    %10 = arith.select %7, %5, %9 : vector<8x128xi1>, vector<8x128xf32>
    %cst_7 = arith.constant dense<0.000000e+00> : vector<8xf32>
    %11 = vector.multi_reduction <add>, %10, %cst_7 [1] : vector<8x128xf32> to vector<8xf32>
    %12 = vector.shape_cast %11 : vector<8xf32> to vector<8x1xf32>
    %cst_8 = arith.constant 1.280000e+02 : f32
    %13 = vector.broadcast %cst_8 : f32 to vector<8x1xf32>
    %14 = arith.divf %12, %13 : vector<8x1xf32>
    %15 = vector.broadcast %14 : vector<8x1xf32> to vector<8x128xf32>
    %16 = arith.subf %10, %15 : vector<8x128xf32>
    %17 = arith.mulf %16, %16 : vector<8x128xf32>
    %cst_9 = arith.constant dense<0.000000e+00> : vector<8xf32>
    %18 = vector.multi_reduction <add>, %17, %cst_9 [1] : vector<8x128xf32> to vector<8xf32>
    %19 = vector.shape_cast %18 : vector<8xf32> to vector<8x1xf32>
    %cst_10 = arith.constant 1.280000e+02 : f32
    %20 = vector.broadcast %cst_10 : f32 to vector<8x1xf32>
    %21 = arith.divf %19, %20 : vector<8x1xf32>
    %cst_11 = arith.constant 9.99999974E-6 : f32
    %22 = vector.broadcast %cst_11 : f32 to vector<8x1xf32>
    %23 = arith.addf %21, %22 : vector<8x1xf32>
    %24 = math.rsqrt %23 : vector<8x1xf32>
    %25 = vector.broadcast %24 : vector<8x1xf32> to vector<8x128xf32>
    %26 = arith.mulf %16, %25 : vector<8x128xf32>
    %c0_12 = arith.constant 0 : index
    %c0_13 = arith.constant 0 : index
    %27 = vector.load %arg4[%c0_12, %c0_13] : memref<1x128xf32, #tpu.memory_space<vmem>>, vector<1x128xf32>
    %28 = vector.broadcast %27 : vector<1x128xf32> to vector<8x128xf32>
    %29 = arith.mulf %26, %28 : vector<8x128xf32>
    %c0_14 = arith.constant 0 : index
    %c0_15 = arith.constant 0 : index
    %30 = vector.load %arg5[%c0_14, %c0_15] : memref<1x128xf32, #tpu.memory_space<vmem>>, vector<1x128xf32>
    %31 = vector.broadcast %30 : vector<1x128xf32> to vector<8x128xf32>
    %32 = arith.addf %29, %31 : vector<8x128xf32>
    %c0_16 = arith.constant 0 : index
    %c0_17 = arith.constant 0 : index
    %33 = vector.load %arg6[%c0_16, %c0_17] : memref<8x128xf32, #tpu.memory_space<vmem>>, vector<8x128xf32>
    tpu.vector_store %arg6[%c0_16, %c0_17], %32 {strides = array<i32>} : memref<8x128xf32, #tpu.memory_space<vmem>>, vector<8x128xf32>,
    return
  }
  func.func @transform_0(%arg0: i32) -> (i32, i32) {
    %c0_i32 = arith.constant 0 : i32
    %c0_i32_0 = arith.constant 0 : i32
    return %arg0, %c0_i32 : i32, i32
  }
  func.func @transform_1(%arg0: i32) -> (i32, i32) {
    %c0_i32 = arith.constant 0 : i32
    %c0_i32_0 = arith.constant 0 : i32
    %c0_i32_1 = arith.constant 0 : i32
    return %c0_i32, %c0_i32_0 : i32, i32
  }
  func.func @transform_2(%arg0: i32) -> (i32, i32) {
    %c0_i32 = arith.constant 0 : i32
    %c0_i32_0 = arith.constant 0 : i32
    %c0_i32_1 = arith.constant 0 : i32
    return %c0_i32, %c0_i32_0 : i32, i32
  }
  func.func @transform_3(%arg0: i32) -> (i32, i32) {
    %c0_i32 = arith.constant 0 : i32
    %c0_i32_0 = arith.constant 0 : i32
    %c0_i32_1 = arith.constant 0 : i32
    return %c0_i32, %c0_i32_0 : i32, i32
  }
  func.func @transform_4(%arg0: i32) -> (i32, i32) {
    %c0_i32 = arith.constant 0 : i32
    %c0_i32_0 = arith.constant 0 : i32
    %c0_i32_1 = arith.constant 0 : i32
    return %c0_i32, %c0_i32_0 : i32, i32
  }
  func.func @transform_5(%arg0: i32) -> (i32, i32) {
    %c0_i32 = arith.constant 0 : i32
    %c0_i32_0 = arith.constant 0 : i32
    return %arg0, %c0_i32 : i32, i32
  }
}

module attributes {stable_mosaic.version = 11 : i64} {
  func.func @_linear_kernel(%arg0: i32, %arg1: memref<8x128xf32, #tpu.memory_space<vmem>>, %arg2: memref<128x256xf32, #tpu.memory_space<vmem>>, %arg3: memref<8x256xf32, #tpu.memory_space<vmem>>) attributes {dimension_semantics = [#tpu.dimension_semantics<parallel>], iteration_bounds = array<i64: 2>, scalar_prefetch = 0 : i64, scratch_operands = 0 : i64, tpu.core_type = #tpu.core_type<tc>, window_params = [{transform_indices = @transform_0, window_bounds = array<i64: 8, 128>}, {pipeline_mode = #tpu.pipeline_mode<synchronous>, transform_indices = @transform_1, window_bounds = array<i64: 128, 256>}, {transform_indices = @transform_2, window_bounds = array<i64: 8, 256>}]} {
    %c0 = arith.constant 0 : index
    %c0_0 = arith.constant 0 : index
    %0 = vector.load %arg1[%c0, %c0_0] : memref<8x128xf32, #tpu.memory_space<vmem>>, vector<8x128xf32>
    %c0_1 = arith.constant 0 : index
    %c0_2 = arith.constant 0 : index
    %1 = vector.load %arg2[%c0_1, %c0_2] : memref<128x256xf32, #tpu.memory_space<vmem>>, vector<128x256xf32>
    %cst = arith.constant dense<0.000000e+00> : vector<8x256xf32>
    %2 = tpu.matmul %0, %1, %cst {dimension_numbers = #tpu.dot_dimension_numbers<[1], [0], [0], [1], [0, 0, 1, 1], [], []>} : vector<8x128xf32>, vector<128x256xf32>, vector<8x256xf32> -> vector<8x256xf32>
    %c0_3 = arith.constant 0 : index
    %c0_4 = arith.constant 0 : index
    %3 = vector.load %arg3[%c0_3, %c0_4] : memref<8x256xf32, #tpu.memory_space<vmem>>, vector<8x256xf32>
    tpu.vector_store %arg3[%c0_3, %c0_4], %2 {strides = array<i32>} : memref<8x256xf32, #tpu.memory_space<vmem>>, vector<8x256xf32>,
    return
  }
  func.func @transform_0(%arg0: i32) -> (i32, i32) {
    %c0_i32 = arith.constant 0 : i32
    %c0_i32_0 = arith.constant 0 : i32
    return %arg0, %c0_i32 : i32, i32
  }
  func.func @transform_1(%arg0: i32) -> (i32, i32) {
    %c0_i32 = arith.constant 0 : i32
    %c0_i32_0 = arith.constant 0 : i32
    %c0_i32_1 = arith.constant 0 : i32
    return %c0_i32, %c0_i32_0 : i32, i32
  }
  func.func @transform_2(%arg0: i32) -> (i32, i32) {
    %c0_i32 = arith.constant 0 : i32
    %c0_i32_0 = arith.constant 0 : i32
    return %arg0, %c0_i32 : i32, i32
  }
}

module attributes {stable_mosaic.version = 11 : i64} {
  func.func @_linear_kernel(%arg0: i32, %arg1: memref<16x128xf32, #tpu.memory_space<vmem>>, %arg2: memref<128x256xf32, #tpu.memory_space<vmem>>, %arg3: memref<16x256xf32, #tpu.memory_space<vmem>>) attributes {dimension_semantics = [#tpu.dimension_semantics<parallel>], iteration_bounds = array<i64: 2>, scalar_prefetch = 0 : i64, scratch_operands = 0 : i64, tpu.core_type = #tpu.core_type<tc>, window_params = [{transform_indices = @transform_0, window_bounds = array<i64: 16, 128>}, {pipeline_mode = #tpu.pipeline_mode<synchronous>, transform_indices = @transform_1, window_bounds = array<i64: 128, 256>}, {transform_indices = @transform_2, window_bounds = array<i64: 16, 256>}]} {
    %c0 = arith.constant 0 : index
    %c0_0 = arith.constant 0 : index
    %0 = vector.load %arg1[%c0, %c0_0] : memref<16x128xf32, #tpu.memory_space<vmem>>, vector<16x128xf32>
    %c0_1 = arith.constant 0 : index
    %c0_2 = arith.constant 0 : index
    %1 = vector.load %arg2[%c0_1, %c0_2] : memref<128x256xf32, #tpu.memory_space<vmem>>, vector<128x256xf32>
    %cst = arith.constant dense<0.000000e+00> : vector<16x256xf32>
    %2 = tpu.matmul %0, %1, %cst {dimension_numbers = #tpu.dot_dimension_numbers<[1], [0], [0], [1], [0, 0, 1, 1], [], []>} : vector<16x128xf32>, vector<128x256xf32>, vector<16x256xf32> -> vector<16x256xf32>
    %c0_3 = arith.constant 0 : index
    %c0_4 = arith.constant 0 : index
    %3 = vector.load %arg3[%c0_3, %c0_4] : memref<16x256xf32, #tpu.memory_space<vmem>>, vector<16x256xf32>
    tpu.vector_store %arg3[%c0_3, %c0_4], %2 {strides = array<i32>} : memref<16x256xf32, #tpu.memory_space<vmem>>, vector<16x256xf32>,
    return
  }
  func.func @transform_0(%arg0: i32) -> (i32, i32) {
    %c0_i32 = arith.constant 0 : i32
    %c0_i32_0 = arith.constant 0 : i32
    return %arg0, %c0_i32 : i32, i32
  }
  func.func @transform_1(%arg0: i32) -> (i32, i32) {
    %c0_i32 = arith.constant 0 : i32
    %c0_i32_0 = arith.constant 0 : i32
    %c0_i32_1 = arith.constant 0 : i32
    return %c0_i32, %c0_i32_0 : i32, i32
  }
  func.func @transform_2(%arg0: i32) -> (i32, i32) {
    %c0_i32 = arith.constant 0 : i32
    %c0_i32_0 = arith.constant 0 : i32
    return %arg0, %c0_i32 : i32, i32
  }
}

module attributes {stable_mosaic.version = 11 : i64} {
  func.func @_attn_residual_kernel(%arg0: i32, %arg1: memref<1x32x128xf32, #tpu.memory_space<vmem>>, %arg2: memref<1x128xf32, #tpu.memory_space<vmem>>, %arg3: memref<1x128xf32, #tpu.memory_space<vmem>>, %arg4: memref<128x128xf32, #tpu.memory_space<vmem>>, %arg5: memref<128x128xf32, #tpu.memory_space<vmem>>, %arg6: memref<32x128xf32, #tpu.memory_space<vmem>>, %arg7: memref<32x128xf32, #tpu.memory_space<vmem>>, %arg8: memref<128x128xf32, #tpu.memory_space<vmem>>, %arg9: memref<128x128xf32, #tpu.memory_space<vmem>>, %arg10: memref<1x32x128xf32, #tpu.memory_space<vmem>>) attributes {dimension_semantics = [#tpu.dimension_semantics<parallel>], iteration_bounds = array<i64: 2>, scalar_prefetch = 0 : i64, scratch_operands = 0 : i64, tpu.core_type = #tpu.core_type<tc>, window_params = [{transform_indices = @transform_0, window_bounds = array<i64: 1, 32, 128>}, {pipeline_mode = #tpu.pipeline_mode<synchronous>, transform_indices = @transform_1, window_bounds = array<i64: 1, 128>}, {pipeline_mode = #tpu.pipeline_mode<synchronous>, transform_indices = @transform_2, window_bounds = array<i64: 1, 128>}, {pipeline_mode = #tpu.pipeline_mode<synchronous>, transform_indices = @transform_3, window_bounds = array<i64: 128, 128>}, {pipeline_mode = #tpu.pipeline_mode<synchronous>, transform_indices = @transform_4, window_bounds = array<i64: 128, 128>}, {pipeline_mode = #tpu.pipeline_mode<synchronous>, transform_indices = @transform_5, window_bounds = array<i64: 32, 128>}, {pipeline_mode = #tpu.pipeline_mode<synchronous>, transform_indices = @transform_6, window_bounds = array<i64: 32, 128>}, {pipeline_mode = #tpu.pipeline_mode<synchronous>, transform_indices = @transform_7, window_bounds = array<i64: 128, 128>}, {pipeline_mode = #tpu.pipeline_mode<synchronous>, transform_indices = @transform_8, window_bounds = array<i64: 128, 128>}, {transform_indices = @transform_9, window_bounds = array<i64: 1, 32, 128>}]} {
    %c0 = arith.constant 0 : index
    %c0_0 = arith.constant 0 : index
    %c0_1 = arith.constant 0 : index
    %0 = vector.load %arg1[%c0, %c0_0, %c0_1] : memref<1x32x128xf32, #tpu.memory_space<vmem>>, vector<1x32x128xf32>
    %1 = vector.shape_cast %0 : vector<1x32x128xf32> to vector<32x128xf32>
    %cst = arith.constant dense<0.000000e+00> : vector<32xf32>
    %2 = vector.multi_reduction <add>, %1, %cst [1] : vector<32x128xf32> to vector<32xf32>
    %3 = vector.shape_cast %2 : vector<32xf32> to vector<32x1xf32>
    %cst_2 = arith.constant 1.280000e+02 : f32
    %4 = vector.broadcast %cst_2 : f32 to vector<32x1xf32>
    %5 = arith.divf %3, %4 : vector<32x1xf32>
    %6 = vector.broadcast %5 : vector<32x1xf32> to vector<32x128xf32>
    %7 = arith.subf %1, %6 : vector<32x128xf32>
    %8 = arith.mulf %7, %7 : vector<32x128xf32>
    %cst_3 = arith.constant dense<0.000000e+00> : vector<32xf32>
    %9 = vector.multi_reduction <add>, %8, %cst_3 [1] : vector<32x128xf32> to vector<32xf32>
    %10 = vector.shape_cast %9 : vector<32xf32> to vector<32x1xf32>
    %cst_4 = arith.constant 1.280000e+02 : f32
    %11 = vector.broadcast %cst_4 : f32 to vector<32x1xf32>
    %12 = arith.divf %10, %11 : vector<32x1xf32>
    %cst_5 = arith.constant 9.99999974E-6 : f32
    %13 = vector.broadcast %cst_5 : f32 to vector<32x1xf32>
    %14 = arith.addf %12, %13 : vector<32x1xf32>
    %15 = math.rsqrt %14 : vector<32x1xf32>
    %16 = vector.broadcast %15 : vector<32x1xf32> to vector<32x128xf32>
    %17 = arith.mulf %7, %16 : vector<32x128xf32>
    %c0_6 = arith.constant 0 : index
    %c0_7 = arith.constant 0 : index
    %18 = vector.load %arg2[%c0_6, %c0_7] : memref<1x128xf32, #tpu.memory_space<vmem>>, vector<1x128xf32>
    %19 = vector.broadcast %18 : vector<1x128xf32> to vector<32x128xf32>
    %20 = arith.mulf %17, %19 : vector<32x128xf32>
    %c0_8 = arith.constant 0 : index
    %c0_9 = arith.constant 0 : index
    %21 = vector.load %arg3[%c0_8, %c0_9] : memref<1x128xf32, #tpu.memory_space<vmem>>, vector<1x128xf32>
    %22 = vector.broadcast %21 : vector<1x128xf32> to vector<32x128xf32>
    %23 = arith.addf %20, %22 : vector<32x128xf32>
    %c0_10 = arith.constant 0 : index
    %c0_11 = arith.constant 0 : index
    %24 = vector.load %arg4[%c0_10, %c0_11] : memref<128x128xf32, #tpu.memory_space<vmem>>, vector<128x128xf32>
    %cst_12 = arith.constant dense<0.000000e+00> : vector<32x128xf32>
    %25 = tpu.matmul %23, %24, %cst_12 {dimension_numbers = #tpu.dot_dimension_numbers<[1], [0], [0], [1], [0, 0, 1, 1], [], []>} : vector<32x128xf32>, vector<128x128xf32>, vector<32x128xf32> -> vector<32x128xf32>
    %c0_13 = arith.constant 0 : index
    %c0_14 = arith.constant 0 : index
    %26 = vector.load %arg6[%c0_13, %c0_14] : memref<32x128xf32, #tpu.memory_space<vmem>>, vector<32x128xf32>
    %27 = arith.mulf %25, %26 : vector<32x128xf32>
    %c0_15 = arith.constant 0 : index
    %c0_16 = arith.constant 0 : index
    %28 = vector.load %arg8[%c0_15, %c0_16] : memref<128x128xf32, #tpu.memory_space<vmem>>, vector<128x128xf32>
    %cst_17 = arith.constant dense<0.000000e+00> : vector<32x128xf32>
    %29 = tpu.matmul %25, %28, %cst_17 {dimension_numbers = #tpu.dot_dimension_numbers<[1], [0], [0], [1], [0, 0, 1, 1], [], []>} : vector<32x128xf32>, vector<128x128xf32>, vector<32x128xf32> -> vector<32x128xf32>
    %c0_18 = arith.constant 0 : index
    %c0_19 = arith.constant 0 : index
    %30 = vector.load %arg7[%c0_18, %c0_19] : memref<32x128xf32, #tpu.memory_space<vmem>>, vector<32x128xf32>
    %31 = arith.mulf %29, %30 : vector<32x128xf32>
    %32 = arith.addf %27, %31 : vector<32x128xf32>
    %cst_20 = arith.constant 2.500000e-01 : f32
    %33 = vector.broadcast %cst_20 : f32 to vector<32x128xf32>
    %34 = arith.mulf %32, %33 : vector<32x128xf32>
    %cst_21 = arith.constant dense<0xFF800000> : vector<32xf32>
    %35 = vector.multi_reduction <maximumf>, %34, %cst_21 [1] : vector<32x128xf32> to vector<32xf32>
    %36 = vector.shape_cast %35 : vector<32xf32> to vector<32x1xf32>
    %37 = vector.broadcast %36 : vector<32x1xf32> to vector<32x128xf32>
    %38 = arith.subf %34, %37 : vector<32x128xf32>
    %39 = math.exp %38 : vector<32x128xf32>
    %c0_22 = arith.constant 0 : index
    %c0_23 = arith.constant 0 : index
    %40 = vector.load %arg9[%c0_22, %c0_23] : memref<128x128xf32, #tpu.memory_space<vmem>>, vector<128x128xf32>
    %cst_24 = arith.constant dense<0.000000e+00> : vector<32x128xf32>
    %41 = tpu.matmul %39, %40, %cst_24 {dimension_numbers = #tpu.dot_dimension_numbers<[1], [0], [0], [1], [0, 0, 1, 1], [], []>} : vector<32x128xf32>, vector<128x128xf32>, vector<32x128xf32> -> vector<32x128xf32>
    %42 = arith.divf %39, %41 : vector<32x128xf32>
    %c0_25 = arith.constant 0 : index
    %c0_26 = arith.constant 0 : index
    %43 = vector.load %arg5[%c0_25, %c0_26] : memref<128x128xf32, #tpu.memory_space<vmem>>, vector<128x128xf32>
    %cst_27 = arith.constant dense<0.000000e+00> : vector<32x128xf32>
    %44 = tpu.matmul %42, %43, %cst_27 {dimension_numbers = #tpu.dot_dimension_numbers<[1], [0], [0], [1], [0, 0, 1, 1], [], []>} : vector<32x128xf32>, vector<128x128xf32>, vector<32x128xf32> -> vector<32x128xf32>
    %45 = arith.addf %1, %44 : vector<32x128xf32>
    %c0_28 = arith.constant 0 : index
    %c0_29 = arith.constant 0 : index
    %c0_30 = arith.constant 0 : index
    %46 = vector.load %arg10[%c0_28, %c0_29, %c0_30] : memref<1x32x128xf32, #tpu.memory_space<vmem>>, vector<1x32x128xf32>
    %47 = vector.shape_cast %46 : vector<1x32x128xf32> to vector<32x128xf32>
    %48 = vector.shape_cast %45 : vector<32x128xf32> to vector<1x32x128xf32>
    tpu.vector_store %arg10[%c0_28, %c0_29, %c0_30], %48 {strides = array<i32>} : memref<1x32x128xf32, #tpu.memory_space<vmem>>, vector<1x32x128xf32>,
    return
  }
  func.func @transform_0(%arg0: i32) -> (i32, i32, i32) {
    %c0_i32 = arith.constant 0 : i32
    %c0_i32_0 = arith.constant 0 : i32
    %c0_i32_1 = arith.constant 0 : i32
    return %arg0, %c0_i32, %c0_i32_0 : i32, i32, i32
  }
  func.func @transform_1(%arg0: i32) -> (i32, i32) {
    %c0_i32 = arith.constant 0 : i32
    %c0_i32_0 = arith.constant 0 : i32
    %c0_i32_1 = arith.constant 0 : i32
    return %c0_i32, %c0_i32_0 : i32, i32
  }
  func.func @transform_2(%arg0: i32) -> (i32, i32) {
    %c0_i32 = arith.constant 0 : i32
    %c0_i32_0 = arith.constant 0 : i32
    %c0_i32_1 = arith.constant 0 : i32
    return %c0_i32, %c0_i32_0 : i32, i32
  }
  func.func @transform_3(%arg0: i32) -> (i32, i32) {
    %c0_i32 = arith.constant 0 : i32
    %c0_i32_0 = arith.constant 0 : i32
    %c0_i32_1 = arith.constant 0 : i32
    return %c0_i32, %c0_i32_0 : i32, i32
  }
  func.func @transform_4(%arg0: i32) -> (i32, i32) {
    %c0_i32 = arith.constant 0 : i32
    %c0_i32_0 = arith.constant 0 : i32
    %c0_i32_1 = arith.constant 0 : i32
    return %c0_i32, %c0_i32_0 : i32, i32
  }
  func.func @transform_5(%arg0: i32) -> (i32, i32) {
    %c0_i32 = arith.constant 0 : i32
    %c0_i32_0 = arith.constant 0 : i32
    %c0_i32_1 = arith.constant 0 : i32
    return %c0_i32, %c0_i32_0 : i32, i32
  }
  func.func @transform_6(%arg0: i32) -> (i32, i32) {
    %c0_i32 = arith.constant 0 : i32
    %c0_i32_0 = arith.constant 0 : i32
    %c0_i32_1 = arith.constant 0 : i32
    return %c0_i32, %c0_i32_0 : i32, i32
  }
  func.func @transform_7(%arg0: i32) -> (i32, i32) {
    %c0_i32 = arith.constant 0 : i32
    %c0_i32_0 = arith.constant 0 : i32
    %c0_i32_1 = arith.constant 0 : i32
    return %c0_i32, %c0_i32_0 : i32, i32
  }
  func.func @transform_8(%arg0: i32) -> (i32, i32) {
    %c0_i32 = arith.constant 0 : i32
    %c0_i32_0 = arith.constant 0 : i32
    %c0_i32_1 = arith.constant 0 : i32
    return %c0_i32, %c0_i32_0 : i32, i32
  }
  func.func @transform_9(%arg0: i32) -> (i32, i32, i32) {
    %c0_i32 = arith.constant 0 : i32
    %c0_i32_0 = arith.constant 0 : i32
    %c0_i32_1 = arith.constant 0 : i32
    return %arg0, %c0_i32, %c0_i32_0 : i32, i32, i32
  }
}

module attributes {stable_mosaic.version = 11 : i64} {
  func.func @_mlp_residual_kernel(%arg0: i32, %arg1: memref<1x32x128xf32, #tpu.memory_space<vmem>>, %arg2: memref<1x128xf32, #tpu.memory_space<vmem>>, %arg3: memref<1x128xf32, #tpu.memory_space<vmem>>, %arg4: memref<128x384xf32, #tpu.memory_space<vmem>>, %arg5: memref<1x384xf32, #tpu.memory_space<vmem>>, %arg6: memref<384x128xf32, #tpu.memory_space<vmem>>, %arg7: memref<1x128xf32, #tpu.memory_space<vmem>>, %arg8: memref<1x32x128xf32, #tpu.memory_space<vmem>>) attributes {dimension_semantics = [#tpu.dimension_semantics<parallel>], iteration_bounds = array<i64: 2>, scalar_prefetch = 0 : i64, scratch_operands = 0 : i64, tpu.core_type = #tpu.core_type<tc>, window_params = [{transform_indices = @transform_0, window_bounds = array<i64: 1, 32, 128>}, {pipeline_mode = #tpu.pipeline_mode<synchronous>, transform_indices = @transform_1, window_bounds = array<i64: 1, 128>}, {pipeline_mode = #tpu.pipeline_mode<synchronous>, transform_indices = @transform_2, window_bounds = array<i64: 1, 128>}, {pipeline_mode = #tpu.pipeline_mode<synchronous>, transform_indices = @transform_3, window_bounds = array<i64: 128, 384>}, {pipeline_mode = #tpu.pipeline_mode<synchronous>, transform_indices = @transform_4, window_bounds = array<i64: 1, 384>}, {pipeline_mode = #tpu.pipeline_mode<synchronous>, transform_indices = @transform_5, window_bounds = array<i64: 384, 128>}, {pipeline_mode = #tpu.pipeline_mode<synchronous>, transform_indices = @transform_6, window_bounds = array<i64: 1, 128>}, {transform_indices = @transform_7, window_bounds = array<i64: 1, 32, 128>}]} {
    %c0 = arith.constant 0 : index
    %c0_0 = arith.constant 0 : index
    %c0_1 = arith.constant 0 : index
    %0 = vector.load %arg1[%c0, %c0_0, %c0_1] : memref<1x32x128xf32, #tpu.memory_space<vmem>>, vector<1x32x128xf32>
    %1 = vector.shape_cast %0 : vector<1x32x128xf32> to vector<32x128xf32>
    %cst = arith.constant dense<0.000000e+00> : vector<32xf32>
    %2 = vector.multi_reduction <add>, %1, %cst [1] : vector<32x128xf32> to vector<32xf32>
    %3 = vector.shape_cast %2 : vector<32xf32> to vector<32x1xf32>
    %cst_2 = arith.constant 1.280000e+02 : f32
    %4 = vector.broadcast %cst_2 : f32 to vector<32x1xf32>
    %5 = arith.divf %3, %4 : vector<32x1xf32>
    %6 = vector.broadcast %5 : vector<32x1xf32> to vector<32x128xf32>
    %7 = arith.subf %1, %6 : vector<32x128xf32>
    %8 = arith.mulf %7, %7 : vector<32x128xf32>
    %cst_3 = arith.constant dense<0.000000e+00> : vector<32xf32>
    %9 = vector.multi_reduction <add>, %8, %cst_3 [1] : vector<32x128xf32> to vector<32xf32>
    %10 = vector.shape_cast %9 : vector<32xf32> to vector<32x1xf32>
    %cst_4 = arith.constant 1.280000e+02 : f32
    %11 = vector.broadcast %cst_4 : f32 to vector<32x1xf32>
    %12 = arith.divf %10, %11 : vector<32x1xf32>
    %cst_5 = arith.constant 9.99999974E-6 : f32
    %13 = vector.broadcast %cst_5 : f32 to vector<32x1xf32>
    %14 = arith.addf %12, %13 : vector<32x1xf32>
    %15 = math.rsqrt %14 : vector<32x1xf32>
    %16 = vector.broadcast %15 : vector<32x1xf32> to vector<32x128xf32>
    %17 = arith.mulf %7, %16 : vector<32x128xf32>
    %c0_6 = arith.constant 0 : index
    %c0_7 = arith.constant 0 : index
    %18 = vector.load %arg2[%c0_6, %c0_7] : memref<1x128xf32, #tpu.memory_space<vmem>>, vector<1x128xf32>
    %19 = vector.broadcast %18 : vector<1x128xf32> to vector<32x128xf32>
    %20 = arith.mulf %17, %19 : vector<32x128xf32>
    %c0_8 = arith.constant 0 : index
    %c0_9 = arith.constant 0 : index
    %21 = vector.load %arg3[%c0_8, %c0_9] : memref<1x128xf32, #tpu.memory_space<vmem>>, vector<1x128xf32>
    %22 = vector.broadcast %21 : vector<1x128xf32> to vector<32x128xf32>
    %23 = arith.addf %20, %22 : vector<32x128xf32>
    %c0_10 = arith.constant 0 : index
    %c0_11 = arith.constant 0 : index
    %24 = vector.load %arg4[%c0_10, %c0_11] : memref<128x384xf32, #tpu.memory_space<vmem>>, vector<128x384xf32>
    %cst_12 = arith.constant dense<0.000000e+00> : vector<32x384xf32>
    %25 = tpu.matmul %23, %24, %cst_12 {dimension_numbers = #tpu.dot_dimension_numbers<[1], [0], [0], [1], [0, 0, 1, 1], [], []>} : vector<32x128xf32>, vector<128x384xf32>, vector<32x384xf32> -> vector<32x384xf32>
    %c0_13 = arith.constant 0 : index
    %c0_14 = arith.constant 0 : index
    %26 = vector.load %arg5[%c0_13, %c0_14] : memref<1x384xf32, #tpu.memory_space<vmem>>, vector<1x384xf32>
    %27 = vector.broadcast %26 : vector<1x384xf32> to vector<32x384xf32>
    %28 = arith.addf %25, %27 : vector<32x384xf32>
    %cst_15 = arith.constant 0.000000e+00 : f32
    %29 = vector.broadcast %cst_15 : f32 to vector<32x384xf32>
    %30 = arith.subf %29, %28 : vector<32x384xf32>
    %31 = math.exp %30 : vector<32x384xf32>
    %cst_16 = arith.constant 1.000000e+00 : f32
    %32 = vector.broadcast %cst_16 : f32 to vector<32x384xf32>
    %33 = arith.addf %32, %31 : vector<32x384xf32>
    %cst_17 = arith.constant 1.000000e+00 : f32
    %34 = vector.broadcast %cst_17 : f32 to vector<32x384xf32>
    %35 = arith.divf %34, %33 : vector<32x384xf32>
    %36 = arith.mulf %28, %35 : vector<32x384xf32>
    %c0_18 = arith.constant 0 : index
    %c0_19 = arith.constant 0 : index
    %37 = vector.load %arg6[%c0_18, %c0_19] : memref<384x128xf32, #tpu.memory_space<vmem>>, vector<384x128xf32>
    %cst_20 = arith.constant dense<0.000000e+00> : vector<32x128xf32>
    %38 = tpu.matmul %36, %37, %cst_20 {dimension_numbers = #tpu.dot_dimension_numbers<[1], [0], [0], [1], [0, 0, 1, 1], [], []>} : vector<32x384xf32>, vector<384x128xf32>, vector<32x128xf32> -> vector<32x128xf32>
    %c0_21 = arith.constant 0 : index
    %c0_22 = arith.constant 0 : index
    %39 = vector.load %arg7[%c0_21, %c0_22] : memref<1x128xf32, #tpu.memory_space<vmem>>, vector<1x128xf32>
    %40 = vector.broadcast %39 : vector<1x128xf32> to vector<32x128xf32>
    %41 = arith.addf %38, %40 : vector<32x128xf32>
    %42 = arith.addf %1, %41 : vector<32x128xf32>
    %c0_23 = arith.constant 0 : index
    %c0_24 = arith.constant 0 : index
    %c0_25 = arith.constant 0 : index
    %43 = vector.load %arg8[%c0_23, %c0_24, %c0_25] : memref<1x32x128xf32, #tpu.memory_space<vmem>>, vector<1x32x128xf32>
    %44 = vector.shape_cast %43 : vector<1x32x128xf32> to vector<32x128xf32>
    %45 = vector.shape_cast %42 : vector<32x128xf32> to vector<1x32x128xf32>
    tpu.vector_store %arg8[%c0_23, %c0_24, %c0_25], %45 {strides = array<i32>} : memref<1x32x128xf32, #tpu.memory_space<vmem>>, vector<1x32x128xf32>,
    return
  }
  func.func @transform_0(%arg0: i32) -> (i32, i32, i32) {
    %c0_i32 = arith.constant 0 : i32
    %c0_i32_0 = arith.constant 0 : i32
    %c0_i32_1 = arith.constant 0 : i32
    return %arg0, %c0_i32, %c0_i32_0 : i32, i32, i32
  }
  func.func @transform_1(%arg0: i32) -> (i32, i32) {
    %c0_i32 = arith.constant 0 : i32
    %c0_i32_0 = arith.constant 0 : i32
    %c0_i32_1 = arith.constant 0 : i32
    return %c0_i32, %c0_i32_0 : i32, i32
  }
  func.func @transform_2(%arg0: i32) -> (i32, i32) {
    %c0_i32 = arith.constant 0 : i32
    %c0_i32_0 = arith.constant 0 : i32
    %c0_i32_1 = arith.constant 0 : i32
    return %c0_i32, %c0_i32_0 : i32, i32
  }
  func.func @transform_3(%arg0: i32) -> (i32, i32) {
    %c0_i32 = arith.constant 0 : i32
    %c0_i32_0 = arith.constant 0 : i32
    %c0_i32_1 = arith.constant 0 : i32
    return %c0_i32, %c0_i32_0 : i32, i32
  }
  func.func @transform_4(%arg0: i32) -> (i32, i32) {
    %c0_i32 = arith.constant 0 : i32
    %c0_i32_0 = arith.constant 0 : i32
    %c0_i32_1 = arith.constant 0 : i32
    return %c0_i32, %c0_i32_0 : i32, i32
  }
  func.func @transform_5(%arg0: i32) -> (i32, i32) {
    %c0_i32 = arith.constant 0 : i32
    %c0_i32_0 = arith.constant 0 : i32
    %c0_i32_1 = arith.constant 0 : i32
    return %c0_i32, %c0_i32_0 : i32, i32
  }
  func.func @transform_6(%arg0: i32) -> (i32, i32) {
    %c0_i32 = arith.constant 0 : i32
    %c0_i32_0 = arith.constant 0 : i32
    %c0_i32_1 = arith.constant 0 : i32
    return %c0_i32, %c0_i32_0 : i32, i32
  }
  func.func @transform_7(%arg0: i32) -> (i32, i32, i32) {
    %c0_i32 = arith.constant 0 : i32
    %c0_i32_0 = arith.constant 0 : i32
    %c0_i32_1 = arith.constant 0 : i32
    return %arg0, %c0_i32, %c0_i32_0 : i32, i32, i32
  }
}

module attributes {stable_mosaic.version = 11 : i64} {
  func.func @_linear_kernel(%arg0: i32, %arg1: memref<32x128xf32, #tpu.memory_space<vmem>>, %arg2: memref<128x128xf32, #tpu.memory_space<vmem>>, %arg3: memref<32x128xf32, #tpu.memory_space<vmem>>) attributes {dimension_semantics = [#tpu.dimension_semantics<parallel>], iteration_bounds = array<i64: 2>, scalar_prefetch = 0 : i64, scratch_operands = 0 : i64, tpu.core_type = #tpu.core_type<tc>, window_params = [{transform_indices = @transform_0, window_bounds = array<i64: 32, 128>}, {pipeline_mode = #tpu.pipeline_mode<synchronous>, transform_indices = @transform_1, window_bounds = array<i64: 128, 128>}, {transform_indices = @transform_2, window_bounds = array<i64: 32, 128>}]} {
    %c0 = arith.constant 0 : index
    %c0_0 = arith.constant 0 : index
    %0 = vector.load %arg1[%c0, %c0_0] : memref<32x128xf32, #tpu.memory_space<vmem>>, vector<32x128xf32>
    %c0_1 = arith.constant 0 : index
    %c0_2 = arith.constant 0 : index
    %1 = vector.load %arg2[%c0_1, %c0_2] : memref<128x128xf32, #tpu.memory_space<vmem>>, vector<128x128xf32>
    %cst = arith.constant dense<0.000000e+00> : vector<32x128xf32>
    %2 = tpu.matmul %0, %1, %cst {dimension_numbers = #tpu.dot_dimension_numbers<[1], [0], [0], [1], [0, 0, 1, 1], [], []>} : vector<32x128xf32>, vector<128x128xf32>, vector<32x128xf32> -> vector<32x128xf32>
    %cst_3 = arith.constant 0.000000e+00 : f32
    %3 = vector.broadcast %cst_3 : f32 to vector<32x128xf32>
    %4 = arith.subf %3, %2 : vector<32x128xf32>
    %5 = math.exp %4 : vector<32x128xf32>
    %cst_4 = arith.constant 1.000000e+00 : f32
    %6 = vector.broadcast %cst_4 : f32 to vector<32x128xf32>
    %7 = arith.addf %6, %5 : vector<32x128xf32>
    %cst_5 = arith.constant 1.000000e+00 : f32
    %8 = vector.broadcast %cst_5 : f32 to vector<32x128xf32>
    %9 = arith.divf %8, %7 : vector<32x128xf32>
    %c0_6 = arith.constant 0 : index
    %c0_7 = arith.constant 0 : index
    %10 = vector.load %arg3[%c0_6, %c0_7] : memref<32x128xf32, #tpu.memory_space<vmem>>, vector<32x128xf32>
    tpu.vector_store %arg3[%c0_6, %c0_7], %9 {strides = array<i32>} : memref<32x128xf32, #tpu.memory_space<vmem>>, vector<32x128xf32>,
    return
  }
  func.func @transform_0(%arg0: i32) -> (i32, i32) {
    %c0_i32 = arith.constant 0 : i32
    %c0_i32_0 = arith.constant 0 : i32
    return %arg0, %c0_i32 : i32, i32
  }
  func.func @transform_1(%arg0: i32) -> (i32, i32) {
    %c0_i32 = arith.constant 0 : i32
    %c0_i32_0 = arith.constant 0 : i32
    %c0_i32_1 = arith.constant 0 : i32
    return %c0_i32, %c0_i32_0 : i32, i32
  }
  func.func @transform_2(%arg0: i32) -> (i32, i32) {
    %c0_i32 = arith.constant 0 : i32
    %c0_i32_0 = arith.constant 0 : i32
    return %arg0, %c0_i32 : i32, i32
  }
}

</mosaic_0001>

<bundles_post_ra>
// kernel: _lambda_.25
= control target key start
LH: loop header
LB: loop body
LE: loop exit
PB: predicated region body
PF: predicated region fallthrough
CT: control target
= control target key end

     0   :  { %s433_s9 = smov 0   ;;  %s552_s0 = inlined_call_operand.vmem [shape: f32[32,256], index: 0, kind: input, shape index: {}]   ;;  %s553_s1 = inlined_call_operand.vmem [shape: f32[256,128], index: 1, kind: input, shape index: {}]   ;;  %s554_s2 = inlined_call_operand.vmem [shape: f32[32,128], index: 2, kind: output, shape index: {}]  }
   0x1 LB: > { %s319_s10 = sadd.s32 4294967295, %s416_s9   ;;  %p323_p0 = scmp.ge.s32.totalorder %s416_s9, 1  ;;  %s416_s9 = sphi %s433_s9, %s12_s9  }
   0x2   : > { %p114_p1 = scmp.lt.s32.totalorder %s416_s9, 3 }
   0x4   : > { %p115_p2 = pnand %p323_p0, %p114_p1 }
   0x5   : > { %s324_s17 = sshll.u32 (!%p115_p2), %s319_s10, 1 }
   0x6   : > { %118 = sbr.rel (%p115_p2) target bundleno = 243 (0xf3), region = 28  ;;  %p138_p3 = scmp.lt.s32.totalorder (!%p115_p2), %s324_s17, 3 }
   0xb   : > { %v185_v0 = vld [vmem:[%s553_s1 + $0xf8] sm:$0xff]  ;;  %v184_v2 = vld [vmem:[%s553_s1 + $0xf0] sm:$0xff]  ;;  %v183_v4 = vld [vmem:[%s553_s1 + $0xe8] sm:$0xff]  ;;  %s556_s17 = smov (!%p138_p3, %s324_s17), 3 }
   0xc   : > { %v169_v1 = vld [vmem:[%s553_s1 + $0x78] sm:$0xff]  ;;  %332 = vmatprep.subr.mxu0 %v185_v0  ;;  %370 = vmatprep.subr.mxu1 %v185_v0  ;;  %v168_v3 = vld [vmem:[%s553_s1 + $0x70] sm:$0xff]  ;;  %v167_v5 = vld [vmem:[%s553_s1 + $0x68] sm:$0xff]  ;;  %s331_s13 = sshll.u32 %s556_s17, 4  ;;  %s328_s27 = sshll.u32 %s556_s17, 3 }
   0xd   : > { %333 = vmatpush3.msra.mxu0 %v169_v1  ;;  %386 = vmatpush3.msra.mxu1 %v169_v1  ;;  %v182_v6 = vld [vmem:[%s553_s1 + $0xe0] sm:$0xff]  ;;  %v181_v8 = vld [vmem:[%s553_s1 + $0xd8] sm:$0xff]  ;;  %v180_v10 = vld [vmem:[%s553_s1 + $0xd0] sm:$0xff]  ;;  %s142_s23 = scalar_lea.vmem %s552_s0, %s331_s13  ;;  %s148_s30 = scalar_lea.vmem %s554_s2, %s328_s27 }
   0xe   : > { %334 = vmatprep.subr.mxu0 %v184_v2  ;;  %371 = vmatprep.subr.mxu1 %v184_v2  ;;  %v166_v7 = vld [vmem:[%s553_s1 + $0x60] sm:$0xff]  ;;  %v165_v9 = vld [vmem:[%s553_s1 + $0x58] sm:$0xff]  ;;  %v164_v11 = vld [vmem:[%s553_s1 + $0x50] sm:$0xff] }
   0xf   : > { %335 = vmatpush3.msra.mxu0 %v168_v3  ;;  %387 = vmatpush3.msra.mxu1 %v168_v3  ;;  %v179_v12 = vld [vmem:[%s553_s1 + $0xc8] sm:$0xff]  ;;  %v178_v14 = vld [vmem:[%s553_s1 + $0xc0] sm:$0xff]  ;;  %v177_v16 = vld [vmem:[%s553_s1 + $0xb8] sm:$0xff] }
  0x10   : > { %336 = vmatprep.subr.mxu0 %v183_v4  ;;  %372 = vmatprep.subr.mxu1 %v183_v4  ;;  %v163_v13 = vld [vmem:[%s553_s1 + $0x48] sm:$0xff]  ;;  %v162_v15 = vld [vmem:[%s553_s1 + $0x40] sm:$0xff]  ;;  %v161_v17 = vld [vmem:[%s553_s1 + $0x38] sm:$0xff] }
  0x11   : > { %337 = vmatpush3.msra.mxu0 %v167_v5  ;;  %388 = vmatpush3.msra.mxu1 %v167_v5  ;;  %v176_v18 = vld [vmem:[%s553_s1 + $0xb0] sm:$0xff]  ;;  %v175_v20 = vld [vmem:[%s553_s1 + $0xa8] sm:$0xff]  ;;  %v174_v22 = vld [vmem:[%s553_s1 + $0xa0] sm:$0xff] }
  0x12   : > { %338 = vmatprep.subr.mxu0 %v182_v6  ;;  %373 = vmatprep.subr.mxu1 %v182_v6  ;;  %v160_v19 = vld [vmem:[%s553_s1 + $0x30] sm:$0xff]  ;;  %v159_v21 = vld [vmem:[%s553_s1 + $0x28] sm:$0xff]  ;;  %v158_v23 = vld [vmem:[%s553_s1 + $0x20] sm:$0xff] }
  0x13   : > { %339 = vmatpush3.msra.mxu0 %v166_v7  ;;  %389 = vmatpush3.msra.mxu1 %v166_v7  ;;  %v173_v24 = vld [vmem:[%s553_s1 + $0x98] sm:$0xff]  ;;  %v172_v26 = vld [vmem:[%s553_s1 + $0x90] sm:$0xff]  ;;  %v171_v28 = vld [vmem:[%s553_s1 + $0x88] sm:$0xff] }
  0x14   : > { %340 = vmatprep.subr.mxu0 %v181_v8  ;;  %374 = vmatprep.subr.mxu1 %v181_v8  ;;  %v157_v25 = vld [vmem:[%s553_s1 + $0x18] sm:$0xff]  ;;  %v156_v27 = vld [vmem:[%s553_s1 + $0x10] sm:$0xff]  ;;  %v155_v29 = vld [vmem:[%s553_s1 + $0x8] sm:$0xff] }
  0x15   : > { %341 = vmatpush3.msra.mxu0 %v165_v9  ;;  %390 = vmatpush3.msra.mxu1 %v165_v9  ;;  %v170_v30 = vld [vmem:[%s553_s1 + $0x80] sm:$0xff]  ;;  %v151_v32 = vld [vmem:[%s142_s23 + $0x8] sm:$0xff]  ;;  %v153_v33 = vld [vmem:[%s142_s23 + $0x18] sm:$0xff] }
  0x16   : > { %342 = vmatprep.subr.mxu0 %v180_v10  ;;  %375 = vmatprep.subr.mxu1 %v180_v10  ;;  %v154_v31 = vld [vmem:[%s553_s1] sm:$0xff]  ;;  %v152_v35 = vld [vmem:[%s142_s23 + $0x10] sm:$0xff] }
  0x17   : > { %343 = vmatpush3.msra.mxu0 %v164_v11  ;;  %391 = vmatpush3.msra.mxu1 %v164_v11  ;;  %v150_v34 = vld [vmem:[%s142_s23] sm:$0xff] }
  0x18   : > { %344 = vmatprep.subr.mxu0 %v179_v12  ;;  %376 = vmatprep.subr.mxu1 %v179_v12 }
  0x19   : > { %345 = vmatpush3.msra.mxu0 %v163_v13  ;;  %392 = vmatpush3.msra.mxu1 %v163_v13 }
  0x1a   : > { %346 = vmatprep.subr.mxu0 %v178_v14  ;;  %377 = vmatprep.subr.mxu1 %v178_v14 }
  0x1b   : > { %347 = vmatpush3.msra.mxu0 %v162_v15  ;;  %393 = vmatpush3.msra.mxu1 %v162_v15 }
  0x1c   : > { %348 = vmatprep.subr.mxu0 %v177_v16  ;;  %378 = vmatprep.subr.mxu1 %v177_v16 }
  0x1d   : > { %349 = vmatpush3.msra.mxu0 %v161_v17  ;;  %394 = vmatpush3.msra.mxu1 %v161_v17 }
  0x1e   : > { %350 = vmatprep.subr.mxu0 %v176_v18  ;;  %379 = vmatprep.subr.mxu1 %v176_v18 }
  0x1f   : > { %351 = vmatpush3.msra.mxu0 %v160_v19  ;;  %395 = vmatpush3.msra.mxu1 %v160_v19 }
  0x20   : > { %352 = vmatprep.subr.mxu0 %v175_v20  ;;  %380 = vmatprep.subr.mxu1 %v175_v20 }
  0x21   : > { %353 = vmatpush3.msra.mxu0 %v159_v21  ;;  %396 = vmatpush3.msra.mxu1 %v159_v21 }
  0x22   : > { %354 = vmatprep.subr.mxu0 %v174_v22  ;;  %381 = vmatprep.subr.mxu1 %v174_v22 }
  0x23   : > { %355 = vmatpush3.msra.mxu0 %v158_v23  ;;  %397 = vmatpush3.msra.mxu1 %v158_v23 }
  0x24   : > { %356 = vmatprep.subr.mxu0 %v173_v24  ;;  %382 = vmatprep.subr.mxu1 %v173_v24 }
  0x25   : > { %357 = vmatpush3.msra.mxu0 %v157_v25  ;;  %398 = vmatpush3.msra.mxu1 %v157_v25 }
  0x26   : > { %358 = vmatprep.subr.mxu0 %v172_v26  ;;  %383 = vmatprep.subr.mxu1 %v172_v26 }
  0x27   : > { %359 = vmatpush3.msra.mxu0 %v156_v27  ;;  %399 = vmatpush3.msra.mxu1 %v156_v27 }
  0x28   : > { %360 = vmatprep.subr.mxu0 %v171_v28  ;;  %384 = vmatprep.subr.mxu1 %v171_v28 }
  0x29   : > { %361 = vmatpush3.msra.mxu0 %v155_v29  ;;  %400 = vmatpush3.msra.mxu1 %v155_v29 }
  0x2a   : > { %362 = vmatprep.subr.mxu0 %v170_v30  ;;  %385 = vmatprep.subr.mxu1 %v170_v30 }
  0x2b   : > { %363 = vmatpush3.msra.mxu0 %v154_v31  ;;  %401 = vmatpush3.msra.mxu1 %v154_v31 }
  0x2c   : > { %250 = vmatprep.mubr.f32.mxu0 %v151_v32  ;;  %255 = vmatprep.mubr.f32.mxu1 %v153_v33 }
  0x2d   : > { %251 = vmatmul.mubr.f32.vlgmr.msra.gmra.mxu0 %v150_v34  ;;  %256 = vmatmul.mubr.f32.vlgmr.msra.gmra.mxu1 %v152_v35 }
  0xed   : > { %v364_v36 = vpop.f32.mrf.mxu0  ;;  %v367_v37 = vpop.f32.mrf.mxu1 }
  0xef   : > { %v365_v38 = vpop.f32.mrf.mxu0  ;;  %v368_v39 = vpop.f32.mrf.mxu1 }
  0xf0   : > { %v366_v40 = vadd.f32 %v365_v38, %v364_v36  ;;  %v369_v41 = vadd.f32 %v368_v39, %v367_v37 }
  0xf2   : > { %261 = vst [vmem:[%s148_s30] sm:$0xff] %v366_v40  ;;  %262 = vst [vmem:[%s148_s30 + $0x8] sm:$0xff] %v369_v41 }
  0xf3 PF: > { %s12_s9 = sadd.s32 1, %s416_s9  }
  0xf4   : > { %p9_p4 = scmp.ge.s32.totalorder %s12_s9, 4  }
  0xf6   :  { %11 = sbr.rel (!%p9_p4) target bundleno = 1 (0x1), region = 58 }

// kernel: _lambda_.24
= control target key start
LH: loop header
LB: loop body
LE: loop exit
PB: predicated region body
PF: predicated region fallthrough
CT: control target
= control target key end

     0   :  { %s371_s9 = smov 0   ;;  %s391_s0 = inlined_call_operand.vmem [shape: f32[64,8], index: 0, kind: input, shape index: {}]   ;;  %s392_s1 = inlined_call_operand.vmem [shape: f32[8,128], index: 1, kind: input, shape index: {}]   ;;  %s393_s2 = inlined_call_operand.vmem [shape: f32[64,128], index: 2, kind: output, shape index: {}]  }
   0x1 LB: > { %s310_s10 = sadd.s32 4294967295, %s354_s9   ;;  %p314_p0 = scmp.ge.s32.totalorder %s354_s9, 1  ;;  %s354_s9 = sphi %s371_s9, %s12_s9  }
   0x2   : > { %p113_p1 = scmp.lt.s32.totalorder %s354_s9, 3 }
   0x4   : > { %p114_p2 = pnand %p314_p0, %p113_p1 }
   0x5   : > { %s315_s13 = sshll.u32 (!%p114_p2), %s310_s10, 2 }
   0x6   : > { %117 = sbr.rel (%p114_p2) target bundleno = 212 (0xd4), region = 28  ;;  %p136_p3 = scmp.lt.s32.totalorder (!%p114_p2), %s315_s13, 7 }
   0xb   : > { %v151_v0 = vld [vmem:[%s392_s1] sm:$0xff]  ;;  %s395_s13 = smov (!%p136_p3, %s315_s13), 7  ;;  %vm152_vm0 = vcmask 64512  }
   0xc   : > { %330 = vmatprep.subr.mxu0 %v151_v0  ;;  %338 = vmatprep.subr.mxu1 %v151_v0  ;;  %s316_s14 = sshll.u32 %s395_s13, 3 }
   0xd   : > { %331 = vmatpush3.msra.mxu0 %v151_v0  ;;  %339 = vmatpush3.msra.mxu1 %v151_v0  ;;  %s139_s17 = scalar_lea.vmem %s391_s0, %s316_s14  ;;  %s145_s20 = scalar_lea.vmem %s393_s2, %s316_s14 }
   0xe   : > { %v147_v1 = vld [vmem:[%s139_s17] sm:$0xff]  ;;  %v149_v2 = vld [vmem:[%s139_s17 + $0x10] sm:$0xff]  ;;  %v148_v3 = vld [vmem:[%s139_s17 + $0x8] sm:$0xff] }
   0xf   : > { %332 = vmatprep.mubr.msk.f32.mxu0 %vm152_vm0, %v147_v1  ;;  %335 = vmatprep.mubr.msk.f32.mxu1 %vm152_vm0, %v149_v2  ;;  %v150_v4 = vld [vmem:[%s139_s17 + $0x18] sm:$0xff] }
  0x10   : > { %333 = vmatmul.mubr.msk.f32.vlgmr.msra.gmra.mxu0 %vm152_vm0, %v148_v3  ;;  %336 = vmatmul.mubr.msk.f32.vlgmr.msra.gmra.mxu1 %vm152_vm0, %v150_v4 }
  0xd0   : > { %v334_v5 = vpop.f32.mrf.mxu0  ;;  %v337_v6 = vpop.f32.mrf.mxu1 }
  0xd1   : > { %251 = vst [vmem:[%s145_s20 + $0x8] sm:$0xff] %v334_v5  ;;  %253 = vst [vmem:[%s145_s20 + $0x18] sm:$0xff] %v337_v6 }
  0xd2   : > { %v231_v7 = vpop.f32.mrf.mxu0  ;;  %v241_v8 = vpop.f32.mrf.mxu1 }
  0xd3   : > { %250 = vst [vmem:[%s145_s20] sm:$0xff] %v231_v7  ;;  %252 = vst [vmem:[%s145_s20 + $0x10] sm:$0xff] %v241_v8 }
  0xd4 PF: > { %s12_s9 = sadd.s32 1, %s354_s9  }
  0xd5   : > { %p9_p4 = scmp.ge.s32.totalorder %s12_s9, 4  }
  0xd7   :  { %11 = sbr.rel (!%p9_p4) target bundleno = 1 (0x1), region = 58 }

// kernel: _lambda_.26
= control target key start
LH: loop header
LB: loop body
LE: loop exit
PB: predicated region body
PF: predicated region fallthrough
CT: control target
= control target key end

     0   :  { %s1130_s30 = smov 0   ;;  %s1384_s0 = inlined_call_operand.vmem [shape: f32[2,16,128], index: 0, kind: input, shape index: {}]   ;;  %s1385_s1 = inlined_call_operand.vmem [shape: f32[1,128], index: 1, kind: input, shape index: {}]   ;;  %s1386_s2 = inlined_call_operand.vmem [shape: f32[1,128], index: 2, kind: input, shape index: {}]   ;;  %s1387_s3 = inlined_call_operand.vmem [shape: f32[128,128], index: 3, kind: input, shape index: {}]   ;;  %s1388_s4 = inlined_call_operand.vmem [shape: f32[128,128], index: 4, kind: input, shape index: {}]   ;;  %s1389_s5 = inlined_call_operand.vmem [shape: f32[16,128], index: 5, kind: input, shape index: {}]   ;;  %s1390_s6 = inlined_call_operand.vmem [shape: f32[16,128], index: 6, kind: input, shape index: {}]   ;;  %s1391_s7 = inlined_call_operand.vmem [shape: f32[128,128], index: 7, kind: input, shape index: {}]   ;;  %s1392_s8 = inlined_call_operand.vmem [shape: f32[128,128], index: 8, kind: input, shape index: {}]   ;;  %s1393_s9 = inlined_call_operand.vmem [shape: f32[2,16,128], index: 9, kind: output, shape index: {}]  }
   0x1 LB: > { %s825_s10 = sadd.s32 4294967295, %s1078_s30   ;;  %p829_p0 = scmp.ge.s32.totalorder %s1078_s30, 1  ;;  %s1078_s30 = sphi %s1130_s30, %s19_s30  }
   0x2   : > { %p287_p1 = scmp.lt.s32.totalorder %s1078_s30, 3 }
   0x4   : > { %p288_p2 = pnand %p829_p0, %p287_p1 }
   0x5   : > { %p323_p3 = scmp.lt.s32.totalorder (!%p288_p2), %s825_s10, 1 }
   0x6   : > { %291 = sbr.rel (%p288_p2) target bundleno = 1289 (0x509), region = 56 }
   0xb   : > { %s1395_s10 = smov (!%p323_p3, %s825_s10), 1  ;;  %v391_v2 = vld [vmem:[%s1387_s3 + $0x78] sm:$0xff]  ;;  %v390_v3 = vld [vmem:[%s1387_s3 + $0x70] sm:$0xff]  ;;  %v389_v12 = vld [vmem:[%s1387_s3 + $0x68] sm:$0xff] }
   0xc   : > { %s838_s11 = sshll.u32 %s1395_s10, 4  ;;  %912 = vmatprep.subr.mxu0 %v391_v2  ;;  %v388_v13 = vld [vmem:[%s1387_s3 + $0x60] sm:$0xff]  ;;  %v387_v14 = vld [vmem:[%s1387_s3 + $0x58] sm:$0xff]  ;;  %v386_v15 = vld [vmem:[%s1387_s3 + $0x50] sm:$0xff] }
   0xd   : > { %s327_s14 = scalar_lea.vmem %s1384_s0, %s838_s11  ;;  %913 = vmatpush3.msra.mxu0 %v391_v2  ;;  %v385_v16 = vld [vmem:[%s1387_s3 + $0x48] sm:$0xff]  ;;  %v384_v17 = vld [vmem:[%s1387_s3 + $0x40] sm:$0xff]  ;;  %v383_v18 = vld [vmem:[%s1387_s3 + $0x38] sm:$0xff]  ;;  %s332_s13 = scalar_lea.vmem %s1393_s9, %s838_s11 }
   0xe   : > { %v1146_v0 = vld [vmem:[%s327_s14] sm:$0xff]  ;;  %v1149_v1 = vld [vmem:[%s327_s14 + $0x8] sm:$0xff]  ;;  %914 = vmatprep.subr.mxu0 %v390_v3  ;;  %v382_v19 = vld [vmem:[%s1387_s3 + $0x30] sm:$0xff] }
   0xf   : > { %335 = vadd.xlane.f32.xlu0 %v1146_v0  ;;  %915 = vmatpush3.msra.mxu0 %v390_v3  ;;  %v381_v20 = vld [vmem:[%s1387_s3 + $0x28] sm:$0xff]  ;;  %v380_v21 = vld [vmem:[%s1387_s3 + $0x20] sm:$0xff]  ;;  %v379_v22 = vld [vmem:[%s1387_s3 + $0x18] sm:$0xff] }
  0x10   : > { %916 = vmatprep.subr.mxu0 %v389_v12  ;;  %v378_v23 = vld [vmem:[%s1387_s3 + $0x10] sm:$0xff]  ;;  %v377_v24 = vld [vmem:[%s1387_s3 + $0x8] sm:$0xff]  ;;  %v376_v25 = vld [vmem:[%s1387_s3] sm:$0xff] }
  0x11   : > { %917 = vmatpush3.msra.mxu0 %v389_v12  ;;  %v486_v26 = vld [vmem:[%s1391_s7 + $0x78] sm:$0xff]  ;;  %v485_v27 = vld [vmem:[%s1391_s7 + $0x70] sm:$0xff]  ;;  %v484_v28 = vld [vmem:[%s1391_s7 + $0x68] sm:$0xff] }
  0x12   : > { %918 = vmatprep.subr.mxu0 %v388_v13  ;;  %947 = vmatprep.subr.mxu1 %v486_v26  ;;  %v483_v29 = vld [vmem:[%s1391_s7 + $0x60] sm:$0xff]  ;;  %v482_v30 = vld [vmem:[%s1391_s7 + $0x58] sm:$0xff]  ;;  %v481_v31 = vld [vmem:[%s1391_s7 + $0x50] sm:$0xff] }
  0x13   : > { %337 = vadd.xlane.f32.xlu0 %v1149_v1  ;;  %919 = vmatpush3.msra.mxu0 %v388_v13  ;;  %v480_v32 = vld [vmem:[%s1391_s7 + $0x48] sm:$0xff]  ;;  %v479_v33 = vld [vmem:[%s1391_s7 + $0x40] sm:$0xff]  ;;  %v478_v34 = vld [vmem:[%s1391_s7 + $0x38] sm:$0xff] }
  0x14   : > { %920 = vmatprep.subr.mxu0 %v387_v14  ;;  %948 = vmatpush3.msra.mxu1 %v486_v26  ;;  %v477_v35 = vld [vmem:[%s1391_s7 + $0x30] sm:$0xff]  ;;  %v476_v36 = vld [vmem:[%s1391_s7 + $0x28] sm:$0xff]  ;;  %v475_v37 = vld [vmem:[%s1391_s7 + $0x20] sm:$0xff] }
  0x15   : > { %921 = vmatpush3.msra.mxu0 %v387_v14  ;;  %949 = vmatprep.subr.mxu1 %v485_v27  ;;  %v474_v38 = vld [vmem:[%s1391_s7 + $0x18] sm:$0xff]  ;;  %v473_v39 = vld [vmem:[%s1391_s7 + $0x10] sm:$0xff]  ;;  %v834_v47 = vld [vmem:[%s1385_s1] ss:$0 sm:$0xff] }
  0x16   : > { %922 = vmatprep.subr.mxu0 %v386_v15  ;;  %950 = vmatpush3.msra.mxu1 %v485_v27  ;;  %v835_v49 = vld [vmem:[%s1386_s2] ss:$0 sm:$0xff]  ;;  %v472_v56 = vld [vmem:[%s1391_s7 + $0x8] sm:$0xff]  ;;  %v595_v60 = vld [vmem:[%s1392_s8 + $0x78] sm:$0xff] }
  0x17   : > { %923 = vmatpush3.msra.mxu0 %v386_v15  ;;  %951 = vmatprep.subr.mxu1 %v484_v28  ;;  %v471_v57 = vld [vmem:[%s1391_s7] sm:$0xff]  ;;  %v594_v61 = vld [vmem:[%s1392_s8 + $0x70] sm:$0xff]  ;;  %v593_v62 = vld [vmem:[%s1392_s8 + $0x68] sm:$0xff] }
  0x18   : > { %924 = vmatprep.subr.mxu0 %v385_v16  ;;  %952 = vmatpush3.msra.mxu1 %v484_v28  ;;  %v592_v63 = vld [vmem:[%s1392_s8 + $0x60] sm:$0xff]  ;;  %v591_v2 = vld [vmem:[%s1392_s8 + $0x58] sm:$0xff]  ;;  %v590_v3 = vld [vmem:[%s1392_s8 + $0x50] sm:$0xff] }
  0x19   : > { %925 = vmatpush3.msra.mxu0 %v385_v16  ;;  %953 = vmatprep.subr.mxu1 %v483_v29  ;;  %v581_v26 = vld [vmem:[%s1392_s8 + $0x8] sm:$0xff]  ;;  %v580_v27 = vld [vmem:[%s1392_s8] sm:$0xff]  ;;  %v690_v28 = vld [vmem:[%s1388_s4 + $0x78] sm:$0xff] }
  0x1a   : > { %926 = vmatprep.subr.mxu0 %v384_v17  ;;  %954 = vmatpush3.msra.mxu1 %v483_v29  ;;  %v689_v29 = vld [vmem:[%s1388_s4 + $0x70] sm:$0xff] }
  0x1b   : > { %927 = vmatpush3.msra.mxu0 %v384_v17  ;;  %955 = vmatprep.subr.mxu1 %v482_v30 }
  0x1c   : > { %928 = vmatprep.subr.mxu0 %v383_v18  ;;  %956 = vmatpush3.msra.mxu1 %v482_v30  ;;  %v688_v30 = vld [vmem:[%s1388_s4 + $0x68] sm:$0xff] }
  0x1d   : > { %929 = vmatpush3.msra.mxu0 %v383_v18  ;;  %957 = vmatprep.subr.mxu1 %v481_v31  ;;  %v589_v18 = vld [vmem:[%s1392_s8 + $0x48] sm:$0xff] }
  0x1e   : > { %930 = vmatprep.subr.mxu0 %v382_v19  ;;  %958 = vmatpush3.msra.mxu1 %v481_v31  ;;  %v687_v31 = vld [vmem:[%s1388_s4 + $0x60] sm:$0xff] }
  0x1f   : > { %931 = vmatpush3.msra.mxu0 %v382_v19  ;;  %959 = vmatprep.subr.mxu1 %v480_v32  ;;  %v588_v19 = vld [vmem:[%s1392_s8 + $0x40] sm:$0xff] }
  0x20   : > { %932 = vmatprep.subr.mxu0 %v381_v20  ;;  %960 = vmatpush3.msra.mxu1 %v480_v32  ;;  %v686_v32 = vld [vmem:[%s1388_s4 + $0x58] sm:$0xff] }
  0x21   : > { %933 = vmatpush3.msra.mxu0 %v381_v20  ;;  %961 = vmatprep.subr.mxu1 %v479_v33  ;;  %v587_v20 = vld [vmem:[%s1392_s8 + $0x38] sm:$0xff] }
  0x22   : > { %934 = vmatprep.subr.mxu0 %v380_v21  ;;  %962 = vmatpush3.msra.mxu1 %v479_v33  ;;  %v685_v33 = vld [vmem:[%s1388_s4 + $0x50] sm:$0xff] }
  0x23   : > { %935 = vmatpush3.msra.mxu0 %v380_v21  ;;  %963 = vmatprep.subr.mxu1 %v478_v34  ;;  %v586_v21 = vld [vmem:[%s1392_s8 + $0x30] sm:$0xff] }
  0x24   : > { %936 = vmatprep.subr.mxu0 %v379_v22  ;;  %964 = vmatpush3.msra.mxu1 %v478_v34 }
  0x25   : > { %937 = vmatpush3.msra.mxu0 %v379_v22  ;;  %965 = vmatprep.subr.mxu1 %v477_v35  ;;  %v585_v22 = vld [vmem:[%s1392_s8 + $0x28] sm:$0xff] }
  0x26   : > { %938 = vmatprep.subr.mxu0 %v378_v23  ;;  %966 = vmatpush3.msra.mxu1 %v477_v35 }
  0x27   : > { %939 = vmatpush3.msra.mxu0 %v378_v23  ;;  %967 = vmatprep.subr.mxu1 %v476_v36  ;;  %v584_v23 = vld [vmem:[%s1392_s8 + $0x20] sm:$0xff] }
  0x28   : > { %940 = vmatprep.subr.mxu0 %v377_v24  ;;  %968 = vmatpush3.msra.mxu1 %v476_v36 }
  0x29   : > { %941 = vmatpush3.msra.mxu0 %v377_v24  ;;  %969 = vmatprep.subr.mxu1 %v475_v37  ;;  %v583_v24 = vld [vmem:[%s1392_s8 + $0x18] sm:$0xff] }
  0x2a   : > { %942 = vmatprep.subr.mxu0 %v376_v25  ;;  %970 = vmatpush3.msra.mxu1 %v475_v37 }
  0x2b   : > { %943 = vmatpush3.msra.mxu0 %v376_v25  ;;  %971 = vmatprep.subr.mxu1 %v474_v38  ;;  %v582_v25 = vld [vmem:[%s1392_s8 + $0x10] sm:$0xff] }
  0x2c   : > { %972 = vmatpush3.msra.mxu1 %v474_v38  ;;  %982 = vmatprep.subr.mxu0 %v595_v60 }
  0x2d   : > { %973 = vmatprep.subr.mxu1 %v473_v39 }
  0x2e   : > { %974 = vmatpush3.msra.mxu1 %v473_v39 }
  0x2f   : > { %975 = vmatprep.subr.mxu1 %v472_v56 }
  0x30   : > { %976 = vmatpush3.msra.mxu1 %v472_v56 }
  0x31   : > { %977 = vmatprep.subr.mxu1 %v471_v57 }
  0x32   : > { %978 = vmatpush3.msra.mxu1 %v471_v57 }
  0x33   : > { %1017 = vmatprep.subr.mxu1 %v690_v28 }
  0x98   : > { %v336_v4 = vpop.xlane.xlu0 %335 }
  0x99   : > { %v340_v5 = vmul.f32 0.0078125, %v336_v4  ;;  %v468_v4 = vld [vmem:[%s1389_s5 + $0x8] sm:$0xff] }
  0x9b   : > { %v1159_v6 = vsub.f32 %v1146_v0, %v340_v5  ;;  %v563_v5 = vld [vmem:[%s1390_s6 + $0x8] sm:$0xff] }
  0x9c   : > { %v338_v7 = vpop.xlane.xlu0 %337 }
  0x9d   : > { %v341_v8 = vmul.f32 0.0078125, %v338_v7  ;;  %v344_v9 = vmul.f32 %v1159_v6, %v1159_v6 }
  0x9f   : > { %v1164_v10 = vsub.f32 %v1149_v1, %v341_v8  ;;  %346 = vadd.xlane.f32.xlu1 %v344_v9  ;;  %v562_v8 = vld [vmem:[%s1390_s6] sm:$0xff] }
  0xa1   : > { %v345_v11 = vmul.f32 %v1164_v10, %v1164_v10 }
  0xa3   : > { %348 = vadd.xlane.f32.xlu1 %v345_v11 }
 0x128   : > { %v347_v40 = vpop.xlane.xlu1 %346 }
 0x129   : > { %v350_v41 = vmul.f32 0.0078125, %v347_v40 }
 0x12b   : > { %v352_v42 = vadd.f32 1e-05, %v350_v41 }
 0x12c   : > { %v349_v43 = vpop.xlane.xlu1 %348 }
 0x12d   : > { %1060 = vrsqrt.f32 %v352_v42  ;;  %v351_v44 = vmul.f32 0.0078125, %v349_v43  ;;  %v684_v42 = vld [vmem:[%s1388_s4 + $0x48] sm:$0xff]  ;;  %v683_v43 = vld [vmem:[%s1388_s4 + $0x40] sm:$0xff] }
 0x12f   : > { %v353_v45 = vadd.f32 1e-05, %v351_v44  ;;  %v682_v44 = vld [vmem:[%s1388_s4 + $0x38] sm:$0xff] }
 0x131   : > { %1062 = vrsqrt.f32 %v353_v45  ;;  %v681_v45 = vld [vmem:[%s1388_s4 + $0x30] sm:$0xff] }
 0x13a   : > { %v1061_v46 = vpop.eup %1060 }
 0x13b   : > { %v356_v48 = vmul.f32 %v1061_v46, %v1159_v6  ;;  %v467_v6 = vld [vmem:[%s1389_s5] sm:$0xff]  ;;  %v680_v46 = vld [vmem:[%s1388_s4 + $0x28] sm:$0xff] }
 0x13d   : > { %v365_v50 = vmul.f32 %v834_v47, %v356_v48  ;;  %v678_v48 = vld [vmem:[%s1388_s4 + $0x18] sm:$0xff] }
 0x13e   : > { %v1063_v51 = vpop.eup %1062 }
 0x13f   : > { %v357_v52 = vmul.f32 %v1063_v51, %v1164_v10  ;;  %v374_v53 = vadd.f32 %v835_v49, %v365_v50  ;;  %v676_v50 = vld [vmem:[%s1388_s4 + $0x8] sm:$0xff]  ;;  %v675_v51 = vld [vmem:[%s1388_s4] sm:$0xff] }
 0x141   : > { %v366_v54 = vmul.f32 %v834_v47, %v357_v52  ;;  %944 = vmatprep.mubr.f32.mxu0 %v374_v53  ;;  %v679_v47 = vld [vmem:[%s1388_s4 + $0x20] sm:$0xff] }
 0x143   : > { %v375_v55 = vadd.f32 %v835_v49, %v366_v54  ;;  %v677_v49 = vld [vmem:[%s1388_s4 + $0x10] sm:$0xff] }
 0x145   : > { %945 = vmatmul.mubr.f32.vlgmr.msra.gmra.mxu0 %v375_v55 }
 0x146   : > { %983 = vmatpush3.msra.mxu0 %v595_v60 }
 0x147   : > { %984 = vmatprep.subr.mxu0 %v594_v61 }
 0x148   : > { %985 = vmatpush3.msra.mxu0 %v594_v61 }
 0x149   : > { %986 = vmatprep.subr.mxu0 %v593_v62 }
 0x14a   : > { %987 = vmatpush3.msra.mxu0 %v593_v62 }
 0x14b   : > { %988 = vmatprep.subr.mxu0 %v592_v63 }
 0x14c   : > { %989 = vmatpush3.msra.mxu0 %v592_v63 }
 0x14d   : > { %990 = vmatprep.subr.mxu0 %v591_v2 }
 0x14e   : > { %991 = vmatpush3.msra.mxu0 %v591_v2 }
 0x14f   : > { %992 = vmatprep.subr.mxu0 %v590_v3 }
 0x150   : > { %993 = vmatpush3.msra.mxu0 %v590_v3 }
 0x151   : > { %994 = vmatprep.subr.mxu0 %v589_v18 }
 0x152   : > { %995 = vmatpush3.msra.mxu0 %v589_v18 }
 0x153   : > { %996 = vmatprep.subr.mxu0 %v588_v19 }
 0x154   : > { %997 = vmatpush3.msra.mxu0 %v588_v19 }
 0x155   : > { %998 = vmatprep.subr.mxu0 %v587_v20 }
 0x156   : > { %999 = vmatpush3.msra.mxu0 %v587_v20 }
 0x157   : > { %1000 = vmatprep.subr.mxu0 %v586_v21 }
 0x158   : > { %1001 = vmatpush3.msra.mxu0 %v586_v21 }
 0x159   : > { %1002 = vmatprep.subr.mxu0 %v585_v22 }
 0x15a   : > { %1003 = vmatpush3.msra.mxu0 %v585_v22 }
 0x15b   : > { %1004 = vmatprep.subr.mxu0 %v584_v23 }
 0x15c   : > { %1005 = vmatpush3.msra.mxu0 %v584_v23 }
 0x15d   : > { %1006 = vmatprep.subr.mxu0 %v583_v24 }
 0x15e   : > { %1007 = vmatpush3.msra.mxu0 %v583_v24 }
 0x15f   : > { %1008 = vmatprep.subr.mxu0 %v582_v25 }
 0x160   : > { %1009 = vmatpush3.msra.mxu0 %v582_v25 }
 0x161   : > { %1010 = vmatprep.subr.mxu0 %v581_v26 }
 0x162   : > { %1011 = vmatpush3.msra.mxu0 %v581_v26 }
 0x163   : > { %1012 = vmatprep.subr.mxu0 %v580_v27 }
 0x164   : > { %1013 = vmatpush3.msra.mxu0 %v580_v27 }
 0x205   : > { %v946_v58 = vpop.f32.mrf.mxu0 }
 0x206   : > { %v470_v9 = vmul.f32 %v946_v58, %v468_v4 }
 0x207   : > { %v458_v59 = vpop.f32.mrf.mxu0 }
 0x208   : > { %979 = vmatprep.mubr.f32.mxu1 %v458_v59  ;;  %v469_v12 = vmul.f32 %v467_v6, %v458_v59 }
 0x209   : > { %980 = vmatmul.mubr.f32.vlgmr.msra.gmra.mxu1 %v946_v58 }
 0x20a   : > { %1018 = vmatpush3.msra.mxu1 %v690_v28 }
 0x20b   : > { %1019 = vmatprep.subr.mxu1 %v689_v29 }
 0x20c   : > { %1020 = vmatpush3.msra.mxu1 %v689_v29 }
 0x20d   : > { %1021 = vmatprep.subr.mxu1 %v688_v30 }
 0x20e   : > { %1022 = vmatpush3.msra.mxu1 %v688_v30 }
 0x20f   : > { %1023 = vmatprep.subr.mxu1 %v687_v31 }
 0x210   : > { %1024 = vmatpush3.msra.mxu1 %v687_v31 }
 0x211   : > { %1025 = vmatprep.subr.mxu1 %v686_v32 }
 0x212   : > { %1026 = vmatpush3.msra.mxu1 %v686_v32 }
 0x213   : > { %1027 = vmatprep.subr.mxu1 %v685_v33 }
 0x214   : > { %1028 = vmatpush3.msra.mxu1 %v685_v33 }
 0x215   : > { %1029 = vmatprep.subr.mxu1 %v684_v42 }
 0x216   : > { %1030 = vmatpush3.msra.mxu1 %v684_v42 }
 0x217   : > { %1031 = vmatprep.subr.mxu1 %v683_v43 }
 0x218   : > { %1032 = vmatpush3.msra.mxu1 %v683_v43 }
 0x219   : > { %1033 = vmatprep.subr.mxu1 %v682_v44 }
 0x21a   : > { %1034 = vmatpush3.msra.mxu1 %v682_v44 }
 0x21b   : > { %1035 = vmatprep.subr.mxu1 %v681_v45 }
 0x21c   : > { %1036 = vmatpush3.msra.mxu1 %v681_v45 }
 0x21d   : > { %1037 = vmatprep.subr.mxu1 %v680_v46 }
 0x21e   : > { %1038 = vmatpush3.msra.mxu1 %v680_v46 }
 0x21f   : > { %1039 = vmatprep.subr.mxu1 %v679_v47 }
 0x220   : > { %1040 = vmatpush3.msra.mxu1 %v679_v47 }
 0x221   : > { %1041 = vmatprep.subr.mxu1 %v678_v48 }
 0x222   : > { %1042 = vmatpush3.msra.mxu1 %v678_v48 }
 0x223   : > { %1043 = vmatprep.subr.mxu1 %v677_v49 }
 0x224   : > { %1044 = vmatpush3.msra.mxu1 %v677_v49 }
 0x225   : > { %1045 = vmatprep.subr.mxu1 %v676_v50 }
 0x226   : > { %1046 = vmatpush3.msra.mxu1 %v676_v50 }
 0x227   : > { %1047 = vmatprep.subr.mxu1 %v675_v51 }
 0x228   : > { %1048 = vmatpush3.msra.mxu1 %v675_v51 }
 0x2c9   : > { %v981_v7 = vpop.f32.mrf.mxu1 }
 0x2ca   : > { %v565_v10 = vmul.f32 %v981_v7, %v563_v5 }
 0x2cb   : > { %v553_v11 = vpop.f32.mrf.mxu1 }
 0x2cc   : > { %v564_v13 = vmul.f32 %v562_v8, %v553_v11  ;;  %v567_v14 = vadd.f32 %v565_v10, %v470_v9 }
 0x2ce   : > { %v569_v15 = vmul.f32 0.25, %v567_v14  ;;  %v566_v16 = vadd.f32 %v564_v13, %v469_v12 }
 0x2d0   : > { %572 = vmax.xlane.f32.xlu1 %v569_v15  ;;  %v568_v17 = vmul.f32 0.25, %v566_v16 }
 0x2d2   : > { %570 = vmax.xlane.f32.xlu0 %v568_v17 }
 0x359   : > { %v573_v34 = vpop.xlane.xlu1 %572 }
 0x35a   : > { %v575_v35 = vsub.f32 %v569_v15, %v573_v34 }
 0x35b   : > { %v571_v36 = vpop.xlane.xlu0 %570 }
 0x35c   : > { %v574_v37 = vsub.f32 %v568_v17, %v571_v36  ;;  %v578_v38 = vmul.f32 1.442695, %v575_v35 }
 0x35e   : > { %v576_v39 = vmul.f32 1.442695, %v574_v37 }
 0x360   : > { %1064 = vpow2.f32 %v576_v39 }
 0x361   : > { %1066 = vpow2.f32 %v578_v38 }
 0x36d   : > { %v1065_v40 = vpop.eup %1064 }
 0x36e   : > { %v1067_v41 = vpop.eup %1066  ;;  %1014 = vmatprep.mubr.f32.mxu0 %v1065_v40 }
 0x36f   : > { %1015 = vmatmul.mubr.f32.vlgmr.msra.gmra.mxu0 %v1067_v41 }
 0x42f   : > { %v1016_v52 = vpop.f32.mrf.mxu0 }
 0x430   : > { %1068 = vrcp.f32 %v1016_v52 }
 0x431   : > { %v662_v53 = vpop.f32.mrf.mxu0 }
 0x432   : > { %1070 = vrcp.f32 %v662_v53 }
 0x43d   : > { %v1069_v54 = vpop.eup %1068 }
 0x43e   : > { %v674_v57 = vmul.f32 %v1069_v54, %v1067_v41 }
 0x43f   : > { %v1071_v55 = vpop.eup %1070 }
 0x440   : > { %v672_v56 = vmul.f32 %v1071_v55, %v1065_v40 }
 0x442   : > { %1049 = vmatprep.mubr.f32.mxu1 %v672_v56 }
 0x443   : > { %1050 = vmatmul.mubr.f32.vlgmr.msra.gmra.mxu1 %v674_v57 }
 0x503   : > { %v1051_v58 = vpop.f32.mrf.mxu1 }
 0x504   : > { %v767_v59 = vadd.f32 %v1051_v58, %v1149_v1 }
 0x505   : > { %v757_v60 = vpop.f32.mrf.mxu1 }
 0x506   : > { %769 = vst [vmem:[%s332_s13 + $0x8] sm:$0xff] %v767_v59  ;;  %v766_v61 = vadd.f32 %v757_v60, %v1146_v0 }
 0x508   : > { %768 = vst [vmem:[%s332_s13] sm:$0xff] %v766_v61 }
 0x509 PF: > { %s19_s30 = sadd.s32 1, %s1078_s30  }
 0x50a   : > { %p16_p4 = scmp.ge.s32.totalorder %s19_s30, 4  }
 0x50c   :  { %18 = sbr.rel (!%p16_p4) target bundleno = 1 (0x1), region = 86 }

// kernel: _lambda_.27
= control target key start
LH: loop header
LB: loop body
LE: loop exit
PB: predicated region body
PF: predicated region fallthrough
CT: control target
= control target key end

     0   :  { %s1091_s24 = smov 0   ;;  %s1435_s0 = inlined_call_operand.vmem [shape: f32[2,16,128], index: 0, kind: input, shape index: {}]   ;;  %s1436_s1 = inlined_call_operand.vmem [shape: f32[1,128], index: 1, kind: input, shape index: {}]   ;;  %s1437_s2 = inlined_call_operand.vmem [shape: f32[1,128], index: 2, kind: input, shape index: {}]   ;;  %s1438_s3 = inlined_call_operand.vmem [shape: f32[128,384], index: 3, kind: input, shape index: {}]   ;;  %s1439_s4 = inlined_call_operand.vmem [shape: f32[1,384], index: 4, kind: input, shape index: {}]   ;;  %s1440_s5 = inlined_call_operand.vmem [shape: f32[384,128], index: 5, kind: input, shape index: {}]   ;;  %s1441_s6 = inlined_call_operand.vmem [shape: f32[1,128], index: 6, kind: input, shape index: {}]   ;;  %s1442_s7 = inlined_call_operand.vmem [shape: f32[2,16,128], index: 7, kind: output, shape index: {}]  }
   0x1 LB: > { %s845_s25 = sadd.s32 4294967295, %s1048_s24   ;;  %p849_p0 = scmp.ge.s32.totalorder %s1048_s24, 1  ;;  %s1048_s24 = sphi %s1091_s24, %s17_s24  }
   0x2   : > { %p237_p1 = scmp.lt.s32.totalorder %s1048_s24, 3 }
   0x4   : > { %p238_p2 = pnand %p849_p0, %p237_p1 }
   0x5   : > { %p269_p3 = scmp.lt.s32.totalorder (!%p238_p2), %s845_s25, 1 }
   0x6   : > { %241 = sbr.rel (%p238_p2) target bundleno = 764 (0x2fc), region = 48 }
   0xb   : > { %s1444_s25 = smov (!%p269_p3, %s845_s25), 1  ;;  %v368_v2 = vld [vmem:[%s1438_s3 + $0x170] sm:$0xff]  ;;  %v367_v3 = vld [vmem:[%s1438_s3 + $0x168] sm:$0xff]  ;;  %v365_v4 = vld [vmem:[%s1438_s3 + $0x158] sm:$0xff]  ;;  %v1050_v56 = vmov 0.0  }
   0xc   : > { %s859_s26 = sshll.u32 %s1444_s25, 4  ;;  %387 = vmatprep.subr.mxu0 %v368_v2  ;;  %v364_v5 = vld [vmem:[%s1438_s3 + $0x150] sm:$0xff]  ;;  %v369_v6 = vld [vmem:[%s1438_s3 + $0x178] sm:$0xff]  ;;  %v362_v7 = vld [vmem:[%s1438_s3 + $0x140] sm:$0xff]  ;;  %451 = vmatprep.mubr.f32.mxu0 %v1050_v56 }
   0xd   : > { %s273_s29 = scalar_lea.vmem %s1435_s0, %s859_s26  ;;  %388 = vmatpush1.msra.mxu0 %v367_v3  ;;  %935 = vmatprep.subr.mxu1 %v369_v6  ;;  %v366_v8 = vld [vmem:[%s1438_s3 + $0x160] sm:$0xff]  ;;  %v361_v9 = vld [vmem:[%s1438_s3 + $0x138] sm:$0xff]  ;;  %v359_v10 = vld [vmem:[%s1438_s3 + $0x128] sm:$0xff]  ;;  %s278_s9 = scalar_lea.vmem %s1442_s7, %s859_s26 }
   0xe   : > { %v1107_v0 = vld [vmem:[%s273_s29] sm:$0xff]  ;;  %v1110_v1 = vld [vmem:[%s273_s29 + $0x8] sm:$0xff]  ;;  %389 = vmatprep.subr.mxu0 %v365_v4  ;;  %936 = vmatpush3.msra.mxu1 %v369_v6  ;;  %v356_v20 = vld [vmem:[%s1438_s3 + $0x110] sm:$0xff] }
   0xf   : > { %281 = vadd.xlane.f32.xlu0 %v1107_v0  ;;  %390 = vmatpush1.msra.mxu0 %v364_v5  ;;  %v358_v11 = vld [vmem:[%s1438_s3 + $0x120] sm:$0xff]  ;;  %v363_v21 = vld [vmem:[%s1438_s3 + $0x148] sm:$0xff]  ;;  %v353_v23 = vld [vmem:[%s1438_s3 + $0xf8] sm:$0xff] }
  0x10   : > { %937 = vmatprep.subr.mxu1 %v366_v8  ;;  %391 = vmatprep.subr.mxu0 %v362_v7  ;;  %v355_v22 = vld [vmem:[%s1438_s3 + $0x108] sm:$0xff]  ;;  %v360_v24 = vld [vmem:[%s1438_s3 + $0x130] sm:$0xff]  ;;  %v350_v26 = vld [vmem:[%s1438_s3 + $0xe0] sm:$0xff] }
  0x11   : > { %938 = vmatpush3.msra.mxu1 %v366_v8  ;;  %392 = vmatpush1.msra.mxu0 %v361_v9  ;;  %v352_v25 = vld [vmem:[%s1438_s3 + $0xf0] sm:$0xff]  ;;  %v357_v27 = vld [vmem:[%s1438_s3 + $0x118] sm:$0xff]  ;;  %v347_v29 = vld [vmem:[%s1438_s3 + $0xc8] sm:$0xff] }
  0x12   : > { %393 = vmatprep.subr.mxu0 %v359_v10  ;;  %939 = vmatprep.subr.mxu1 %v363_v21  ;;  %v349_v28 = vld [vmem:[%s1438_s3 + $0xd8] sm:$0xff]  ;;  %v354_v30 = vld [vmem:[%s1438_s3 + $0x100] sm:$0xff]  ;;  %v344_v32 = vld [vmem:[%s1438_s3 + $0xb0] sm:$0xff] }
  0x13   : > { %283 = vadd.xlane.f32.xlu0 %v1110_v1  ;;  %394 = vmatpush1.msra.mxu0 %v358_v11  ;;  %v346_v31 = vld [vmem:[%s1438_s3 + $0xc0] sm:$0xff]  ;;  %v351_v33 = vld [vmem:[%s1438_s3 + $0xe8] sm:$0xff]  ;;  %v341_v35 = vld [vmem:[%s1438_s3 + $0x98] sm:$0xff] }
  0x14   : > { %395 = vmatprep.subr.mxu0 %v356_v20  ;;  %940 = vmatpush3.msra.mxu1 %v363_v21  ;;  %v343_v34 = vld [vmem:[%s1438_s3 + $0xa8] sm:$0xff]  ;;  %v348_v36 = vld [vmem:[%s1438_s3 + $0xd0] sm:$0xff]  ;;  %v338_v38 = vld [vmem:[%s1438_s3 + $0x80] sm:$0xff] }
  0x15   : > { %396 = vmatpush1.msra.mxu0 %v355_v22  ;;  %941 = vmatprep.subr.mxu1 %v360_v24  ;;  %v340_v37 = vld [vmem:[%s1438_s3 + $0x90] sm:$0xff]  ;;  %v345_v39 = vld [vmem:[%s1438_s3 + $0xb8] sm:$0xff]  ;;  %v335_v41 = vld [vmem:[%s1438_s3 + $0x68] sm:$0xff] }
  0x16   : > { %397 = vmatprep.subr.mxu0 %v353_v23  ;;  %942 = vmatpush3.msra.mxu1 %v360_v24  ;;  %v337_v40 = vld [vmem:[%s1438_s3 + $0x78] sm:$0xff]  ;;  %v342_v42 = vld [vmem:[%s1438_s3 + $0xa0] sm:$0xff]  ;;  %v332_v44 = vld [vmem:[%s1438_s3 + $0x50] sm:$0xff] }
  0x17   : > { %398 = vmatpush1.msra.mxu0 %v352_v25  ;;  %943 = vmatprep.subr.mxu1 %v357_v27  ;;  %v334_v43 = vld [vmem:[%s1438_s3 + $0x60] sm:$0xff]  ;;  %v339_v45 = vld [vmem:[%s1438_s3 + $0x88] sm:$0xff]  ;;  %v329_v47 = vld [vmem:[%s1438_s3 + $0x38] sm:$0xff] }
  0x18   : > { %399 = vmatprep.subr.mxu0 %v350_v26  ;;  %944 = vmatpush3.msra.mxu1 %v357_v27  ;;  %v331_v46 = vld [vmem:[%s1438_s3 + $0x48] sm:$0xff]  ;;  %v336_v48 = vld [vmem:[%s1438_s3 + $0x70] sm:$0xff]  ;;  %v326_v50 = vld [vmem:[%s1438_s3 + $0x20] sm:$0xff] }
  0x19   : > { %400 = vmatpush1.msra.mxu0 %v349_v28  ;;  %945 = vmatprep.subr.mxu1 %v354_v30  ;;  %v328_v49 = vld [vmem:[%s1438_s3 + $0x30] sm:$0xff]  ;;  %v333_v51 = vld [vmem:[%s1438_s3 + $0x58] sm:$0xff]  ;;  %v323_v53 = vld [vmem:[%s1438_s3 + $0x8] sm:$0xff] }
  0x1a   : > { %401 = vmatprep.subr.mxu0 %v347_v29  ;;  %946 = vmatpush3.msra.mxu1 %v354_v30  ;;  %v325_v52 = vld [vmem:[%s1438_s3 + $0x18] sm:$0xff]  ;;  %v330_v54 = vld [vmem:[%s1438_s3 + $0x40] sm:$0xff]  ;;  %v327_v57 = vld [vmem:[%s1438_s3 + $0x28] sm:$0xff] }
  0x1b   : > { %402 = vmatpush1.msra.mxu0 %v346_v31  ;;  %947 = vmatprep.subr.mxu1 %v351_v33  ;;  %v322_v55 = vld [vmem:[%s1438_s3] sm:$0xff]  ;;  %v324_v58 = vld [vmem:[%s1438_s3 + $0x10] sm:$0xff]  ;;  %v608_v23 = vld [vmem:[%s1440_s5 + $0xd8] sm:$0xff] }
  0x1c   : > { %403 = vmatprep.subr.mxu0 %v344_v32  ;;  %948 = vmatpush3.msra.mxu1 %v351_v33  ;;  %v854_v4 = vld [vmem:[%s1436_s1] ss:$0 sm:$0xff]  ;;  %v627_v21 = vld [vmem:[%s1440_s5 + $0x170] sm:$0xff]  ;;  %v626_v24 = vld [vmem:[%s1440_s5 + $0x168] sm:$0xff] }
  0x1d   : > { %404 = vmatpush1.msra.mxu0 %v343_v34  ;;  %949 = vmatprep.subr.mxu1 %v348_v36  ;;  %v855_v6 = vld [vmem:[%s1437_s2] ss:$0 sm:$0xff]  ;;  %v592_v25 = vld [vmem:[%s1440_s5 + $0x58] sm:$0xff]  ;;  %v607_v26 = vld [vmem:[%s1440_s5 + $0xd0] sm:$0xff] }
  0x1e   : > { %405 = vmatprep.subr.mxu0 %v341_v35  ;;  %950 = vmatpush3.msra.mxu1 %v348_v36  ;;  %v609_v20 = vld [vmem:[%s1440_s5 + $0xe0] sm:$0xff]  ;;  %v591_v28 = vld [vmem:[%s1440_s5 + $0x50] sm:$0xff]  ;;  %v606_v29 = vld [vmem:[%s1440_s5 + $0xc8] sm:$0xff] }
  0x1f   : > { %406 = vmatpush1.msra.mxu0 %v340_v37  ;;  %951 = vmatprep.subr.mxu1 %v345_v39  ;;  %v593_v22 = vld [vmem:[%s1440_s5 + $0x60] sm:$0xff]  ;;  %v624_v30 = vld [vmem:[%s1440_s5 + $0x158] sm:$0xff]  ;;  %v590_v31 = vld [vmem:[%s1440_s5 + $0x48] sm:$0xff] }
  0x20   : > { %407 = vmatprep.subr.mxu0 %v338_v38  ;;  %952 = vmatpush3.msra.mxu1 %v345_v39  ;;  %v625_v27 = vld [vmem:[%s1440_s5 + $0x160] sm:$0xff]  ;;  %v623_v33 = vld [vmem:[%s1440_s5 + $0x150] sm:$0xff]  ;;  %v604_v35 = vld [vmem:[%s1440_s5 + $0xb8] sm:$0xff] }
  0x21   : > { %408 = vmatpush1.msra.mxu0 %v337_v40  ;;  %953 = vmatprep.subr.mxu1 %v342_v42  ;;  %v605_v32 = vld [vmem:[%s1440_s5 + $0xc0] sm:$0xff]  ;;  %v622_v36 = vld [vmem:[%s1440_s5 + $0x148] sm:$0xff]  ;;  %v588_v37 = vld [vmem:[%s1440_s5 + $0x38] sm:$0xff] }
  0x22   : > { %409 = vmatprep.subr.mxu0 %v335_v41  ;;  %954 = vmatpush3.msra.mxu1 %v342_v42  ;;  %v589_v34 = vld [vmem:[%s1440_s5 + $0x40] sm:$0xff]  ;;  %v603_v38 = vld [vmem:[%s1440_s5 + $0xb0] sm:$0xff]  ;;  %v602_v41 = vld [vmem:[%s1440_s5 + $0xa8] sm:$0xff] }
  0x23   : > { %410 = vmatpush1.msra.mxu0 %v334_v43  ;;  %955 = vmatprep.subr.mxu1 %v339_v45  ;;  %v621_v39 = vld [vmem:[%s1440_s5 + $0x140] sm:$0xff]  ;;  %v587_v40 = vld [vmem:[%s1440_s5 + $0x30] sm:$0xff]  ;;  %v620_v42 = vld [vmem:[%s1440_s5 + $0x138] sm:$0xff] }
  0x24   : > { %411 = vmatprep.subr.mxu0 %v332_v44  ;;  %956 = vmatpush3.msra.mxu1 %v339_v45  ;;  %v586_v43 = vld [vmem:[%s1440_s5 + $0x28] sm:$0xff]  ;;  %v601_v44 = vld [vmem:[%s1440_s5 + $0xa0] sm:$0xff]  ;;  %v619_v45 = vld [vmem:[%s1440_s5 + $0x130] sm:$0xff] }
  0x25   : > { %412 = vmatpush1.msra.mxu0 %v331_v46  ;;  %957 = vmatprep.subr.mxu1 %v336_v48  ;;  %v585_v46 = vld [vmem:[%s1440_s5 + $0x20] sm:$0xff] }
  0x26   : > { %413 = vmatprep.subr.mxu0 %v329_v47  ;;  %958 = vmatpush3.msra.mxu1 %v336_v48  ;;  %v600_v47 = vld [vmem:[%s1440_s5 + $0x98] sm:$0xff]  ;;  %v618_v48 = vld [vmem:[%s1440_s5 + $0x128] sm:$0xff] }
  0x27   : > { %414 = vmatpush1.msra.mxu0 %v328_v49  ;;  %959 = vmatprep.subr.mxu1 %v333_v51  ;;  %v584_v49 = vld [vmem:[%s1440_s5 + $0x18] sm:$0xff] }
  0x28   : > { %415 = vmatprep.subr.mxu0 %v326_v50  ;;  %960 = vmatpush3.msra.mxu1 %v333_v51  ;;  %v599_v50 = vld [vmem:[%s1440_s5 + $0x90] sm:$0xff]  ;;  %v617_v51 = vld [vmem:[%s1440_s5 + $0x120] sm:$0xff] }
  0x29   : > { %416 = vmatpush1.msra.mxu0 %v325_v52  ;;  %961 = vmatprep.subr.mxu1 %v330_v54  ;;  %v583_v52 = vld [vmem:[%s1440_s5 + $0x10] sm:$0xff] }
  0x2a   : > { %417 = vmatprep.subr.mxu0 %v323_v53  ;;  %962 = vmatpush3.msra.mxu1 %v330_v54  ;;  %v598_v53 = vld [vmem:[%s1440_s5 + $0x88] sm:$0xff]  ;;  %v616_v54 = vld [vmem:[%s1440_s5 + $0x118] sm:$0xff] }
  0x2b   : > { %418 = vmatpush1.msra.mxu0 %v322_v55  ;;  %963 = vmatprep.subr.mxu1 %v327_v57  ;;  %v582_v55 = vld [vmem:[%s1440_s5 + $0x8] sm:$0xff] }
  0x2c   : > { %964 = vmatpush3.msra.mxu1 %v327_v57  ;;  %v615_v57 = vld [vmem:[%s1440_s5 + $0x110] sm:$0xff] }
  0x2d   : > { %965 = vmatprep.subr.mxu1 %v324_v58 }
  0x2e   : > { %966 = vmatpush3.msra.mxu1 %v324_v58  ;;  %v581_v58 = vld [vmem:[%s1440_s5] sm:$0xff] }
  0x98   : > { %v282_v12 = vpop.xlane.xlu0 %281 }
  0x99   : > { %v286_v13 = vmul.f32 0.0078125, %v282_v12 }
  0x9b   : > { %v1144_v14 = vsub.f32 %v1107_v0, %v286_v13  ;;  %v612_v13 = vld [vmem:[%s1440_s5 + $0xf8] sm:$0xff] }
  0x9c   : > { %v284_v15 = vpop.xlane.xlu0 %283  ;;  %879 = vmatprep.subr.mxu0 %v612_v13 }
  0x9d   : > { %v287_v16 = vmul.f32 0.0078125, %v284_v15  ;;  %v290_v17 = vmul.f32 %v1144_v14, %v1144_v14  ;;  %v611_v15 = vld [vmem:[%s1440_s5 + $0xf0] sm:$0xff] }
  0x9f   : > { %v1149_v18 = vsub.f32 %v1110_v1, %v287_v16  ;;  %292 = vadd.xlane.f32.xlu1 %v290_v17  ;;  %v595_v16 = vld [vmem:[%s1440_s5 + $0x70] sm:$0xff]  ;;  %v610_v17 = vld [vmem:[%s1440_s5 + $0xe8] sm:$0xff] }
  0xa1   : > { %v291_v19 = vmul.f32 %v1149_v18, %v1149_v18 }
  0xa3   : > { %294 = vadd.xlane.f32.xlu1 %v291_v19  ;;  %v594_v19 = vld [vmem:[%s1440_s5 + $0x68] sm:$0xff] }
 0x128   : > { %v293_v59 = vpop.xlane.xlu1 %292 }
 0x129   : > { %v296_v60 = vmul.f32 0.0078125, %v293_v59  ;;  %v614_v59 = vld [vmem:[%s1440_s5 + $0x108] sm:$0xff] }
 0x12b   : > { %v298_v61 = vadd.f32 1e-05, %v296_v60  ;;  %v613_v60 = vld [vmem:[%s1440_s5 + $0x100] sm:$0xff] }
 0x12c   : > { %v295_v62 = vpop.xlane.xlu1 %294 }
 0x12d   : > { %1014 = vrsqrt.f32 %v298_v61  ;;  %v297_v63 = vmul.f32 0.0078125, %v295_v62  ;;  %v372_v61 = vlaneseq }
 0x12f   : > { %v299_v2 = vadd.f32 1e-05, %v297_v63  ;;  %v373_v62 = vshrl.u32 %v372_v61, 7 }
 0x131   : > { %1016 = vrsqrt.f32 %v299_v2  ;;  %v374_v63 = vsub.s32 0, %v373_v62  ;;  %v370_v2 = vld [vmem:[%s1439_s4] sm:$0x7] }
 0x13a   : > { %v1015_v3 = vpop.eup %1014 }
 0x13b   : > { %v302_v5 = vmul.f32 %v1015_v3, %v1144_v14  ;;  %v596_v14 = vld [vmem:[%s1440_s5 + $0x78] sm:$0xff]  ;;  %v378_v3 = vsub.s32 1, %v373_v62 }
 0x13d   : > { %v311_v7 = vmul.f32 %v854_v4, %v302_v5  ;;  %v382_v5 = vsub.s32 2, %v373_v62 }
 0x13e   : > { %v1017_v8 = vpop.eup %1016 }
 0x13f   : > { %v320_v9 = vadd.f32 %v855_v6, %v311_v7  ;;  %v303_v10 = vmul.f32 %v1017_v8, %v1149_v18  ;;  %v628_v18 = vld [vmem:[%s1440_s5 + $0x178] sm:$0xff] }
 0x140   : > { %970 = vmatprep.subr.mxu1 %v628_v18 }
 0x141   : > { %452 = vmatmul.mubr.f32.vlgmr.msra.gmra.mxu0 %v320_v9  ;;  %967 = vmatprep.mubr.f32.mxu1 %v320_v9  ;;  %v312_v11 = vmul.f32 %v854_v4, %v303_v10  ;;  %v375_v4 = vrot.slane %v370_v2, %v374_v63  ;;  %v383_v9 = vrot.slane %v370_v2, %v382_v5 }
 0x142   : > { %457 = vmatprep.mubr.f32.mxu0 %v1050_v56  ;;  %880 = vmatpush3.msra.mxu0 %v596_v14  ;;  %v597_v56 = vld [vmem:[%s1440_s5 + $0x80] sm:$0xff] }
 0x143   : > { %v321_v12 = vadd.f32 %v855_v6, %v312_v11  ;;  %881 = vmatprep.subr.mxu0 %v611_v15  ;;  %v379_v6 = vrot.slane %v370_v2, %v378_v3 }
 0x144   : > { %882 = vmatpush3.msra.mxu0 %v595_v16 }
 0x145   : > { %458 = vmatmul.mubr.f32.gmra.mxu0 %v321_v12  ;;  %968 = vmatmul.mubr.f32.vlgmr.msra.gmra.mxu1 %v321_v12 }
 0x146   : > { %883 = vmatprep.subr.mxu0 %v610_v17  ;;  %971 = vmatpush3.msra.mxu1 %v628_v18 }
 0x147   : > { %884 = vmatpush3.msra.mxu0 %v594_v19  ;;  %972 = vmatprep.subr.mxu1 %v627_v21 }
 0x148   : > { %885 = vmatprep.subr.mxu0 %v609_v20  ;;  %973 = vmatpush3.msra.mxu1 %v627_v21 }
 0x149   : > { %886 = vmatpush3.msra.mxu0 %v593_v22  ;;  %974 = vmatprep.subr.mxu1 %v626_v24 }
 0x14a   : > { %887 = vmatprep.subr.mxu0 %v608_v23  ;;  %975 = vmatpush3.msra.mxu1 %v626_v24 }
 0x14b   : > { %888 = vmatpush3.msra.mxu0 %v592_v25  ;;  %976 = vmatprep.subr.mxu1 %v625_v27 }
 0x14c   : > { %889 = vmatprep.subr.mxu0 %v607_v26  ;;  %977 = vmatpush3.msra.mxu1 %v625_v27 }
 0x14d   : > { %890 = vmatpush3.msra.mxu0 %v591_v28  ;;  %978 = vmatprep.subr.mxu1 %v624_v30 }
 0x14e   : > { %891 = vmatprep.subr.mxu0 %v606_v29  ;;  %979 = vmatpush3.msra.mxu1 %v624_v30 }
 0x14f   : > { %892 = vmatpush3.msra.mxu0 %v590_v31  ;;  %980 = vmatprep.subr.mxu1 %v623_v33 }
 0x150   : > { %893 = vmatprep.subr.mxu0 %v605_v32  ;;  %981 = vmatpush3.msra.mxu1 %v623_v33 }
 0x151   : > { %894 = vmatpush3.msra.mxu0 %v589_v34  ;;  %982 = vmatprep.subr.mxu1 %v622_v36 }
 0x152   : > { %895 = vmatprep.subr.mxu0 %v604_v35  ;;  %983 = vmatpush3.msra.mxu1 %v622_v36 }
 0x153   : > { %896 = vmatpush3.msra.mxu0 %v588_v37  ;;  %984 = vmatprep.subr.mxu1 %v621_v39 }
 0x154   : > { %897 = vmatprep.subr.mxu0 %v603_v38  ;;  %985 = vmatpush3.msra.mxu1 %v621_v39 }
 0x155   : > { %898 = vmatpush3.msra.mxu0 %v587_v40  ;;  %986 = vmatprep.subr.mxu1 %v620_v42 }
 0x156   : > { %899 = vmatprep.subr.mxu0 %v602_v41  ;;  %987 = vmatpush3.msra.mxu1 %v620_v42 }
 0x157   : > { %900 = vmatpush3.msra.mxu0 %v586_v43  ;;  %988 = vmatprep.subr.mxu1 %v619_v45 }
 0x158   : > { %901 = vmatprep.subr.mxu0 %v601_v44  ;;  %989 = vmatpush3.msra.mxu1 %v619_v45 }
 0x159   : > { %902 = vmatpush3.msra.mxu0 %v585_v46  ;;  %990 = vmatprep.subr.mxu1 %v618_v48 }
 0x15a   : > { %903 = vmatprep.subr.mxu0 %v600_v47  ;;  %991 = vmatpush3.msra.mxu1 %v618_v48 }
 0x15b   : > { %904 = vmatpush3.msra.mxu0 %v584_v49  ;;  %992 = vmatprep.subr.mxu1 %v617_v51 }
 0x15c   : > { %905 = vmatprep.subr.mxu0 %v599_v50  ;;  %993 = vmatpush3.msra.mxu1 %v617_v51 }
 0x15d   : > { %906 = vmatpush3.msra.mxu0 %v583_v52  ;;  %994 = vmatprep.subr.mxu1 %v616_v54 }
 0x15e   : > { %907 = vmatprep.subr.mxu0 %v598_v53  ;;  %995 = vmatpush3.msra.mxu1 %v616_v54 }
 0x15f   : > { %908 = vmatpush3.msra.mxu0 %v582_v55  ;;  %996 = vmatprep.subr.mxu1 %v615_v57 }
 0x160   : > { %909 = vmatprep.subr.mxu0 %v597_v56  ;;  %997 = vmatpush3.msra.mxu1 %v615_v57 }
 0x161   : > { %910 = vmatpush3.msra.mxu0 %v581_v58  ;;  %998 = vmatprep.subr.mxu1 %v614_v59  ;;  %v856_v58 = vld [vmem:[%s1441_s6] ss:$0 sm:$0xff] }
 0x162   : > { %999 = vmatpush3.msra.mxu1 %v614_v59 }
 0x163   : > { %1000 = vmatprep.subr.mxu1 %v613_v60 }
 0x164   : > { %1001 = vmatpush3.msra.mxu1 %v613_v60 }
 0x201   : > { %v453_v7 = vpop.f32.mrf.mxu0 }
 0x202   : > { %v454_v8 = vadd.f32 %v453_v7, %v375_v4 }
 0x203   : > { %v455_v10 = vpop.f32.mrf.mxu0 }
 0x204   : > { %v539_v11 = vsub.f32 0.0, %v454_v8  ;;  %v456_v12 = vadd.f32 %v455_v10, %v379_v6 }
 0x205   : > { %v459_v13 = vpop.f32.mrf.mxu0  ;;  %v969_v14 = vpop.f32.mrf.mxu1 }
 0x206   : > { %v545_v15 = vmul.f32 1.442695, %v539_v11  ;;  %v540_v16 = vsub.f32 0.0, %v456_v12  ;;  %v460_v17 = vadd.f32 %v459_v13, %v375_v4  ;;  %v536_v18 = vadd.f32 %v969_v14, %v383_v9 }
 0x207   : > { %v461_v19 = vpop.f32.mrf.mxu0  ;;  %v530_v20 = vpop.f32.mrf.mxu1 }
 0x208   : > { %1018 = vpow2.f32 %v545_v15  ;;  %v547_v21 = vmul.f32 1.442695, %v540_v16  ;;  %v542_v22 = vsub.f32 0.0, %v460_v17  ;;  %v544_v23 = vsub.f32 0.0, %v536_v18 }
 0x209   : > { %v462_v24 = vadd.f32 %v461_v19, %v379_v6  ;;  %v531_v25 = vadd.f32 %v530_v20, %v383_v9 }
 0x20a   : > { %1020 = vpow2.f32 %v547_v21  ;;  %v551_v26 = vmul.f32 1.442695, %v542_v22  ;;  %v555_v27 = vmul.f32 1.442695, %v544_v23 }
 0x20b   : > { %v543_v28 = vsub.f32 0.0, %v462_v24  ;;  %v541_v29 = vsub.f32 0.0, %v531_v25 }
 0x20c   : > { %1022 = vpow2.f32 %v551_v26 }
 0x20d   : > { %1024 = vpow2.f32 %v555_v27  ;;  %v553_v30 = vmul.f32 1.442695, %v543_v28  ;;  %v549_v31 = vmul.f32 1.442695, %v541_v29 }
 0x20f   : > { %1026 = vpow2.f32 %v553_v30 }
 0x210   : > { %1028 = vpow2.f32 %v549_v31 }
 0x215   : > { %v1019_v32 = vpop.eup %1018 }
 0x216   : > { %v557_v33 = vadd.f32 1.0, %v1019_v32 }
 0x217   : > { %v1021_v34 = vpop.eup %1020 }
 0x218   : > { %v558_v35 = vadd.f32 1.0, %v1021_v34  ;;  %1030 = vrcp.f32 %v557_v33 }
 0x219   : > { %v1023_v36 = vpop.eup %1022 }
 0x21a   : > { %v1025_v37 = vpop.eup %1024  ;;  %1032 = vrcp.f32 %v558_v35  ;;  %v560_v38 = vadd.f32 1.0, %v1023_v36 }
 0x21b   : > { %v562_v39 = vadd.f32 1.0, %v1025_v37 }
 0x21c   : > { %v1027_v40 = vpop.eup %1026  ;;  %1034 = vrcp.f32 %v560_v38 }
 0x21d   : > { %v1029_v41 = vpop.eup %1028  ;;  %v561_v42 = vadd.f32 1.0, %v1027_v40  ;;  %1036 = vrcp.f32 %v562_v39 }
 0x21e   : > { %v559_v43 = vadd.f32 1.0, %v1029_v41 }
 0x21f   : > { %1038 = vrcp.f32 %v561_v42 }
 0x220   : > { %1040 = vrcp.f32 %v559_v43 }
 0x225   : > { %v1031_v44 = vpop.eup %1030 }
 0x226   : > { %v575_v47 = vmul.f32 %v1031_v44, %v454_v8 }
 0x227   : > { %v1033_v45 = vpop.eup %1032 }
 0x228   : > { %v576_v46 = vmul.f32 %v1033_v45, %v456_v12 }
 0x229   : > { %v1035_v48 = vpop.eup %1034 }
 0x22a   : > { %700 = vmatprep.mubr.f32.mxu0 %v576_v46  ;;  %v1037_v49 = vpop.eup %1036  ;;  %v578_v53 = vmul.f32 %v1035_v48, %v460_v17 }
 0x22b   : > { %701 = vmatmul.mubr.f32.vlgmr.msra.gmra.mxu0 %v575_v47  ;;  %v580_v55 = vmul.f32 %v1037_v49, %v536_v18 }
 0x22c   : > { %v1039_v50 = vpop.eup %1038 }
 0x22d   : > { %v1041_v51 = vpop.eup %1040  ;;  %v579_v52 = vmul.f32 %v1039_v50, %v462_v24 }
 0x22e   : > { %v577_v54 = vmul.f32 %v1041_v51, %v531_v25 }
 0x22f   : > { %705 = vmatprep.mubr.f32.mxu0 %v579_v52 }
 0x230   : > { %1002 = vmatprep.mubr.f32.mxu1 %v577_v54  ;;  %706 = vmatmul.mubr.f32.gmra.mxu0 %v578_v53 }
 0x231   : > { %1003 = vmatmul.mubr.f32.vlgmr.msra.gmra.mxu1 %v580_v55 }
 0x2eb   : > { %v911_v56 = vpop.f32.mrf.mxu0 }
 0x2ed   : > { %v912_v57 = vpop.f32.mrf.mxu0 }
 0x2ee   : > { %v913_v59 = vadd.f32 %v912_v57, %v911_v56 }
 0x2f0   : > { %v914_v60 = vpop.f32.mrf.mxu0  ;;  %v703_v61 = vadd.f32 %v913_v59, %v856_v58 }
 0x2f1   : > { %v1004_v62 = vpop.f32.mrf.mxu1 }
 0x2f2   : > { %v915_v63 = vpop.f32.mrf.mxu0 }
 0x2f3   : > { %v916_v2 = vadd.f32 %v915_v63, %v914_v60  ;;  %v777_v3 = vpop.f32.mrf.mxu1 }
 0x2f4   : > { %v778_v4 = vadd.f32 %v777_v3, %v703_v61 }
 0x2f5   : > { %v708_v5 = vadd.f32 %v916_v2, %v856_v58 }
 0x2f6   : > { %v786_v6 = vadd.f32 %v778_v4, %v1107_v0 }
 0x2f7   : > { %v783_v7 = vadd.f32 %v1004_v62, %v708_v5 }
 0x2f8   : > { %788 = vst [vmem:[%s278_s9] sm:$0xff] %v786_v6 }
 0x2f9   : > { %v787_v8 = vadd.f32 %v783_v7, %v1110_v1 }
 0x2fb   : > { %789 = vst [vmem:[%s278_s9 + $0x8] sm:$0xff] %v787_v8 }
 0x2fc PF: > { %s17_s24 = sadd.s32 1, %s1048_s24  }
 0x2fd   : > { %p14_p4 = scmp.ge.s32.totalorder %s17_s24, 4  }
 0x2ff   :  { %16 = sbr.rel (!%p14_p4) target bundleno = 1 (0x1), region = 78 }

// kernel: _lambda_.30
= control target key start
LH: loop header
LB: loop body
LE: loop exit
PB: predicated region body
PF: predicated region fallthrough
CT: control target
= control target key end

     0   :  { %s377_s9 = smov 0   ;;  %s498_s0 = inlined_call_operand.vmem [shape: f32[16,256], index: 0, kind: input, shape index: {}]   ;;  %s499_s1 = inlined_call_operand.vmem [shape: f32[256,128], index: 1, kind: input, shape index: {}]   ;;  %s500_s2 = inlined_call_operand.vmem [shape: f32[16,128], index: 2, kind: output, shape index: {}]  }
   0x1 LB: > { %s300_s10 = sadd.s32 4294967295, %s360_s9   ;;  %p304_p0 = scmp.ge.s32.totalorder %s360_s9, 1  ;;  %s360_s9 = sphi %s377_s9, %s12_s9  }
   0x2   : > { %p112_p1 = scmp.lt.s32.totalorder %s360_s9, 3 }
   0x4   : > { %p113_p2 = pnand %p304_p0, %p112_p1 }
   0x5   : > { %p133_p3 = scmp.lt.s32.totalorder (!%p113_p2), %s300_s10, 1 }
   0x6   : > { %116 = sbr.rel (%p113_p2) target bundleno = 242 (0xf2), region = 28 }
   0xb   : > { %v175_v0 = vld [vmem:[%s499_s1 + $0xf8] sm:$0xff]  ;;  %v174_v2 = vld [vmem:[%s499_s1 + $0xf0] sm:$0xff]  ;;  %v173_v4 = vld [vmem:[%s499_s1 + $0xe8] sm:$0xff]  ;;  %s502_s10 = smov (!%p133_p3, %s300_s10), 1 }
   0xc   : > { %v159_v1 = vld [vmem:[%s499_s1 + $0x78] sm:$0xff]  ;;  %311 = vmatprep.subr.mxu0 %v175_v0  ;;  %v158_v3 = vld [vmem:[%s499_s1 + $0x70] sm:$0xff]  ;;  %v157_v5 = vld [vmem:[%s499_s1 + $0x68] sm:$0xff]  ;;  %s310_s25 = sshll.u32 %s502_s10, 4  ;;  %s307_s28 = sshll.u32 %s502_s10, 3 }
   0xd   : > { %312 = vmatpush3.msra.mxu0 %v159_v1  ;;  %v172_v6 = vld [vmem:[%s499_s1 + $0xe0] sm:$0xff]  ;;  %v171_v8 = vld [vmem:[%s499_s1 + $0xd8] sm:$0xff]  ;;  %s421_s6 = scalar_lea.vmem %s498_s0, %s310_s25  ;;  %v170_v10 = vld [vmem:[%s499_s1 + $0xd0] sm:$0xff]  ;;  %s141_s3 = scalar_lea.vmem %s500_s2, %s307_s28 }
   0xe   : > { %313 = vmatprep.subr.mxu0 %v174_v2  ;;  %v156_v7 = vld [vmem:[%s499_s1 + $0x60] sm:$0xff]  ;;  %v155_v9 = vld [vmem:[%s499_s1 + $0x58] sm:$0xff]  ;;  %v154_v11 = vld [vmem:[%s499_s1 + $0x50] sm:$0xff] }
   0xf   : > { %314 = vmatpush3.msra.mxu0 %v158_v3  ;;  %v169_v12 = vld [vmem:[%s499_s1 + $0xc8] sm:$0xff]  ;;  %v168_v15 = vld [vmem:[%s499_s1 + $0xc0] sm:$0xff]  ;;  %v167_v17 = vld [vmem:[%s499_s1 + $0xb8] sm:$0xff] }
  0x10   : > { %315 = vmatprep.subr.mxu0 %v173_v4  ;;  %v143_v13 = vld [vmem:[%s421_s6 + $0x8] sm:$0xff]  ;;  %v152_v16 = vld [vmem:[%s499_s1 + $0x40] sm:$0xff]  ;;  %v151_v18 = vld [vmem:[%s499_s1 + $0x38] sm:$0xff] }
  0x11   : > { %316 = vmatpush3.msra.mxu0 %v157_v5  ;;  %v153_v14 = vld [vmem:[%s499_s1 + $0x48] sm:$0xff]  ;;  %240 = vmatprep.mubr.f32.mxu0 %v143_v13  ;;  %v166_v19 = vld [vmem:[%s499_s1 + $0xb0] sm:$0xff]  ;;  %v164_v23 = vld [vmem:[%s499_s1 + $0xa0] sm:$0xff] }
  0x12   : > { %317 = vmatprep.subr.mxu0 %v172_v6  ;;  %v150_v20 = vld [vmem:[%s499_s1 + $0x30] sm:$0xff]  ;;  %v165_v21 = vld [vmem:[%s499_s1 + $0xa8] sm:$0xff]  ;;  %v148_v24 = vld [vmem:[%s499_s1 + $0x20] sm:$0xff] }
  0x13   : > { %318 = vmatpush3.msra.mxu0 %v156_v7  ;;  %v149_v22 = vld [vmem:[%s499_s1 + $0x28] sm:$0xff]  ;;  %v163_v25 = vld [vmem:[%s499_s1 + $0x98] sm:$0xff]  ;;  %v162_v27 = vld [vmem:[%s499_s1 + $0x90] sm:$0xff] }
  0x14   : > { %319 = vmatprep.subr.mxu0 %v171_v8  ;;  %v147_v26 = vld [vmem:[%s499_s1 + $0x18] sm:$0xff]  ;;  %v146_v28 = vld [vmem:[%s499_s1 + $0x10] sm:$0xff]  ;;  %v161_v29 = vld [vmem:[%s499_s1 + $0x88] sm:$0xff] }
  0x15   : > { %320 = vmatpush3.msra.mxu0 %v155_v9  ;;  %v145_v30 = vld [vmem:[%s499_s1 + $0x8] sm:$0xff]  ;;  %v160_v31 = vld [vmem:[%s499_s1 + $0x80] sm:$0xff] }
  0x16   : > { %321 = vmatprep.subr.mxu0 %v170_v10  ;;  %v144_v32 = vld [vmem:[%s499_s1] sm:$0xff] }
  0x17   : > { %322 = vmatpush3.msra.mxu0 %v154_v11  ;;  %v142_v33 = vld [vmem:[%s421_s6] sm:$0xff] }
  0x18   : > { %323 = vmatprep.subr.mxu0 %v169_v12 }
  0x19   : > { %324 = vmatpush3.msra.mxu0 %v153_v14 }
  0x1a   : > { %325 = vmatprep.subr.mxu0 %v168_v15 }
  0x1b   : > { %326 = vmatpush3.msra.mxu0 %v152_v16 }
  0x1c   : > { %327 = vmatprep.subr.mxu0 %v167_v17 }
  0x1d   : > { %328 = vmatpush3.msra.mxu0 %v151_v18 }
  0x1e   : > { %329 = vmatprep.subr.mxu0 %v166_v19 }
  0x1f   : > { %330 = vmatpush3.msra.mxu0 %v150_v20 }
  0x20   : > { %331 = vmatprep.subr.mxu0 %v165_v21 }
  0x21   : > { %332 = vmatpush3.msra.mxu0 %v149_v22 }
  0x22   : > { %333 = vmatprep.subr.mxu0 %v164_v23 }
  0x23   : > { %334 = vmatpush3.msra.mxu0 %v148_v24 }
  0x24   : > { %335 = vmatprep.subr.mxu0 %v163_v25 }
  0x25   : > { %336 = vmatpush3.msra.mxu0 %v147_v26 }
  0x26   : > { %337 = vmatprep.subr.mxu0 %v162_v27 }
  0x27   : > { %338 = vmatpush3.msra.mxu0 %v146_v28 }
  0x28   : > { %339 = vmatprep.subr.mxu0 %v161_v29 }
  0x29   : > { %340 = vmatpush3.msra.mxu0 %v145_v30 }
  0x2a   : > { %341 = vmatprep.subr.mxu0 %v160_v31 }
  0x2b   : > { %342 = vmatpush3.msra.mxu0 %v144_v32 }
  0x2c   : > { %241 = vmatmul.mubr.f32.vlgmr.msra.gmra.mxu0 %v142_v33 }
  0xec   : > { %v343_v34 = vpop.f32.mrf.mxu0 }
  0xee   : > { %v344_v35 = vpop.f32.mrf.mxu0 }
  0xef   : > { %v345_v36 = vadd.f32 %v344_v35, %v343_v34 }
  0xf1   : > { %246 = vst [vmem:[%s141_s3] sm:$0xff] %v345_v36 }
  0xf2 PF: > { %s12_s9 = sadd.s32 1, %s360_s9  }
  0xf3   : > { %p9_p4 = scmp.ge.s32.totalorder %s12_s9, 4  }
  0xf5   :  { %11 = sbr.rel (!%p9_p4) target bundleno = 1 (0x1), region = 58 }

// kernel: _lambda_.31
= control target key start
LH: loop header
LB: loop body
LE: loop exit
PB: predicated region body
PF: predicated region fallthrough
CT: control target
= control target key end

     0   :  { %s1064_s30 = smov 0   ;;  %s1374_s0 = inlined_call_operand.vmem [shape: f32[2,8,128], index: 0, kind: input, shape index: {}]   ;;  %s1375_s1 = inlined_call_operand.vmem [shape: f32[1,128], index: 1, kind: input, shape index: {}]   ;;  %s1376_s2 = inlined_call_operand.vmem [shape: f32[1,128], index: 2, kind: input, shape index: {}]   ;;  %s1377_s3 = inlined_call_operand.vmem [shape: f32[128,128], index: 3, kind: input, shape index: {}]   ;;  %s1378_s4 = inlined_call_operand.vmem [shape: f32[128,128], index: 4, kind: input, shape index: {}]   ;;  %s1379_s5 = inlined_call_operand.vmem [shape: f32[8,128], index: 5, kind: input, shape index: {}]   ;;  %s1380_s6 = inlined_call_operand.vmem [shape: f32[8,128], index: 6, kind: input, shape index: {}]   ;;  %s1381_s7 = inlined_call_operand.vmem [shape: f32[128,128], index: 7, kind: input, shape index: {}]   ;;  %s1382_s8 = inlined_call_operand.vmem [shape: f32[128,128], index: 8, kind: input, shape index: {}]   ;;  %s1383_s9 = inlined_call_operand.vmem [shape: f32[2,8,128], index: 9, kind: output, shape index: {}]  }
   0x1 LB: > { %s769_s10 = sadd.s32 4294967295, %s1010_s30   ;;  %p773_p0 = scmp.ge.s32.totalorder %s1010_s30, 1  ;;  %s1010_s30 = sphi %s1064_s30, %s19_s30  }
   0x2   : > { %p286_p1 = scmp.lt.s32.totalorder %s1010_s30, 3 }
   0x4   : > { %p287_p2 = pnand %p773_p0, %p286_p1 }
   0x5   : > { %p320_p3 = scmp.lt.s32.totalorder (!%p287_p2), %s769_s10, 1 }
   0x6   : > { %290 = sbr.rel (%p287_p2) target bundleno = 1274 (0x4fa), region = 56 }
   0xb   : > { %s1385_s10 = smov (!%p320_p3, %s769_s10), 1  ;;  %v372_v1 = vld [vmem:[%s1377_s3 + $0x78] sm:$0xff]  ;;  %v1012_v2 = vmov 0.0   ;;  %v371_v3 = vld [vmem:[%s1377_s3 + $0x70] sm:$0xff]  ;;  %v370_v4 = vld [vmem:[%s1377_s3 + $0x68] sm:$0xff]  ;;  %vm1013_vm0 = vmmov 0  }
   0xc   : > { %s774_s11 = sshll.u32 %s1385_s10, 3  ;;  %848 = vmatprep.subr.mxu0 %v1012_v2  ;;  %883 = vmatprep.subr.mxu1 %v1012_v2  ;;  %v369_v5 = vld [vmem:[%s1377_s3 + $0x60] sm:$0xff]  ;;  %v368_v10 = vld [vmem:[%s1377_s3 + $0x58] sm:$0xff]  ;;  %v367_v11 = vld [vmem:[%s1377_s3 + $0x50] sm:$0xff] }
   0xd   : > { %s323_s14 = scalar_lea.vmem %s1374_s0, %s774_s11  ;;  %849 = vmatpush3.msra.mxu0 %v372_v1  ;;  %v366_v12 = vld [vmem:[%s1377_s3 + $0x48] sm:$0xff]  ;;  %v365_v13 = vld [vmem:[%s1377_s3 + $0x40] sm:$0xff]  ;;  %880 = vmatprep.mubr.msk.f32.mxu0 %vm1013_vm0, %v1012_v2  ;;  %v364_v14 = vld [vmem:[%s1377_s3 + $0x38] sm:$0xff]  ;;  %s327_s27 = scalar_lea.vmem %s1383_s9, %s774_s11 }
   0xe   : > { %v1080_v0 = vld [vmem:[%s323_s14] sm:$0xff]  ;;  %850 = vmatprep.subr.mxu0 %v1012_v2  ;;  %915 = vmatprep.mubr.msk.f32.mxu1 %vm1013_vm0, %v1012_v2  ;;  %v363_v15 = vld [vmem:[%s1377_s3 + $0x30] sm:$0xff]  ;;  %v362_v16 = vld [vmem:[%s1377_s3 + $0x28] sm:$0xff] }
   0xf   : > { %329 = vadd.xlane.f32.xlu0 %v1080_v0  ;;  %851 = vmatpush3.msra.mxu0 %v371_v3  ;;  %v361_v17 = vld [vmem:[%s1377_s3 + $0x20] sm:$0xff]  ;;  %v360_v18 = vld [vmem:[%s1377_s3 + $0x18] sm:$0xff]  ;;  %v359_v19 = vld [vmem:[%s1377_s3 + $0x10] sm:$0xff] }
  0x10   : > { %852 = vmatprep.subr.mxu0 %v1012_v2  ;;  %v358_v20 = vld [vmem:[%s1377_s3 + $0x8] sm:$0xff]  ;;  %v357_v21 = vld [vmem:[%s1377_s3] sm:$0xff]  ;;  %v460_v22 = vld [vmem:[%s1381_s7 + $0x78] sm:$0xff] }
  0x11   : > { %853 = vmatpush3.msra.mxu0 %v370_v4  ;;  %v459_v23 = vld [vmem:[%s1381_s7 + $0x70] sm:$0xff]  ;;  %884 = vmatpush3.msra.mxu1 %v460_v22  ;;  %v458_v24 = vld [vmem:[%s1381_s7 + $0x68] sm:$0xff]  ;;  %v457_v25 = vld [vmem:[%s1381_s7 + $0x60] sm:$0xff] }
  0x12   : > { %854 = vmatprep.subr.mxu0 %v1012_v2  ;;  %885 = vmatprep.subr.mxu1 %v1012_v2  ;;  %v456_v26 = vld [vmem:[%s1381_s7 + $0x58] sm:$0xff]  ;;  %v455_v27 = vld [vmem:[%s1381_s7 + $0x50] sm:$0xff]  ;;  %v454_v28 = vld [vmem:[%s1381_s7 + $0x48] sm:$0xff] }
  0x13   : > { %855 = vmatpush3.msra.mxu0 %v369_v5  ;;  %886 = vmatpush3.msra.mxu1 %v459_v23  ;;  %v453_v29 = vld [vmem:[%s1381_s7 + $0x40] sm:$0xff]  ;;  %v452_v30 = vld [vmem:[%s1381_s7 + $0x38] sm:$0xff]  ;;  %v451_v31 = vld [vmem:[%s1381_s7 + $0x30] sm:$0xff] }
  0x14   : > { %856 = vmatprep.subr.mxu0 %v1012_v2  ;;  %887 = vmatprep.subr.mxu1 %v1012_v2  ;;  %v450_v32 = vld [vmem:[%s1381_s7 + $0x28] sm:$0xff]  ;;  %v449_v33 = vld [vmem:[%s1381_s7 + $0x20] sm:$0xff]  ;;  %v448_v34 = vld [vmem:[%s1381_s7 + $0x18] sm:$0xff] }
  0x15   : > { %857 = vmatpush3.msra.mxu0 %v368_v10  ;;  %888 = vmatpush3.msra.mxu1 %v458_v24  ;;  %v447_v35 = vld [vmem:[%s1381_s7 + $0x10] sm:$0xff]  ;;  %v446_v36 = vld [vmem:[%s1381_s7 + $0x8] sm:$0xff]  ;;  %v776_v41 = vld [vmem:[%s1375_s1] ss:$0 sm:$0xff] }
  0x16   : > { %858 = vmatprep.subr.mxu0 %v1012_v2  ;;  %889 = vmatprep.subr.mxu1 %v1012_v2  ;;  %v777_v43 = vld [vmem:[%s1376_s2] ss:$0 sm:$0xff]  ;;  %v555_v49 = vld [vmem:[%s1382_s8 + $0x78] sm:$0xff]  ;;  %v554_v50 = vld [vmem:[%s1382_s8 + $0x70] sm:$0xff] }
  0x17   : > { %859 = vmatpush3.msra.mxu0 %v367_v11  ;;  %890 = vmatpush3.msra.mxu1 %v457_v25  ;;  %v445_v46 = vld [vmem:[%s1381_s7] sm:$0xff]  ;;  %v553_v51 = vld [vmem:[%s1382_s8 + $0x68] sm:$0xff]  ;;  %v551_v53 = vld [vmem:[%s1382_s8 + $0x58] sm:$0xff] }
  0x18   : > { %860 = vmatprep.subr.mxu0 %v1012_v2  ;;  %891 = vmatprep.subr.mxu1 %v1012_v2  ;;  %v552_v52 = vld [vmem:[%s1382_s8 + $0x60] sm:$0xff]  ;;  %v550_v54 = vld [vmem:[%s1382_s8 + $0x50] sm:$0xff]  ;;  %v549_v55 = vld [vmem:[%s1382_s8 + $0x48] sm:$0xff] }
  0x19   : > { %861 = vmatpush3.msra.mxu0 %v366_v12  ;;  %892 = vmatpush3.msra.mxu1 %v456_v26  ;;  %v443_v56 = vld [vmem:[%s1379_s5] sm:$0xff]  ;;  %v547_v3 = vld [vmem:[%s1382_s8 + $0x38] sm:$0xff]  ;;  %v546_v4 = vld [vmem:[%s1382_s8 + $0x30] sm:$0xff] }
  0x1a   : > { %862 = vmatprep.subr.mxu0 %v1012_v2  ;;  %893 = vmatprep.subr.mxu1 %v1012_v2  ;;  %v531_v57 = vld [vmem:[%s1380_s6] sm:$0xff]  ;;  %v545_v5 = vld [vmem:[%s1382_s8 + $0x28] sm:$0xff]  ;;  %v643_v11 = vld [vmem:[%s1378_s4 + $0x78] sm:$0xff] }
  0x1b   : > { %863 = vmatpush3.msra.mxu0 %v365_v13  ;;  %894 = vmatpush3.msra.mxu1 %v455_v27  ;;  %v548_v1 = vld [vmem:[%s1382_s8 + $0x40] sm:$0xff]  ;;  %v642_v12 = vld [vmem:[%s1378_s4 + $0x70] sm:$0xff]  ;;  %v641_v13 = vld [vmem:[%s1378_s4 + $0x68] sm:$0xff] }
  0x1c   : > { %864 = vmatprep.subr.mxu0 %v1012_v2  ;;  %895 = vmatprep.subr.mxu1 %v1012_v2  ;;  %v540_v10 = vld [vmem:[%s1382_s8] sm:$0xff]  ;;  %v635_v23 = vld [vmem:[%s1378_s4 + $0x38] sm:$0xff]  ;;  %v634_v24 = vld [vmem:[%s1378_s4 + $0x30] sm:$0xff] }
  0x1d   : > { %865 = vmatpush3.msra.mxu0 %v364_v14  ;;  %896 = vmatpush3.msra.mxu1 %v454_v28  ;;  %v640_v14 = vld [vmem:[%s1378_s4 + $0x60] sm:$0xff]  ;;  %v633_v25 = vld [vmem:[%s1378_s4 + $0x28] sm:$0xff]  ;;  %v631_v27 = vld [vmem:[%s1378_s4 + $0x18] sm:$0xff] }
  0x1e   : > { %866 = vmatprep.subr.mxu0 %v1012_v2  ;;  %897 = vmatprep.subr.mxu1 %v1012_v2  ;;  %v636_v22 = vld [vmem:[%s1378_s4 + $0x40] sm:$0xff]  ;;  %v630_v28 = vld [vmem:[%s1378_s4 + $0x10] sm:$0xff] }
  0x1f   : > { %867 = vmatpush3.msra.mxu0 %v363_v15  ;;  %898 = vmatpush3.msra.mxu1 %v453_v29  ;;  %v639_v15 = vld [vmem:[%s1378_s4 + $0x58] sm:$0xff]  ;;  %v632_v26 = vld [vmem:[%s1378_s4 + $0x20] sm:$0xff]  ;;  %v629_v29 = vld [vmem:[%s1378_s4 + $0x8] sm:$0xff] }
  0x20   : > { %868 = vmatprep.subr.mxu0 %v1012_v2  ;;  %899 = vmatprep.subr.mxu1 %v1012_v2 }
  0x21   : > { %869 = vmatpush3.msra.mxu0 %v362_v16  ;;  %900 = vmatpush3.msra.mxu1 %v452_v30  ;;  %v638_v16 = vld [vmem:[%s1378_s4 + $0x50] sm:$0xff]  ;;  %v628_v30 = vld [vmem:[%s1378_s4] sm:$0xff] }
  0x22   : > { %870 = vmatprep.subr.mxu0 %v1012_v2  ;;  %901 = vmatprep.subr.mxu1 %v1012_v2 }
  0x23   : > { %871 = vmatpush3.msra.mxu0 %v361_v17  ;;  %902 = vmatpush3.msra.mxu1 %v451_v31  ;;  %v637_v17 = vld [vmem:[%s1378_s4 + $0x48] sm:$0xff] }
  0x24   : > { %872 = vmatprep.subr.mxu0 %v1012_v2  ;;  %903 = vmatprep.subr.mxu1 %v1012_v2 }
  0x25   : > { %873 = vmatpush3.msra.mxu0 %v360_v18  ;;  %904 = vmatpush3.msra.mxu1 %v450_v32 }
  0x26   : > { %874 = vmatprep.subr.mxu0 %v1012_v2  ;;  %905 = vmatprep.subr.mxu1 %v1012_v2 }
  0x27   : > { %875 = vmatpush3.msra.mxu0 %v359_v19  ;;  %906 = vmatpush3.msra.mxu1 %v449_v33 }
  0x28   : > { %876 = vmatprep.subr.mxu0 %v1012_v2  ;;  %907 = vmatprep.subr.mxu1 %v1012_v2 }
  0x29   : > { %877 = vmatpush3.msra.mxu0 %v358_v20  ;;  %908 = vmatpush3.msra.mxu1 %v448_v34 }
  0x2a   : > { %878 = vmatprep.subr.mxu0 %v1012_v2  ;;  %909 = vmatprep.subr.mxu1 %v1012_v2 }
  0x2b   : > { %879 = vmatpush3.msra.mxu0 %v357_v21  ;;  %910 = vmatpush3.msra.mxu1 %v447_v35 }
  0x2c   : > { %918 = vmatprep.subr.mxu0 %v1012_v2  ;;  %911 = vmatprep.subr.mxu1 %v1012_v2 }
  0x2d   : > { %912 = vmatpush3.msra.mxu1 %v446_v36 }
  0x2e   : > { %913 = vmatprep.subr.mxu1 %v1012_v2 }
  0x2f   : > { %914 = vmatpush3.msra.mxu1 %v445_v46 }
  0x30   : > { %953 = vmatprep.subr.mxu1 %v1012_v2 }
  0x98   : > { %v330_v6 = vpop.xlane.xlu0 %329 }
  0x99   : > { %v332_v7 = vmul.f32 0.0078125, %v330_v6  ;;  %v544_v6 = vld [vmem:[%s1382_s8 + $0x20] sm:$0xff] }
  0x9b   : > { %v1102_v8 = vsub.f32 %v1080_v0, %v332_v7  ;;  %v543_v7 = vld [vmem:[%s1382_s8 + $0x18] sm:$0xff] }
  0x9d   : > { %v334_v9 = vmul.f32 %v1102_v8, %v1102_v8 }
  0x9f   : > { %335 = vadd.xlane.f32.xlu0 %v334_v9  ;;  %v541_v9 = vld [vmem:[%s1382_s8 + $0x8] sm:$0xff] }
 0x128   : > { %v336_v37 = vpop.xlane.xlu0 %335 }
 0x129   : > { %v337_v38 = vmul.f32 0.0078125, %v336_v37 }
 0x12b   : > { %v338_v39 = vadd.f32 1e-05, %v337_v38 }
 0x12d   : > { %998 = vrsqrt.f32 %v338_v39 }
 0x13a   : > { %v999_v40 = vpop.eup %998 }
 0x13b   : > { %v340_v42 = vmul.f32 %v999_v40, %v1102_v8  ;;  %v542_v8 = vld [vmem:[%s1382_s8 + $0x10] sm:$0xff] }
 0x13d   : > { %v348_v44 = vmul.f32 %v776_v41, %v340_v42 }
 0x13f   : > { %v356_v45 = vadd.f32 %v777_v43, %v348_v44 }
 0x141   : > { %881 = vmatmul.mubr.f32.vlgmr.msra.gmra.mxu0 %v356_v45 }
 0x142   : > { %950 = vmatprep.mubr.msk.f32.mxu0 %vm1013_vm0, %v1012_v2  ;;  %919 = vmatpush3.msra.mxu0 %v555_v49 }
 0x143   : > { %920 = vmatprep.subr.mxu0 %v1012_v2 }
 0x144   : > { %921 = vmatpush3.msra.mxu0 %v554_v50 }
 0x145   : > { %922 = vmatprep.subr.mxu0 %v1012_v2 }
 0x146   : > { %923 = vmatpush3.msra.mxu0 %v553_v51 }
 0x147   : > { %924 = vmatprep.subr.mxu0 %v1012_v2 }
 0x148   : > { %925 = vmatpush3.msra.mxu0 %v552_v52 }
 0x149   : > { %926 = vmatprep.subr.mxu0 %v1012_v2 }
 0x14a   : > { %927 = vmatpush3.msra.mxu0 %v551_v53 }
 0x14b   : > { %928 = vmatprep.subr.mxu0 %v1012_v2 }
 0x14c   : > { %929 = vmatpush3.msra.mxu0 %v550_v54 }
 0x14d   : > { %930 = vmatprep.subr.mxu0 %v1012_v2 }
 0x14e   : > { %931 = vmatpush3.msra.mxu0 %v549_v55 }
 0x14f   : > { %932 = vmatprep.subr.mxu0 %v1012_v2 }
 0x150   : > { %933 = vmatpush3.msra.mxu0 %v548_v1 }
 0x151   : > { %934 = vmatprep.subr.mxu0 %v1012_v2 }
 0x152   : > { %935 = vmatpush3.msra.mxu0 %v547_v3 }
 0x153   : > { %936 = vmatprep.subr.mxu0 %v1012_v2 }
 0x154   : > { %937 = vmatpush3.msra.mxu0 %v546_v4 }
 0x155   : > { %938 = vmatprep.subr.mxu0 %v1012_v2 }
 0x156   : > { %939 = vmatpush3.msra.mxu0 %v545_v5 }
 0x157   : > { %940 = vmatprep.subr.mxu0 %v1012_v2 }
 0x158   : > { %941 = vmatpush3.msra.mxu0 %v544_v6 }
 0x159   : > { %942 = vmatprep.subr.mxu0 %v1012_v2 }
 0x15a   : > { %943 = vmatpush3.msra.mxu0 %v543_v7 }
 0x15b   : > { %944 = vmatprep.subr.mxu0 %v1012_v2 }
 0x15c   : > { %945 = vmatpush3.msra.mxu0 %v542_v8 }
 0x15d   : > { %946 = vmatprep.subr.mxu0 %v1012_v2 }
 0x15e   : > { %947 = vmatpush3.msra.mxu0 %v541_v9 }
 0x15f   : > { %948 = vmatprep.subr.mxu0 %v1012_v2 }
 0x160   : > { %949 = vmatpush3.msra.mxu0 %v540_v10 }
 0x201   : > { %v439_v47 = vpop.f32.mrf.mxu0 }
 0x202   : > { %916 = vmatmul.mubr.f32.vlgmr.msra.gmra.mxu1 %v439_v47  ;;  %v444_v59 = vmul.f32 %v443_v56, %v439_v47 }
 0x203   : > { %v882_v48 = vpop.f32.mrf.mxu0  ;;  %985 = vmatprep.mubr.msk.f32.mxu1 %vm1013_vm0, %v1012_v2  ;;  %954 = vmatpush3.msra.mxu1 %v643_v11 }
 0x204   : > { %955 = vmatprep.subr.mxu1 %v1012_v2 }
 0x205   : > { %956 = vmatpush3.msra.mxu1 %v642_v12 }
 0x206   : > { %957 = vmatprep.subr.mxu1 %v1012_v2 }
 0x207   : > { %958 = vmatpush3.msra.mxu1 %v641_v13 }
 0x208   : > { %959 = vmatprep.subr.mxu1 %v1012_v2 }
 0x209   : > { %960 = vmatpush3.msra.mxu1 %v640_v14 }
 0x20a   : > { %961 = vmatprep.subr.mxu1 %v1012_v2 }
 0x20b   : > { %962 = vmatpush3.msra.mxu1 %v639_v15 }
 0x20c   : > { %963 = vmatprep.subr.mxu1 %v1012_v2 }
 0x20d   : > { %964 = vmatpush3.msra.mxu1 %v638_v16 }
 0x20e   : > { %965 = vmatprep.subr.mxu1 %v1012_v2 }
 0x20f   : > { %966 = vmatpush3.msra.mxu1 %v637_v17 }
 0x210   : > { %967 = vmatprep.subr.mxu1 %v1012_v2 }
 0x211   : > { %968 = vmatpush3.msra.mxu1 %v636_v22 }
 0x212   : > { %969 = vmatprep.subr.mxu1 %v1012_v2 }
 0x213   : > { %970 = vmatpush3.msra.mxu1 %v635_v23 }
 0x214   : > { %971 = vmatprep.subr.mxu1 %v1012_v2 }
 0x215   : > { %972 = vmatpush3.msra.mxu1 %v634_v24 }
 0x216   : > { %973 = vmatprep.subr.mxu1 %v1012_v2 }
 0x217   : > { %974 = vmatpush3.msra.mxu1 %v633_v25 }
 0x218   : > { %975 = vmatprep.subr.mxu1 %v1012_v2 }
 0x219   : > { %976 = vmatpush3.msra.mxu1 %v632_v26 }
 0x21a   : > { %977 = vmatprep.subr.mxu1 %v1012_v2 }
 0x21b   : > { %978 = vmatpush3.msra.mxu1 %v631_v27 }
 0x21c   : > { %979 = vmatprep.subr.mxu1 %v1012_v2 }
 0x21d   : > { %980 = vmatpush3.msra.mxu1 %v630_v28 }
 0x21e   : > { %981 = vmatprep.subr.mxu1 %v1012_v2 }
 0x21f   : > { %982 = vmatpush3.msra.mxu1 %v629_v29 }
 0x220   : > { %983 = vmatprep.subr.mxu1 %v1012_v2 }
 0x221   : > { %984 = vmatpush3.msra.mxu1 %v628_v30 }
 0x2c2   : > { %v527_v58 = vpop.f32.mrf.mxu1 }
 0x2c3   : > { %v532_v60 = vmul.f32 %v531_v57, %v527_v58 }
 0x2c4   : > { %v917_v61 = vpop.f32.mrf.mxu1 }
 0x2c5   : > { %v533_v62 = vadd.f32 %v532_v60, %v444_v59 }
 0x2c7   : > { %v534_v63 = vmul.f32 0.25, %v533_v62 }
 0x2c9   : > { %535 = vmax.xlane.f32.xlu1 %v534_v63 }
 0x352   : > { %v536_v18 = vpop.xlane.xlu1 %535 }
 0x353   : > { %v537_v19 = vsub.f32 %v534_v63, %v536_v18 }
 0x355   : > { %v538_v20 = vmul.f32 1.442695, %v537_v19 }
 0x357   : > { %1000 = vpow2.f32 %v538_v20 }
 0x364   : > { %v1001_v21 = vpop.eup %1000 }
 0x365   : > { %951 = vmatmul.mubr.f32.vlgmr.msra.gmra.mxu0 %v1001_v21 }
 0x425   : > { %v622_v31 = vpop.f32.mrf.mxu0 }
 0x426   : > { %1002 = vrcp.f32 %v622_v31 }
 0x427   : > { %v952_v32 = vpop.f32.mrf.mxu0 }
 0x433   : > { %v1003_v33 = vpop.eup %1002 }
 0x434   : > { %v627_v34 = vmul.f32 %v1003_v33, %v1001_v21 }
 0x436   : > { %986 = vmatmul.mubr.f32.vlgmr.msra.gmra.mxu1 %v627_v34 }
 0x4f6   : > { %v710_v35 = vpop.f32.mrf.mxu1 }
 0x4f7   : > { %v714_v36 = vadd.f32 %v710_v35, %v1080_v0 }
 0x4f8   : > { %v987_v37 = vpop.f32.mrf.mxu1 }
 0x4f9   : > { %715 = vst [vmem:[%s327_s27] sm:$0xff] %v714_v36 }
 0x4fa PF: > { %s19_s30 = sadd.s32 1, %s1010_s30  }
 0x4fb   : > { %p16_p4 = scmp.ge.s32.totalorder %s19_s30, 4  }
 0x4fd   :  { %18 = sbr.rel (!%p16_p4) target bundleno = 1 (0x1), region = 86 }

// kernel: _lambda_.35
= control target key start
LH: loop header
LB: loop body
LE: loop exit
PB: predicated region body
PF: predicated region fallthrough
CT: control target
= control target key end

     0   :  { %s421_s12 = smov 0   ;;  %s496_s0 = inlined_call_operand.vmem [shape: f32[16,128], index: 0, kind: input, shape index: {}]   ;;  %s497_s1 = inlined_call_operand.vmem [shape: f32[128,128], index: 1, kind: input, shape index: {}]   ;;  %s498_s2 = inlined_call_operand.vmem [shape: f32[1,128], index: 2, kind: input, shape index: {}]   ;;  %s499_s3 = inlined_call_operand.vmem [shape: f32[16,128], index: 3, kind: output, shape index: {}]  }
   0x1 LB: > { %s317_s13 = sadd.s32 4294967295, %s397_s12   ;;  %p321_p0 = scmp.ge.s32.totalorder %s397_s12, 1  ;;  %s397_s12 = sphi %s421_s12, %s13_s12  }
   0x2   : > { %p136_p1 = scmp.lt.s32.totalorder %s397_s12, 3 }
   0x4   : > { %p137_p2 = pnand %p321_p0, %p136_p1 }
   0x5   : > { %p158_p3 = scmp.lt.s32.totalorder (!%p137_p2), %s317_s13, 1 }
   0x6   : > { %140 = sbr.rel (%p137_p2) target bundleno = 258 (0x102), region = 32 }
   0xb   : > { %v182_v0 = vld [vmem:[%s497_s1 + $0x78] sm:$0xff]  ;;  %v399_v1 = vmov 0.0   ;;  %v181_v2 = vld [vmem:[%s497_s1 + $0x70] sm:$0xff]  ;;  %vm400_vm0 = vmmov 0   ;;  %v180_v3 = vld [vmem:[%s497_s1 + $0x68] sm:$0xff]  ;;  %s501_s13 = smov (!%p158_p3, %s317_s13), 1 }
   0xc   : > { %344 = vmatprep.subr.mxu0 %v399_v1  ;;  %376 = vmatprep.mubr.msk.f32.mxu0 %vm400_vm0, %v399_v1  ;;  %v179_v4 = vld [vmem:[%s497_s1 + $0x60] sm:$0xff]  ;;  %v178_v5 = vld [vmem:[%s497_s1 + $0x58] sm:$0xff]  ;;  %v177_v6 = vld [vmem:[%s497_s1 + $0x50] sm:$0xff]  ;;  %s322_s15 = sshll.u32 %s501_s13, 3 }
   0xd   : > { %345 = vmatpush3.msra.mxu0 %v182_v0  ;;  %v176_v7 = vld [vmem:[%s497_s1 + $0x48] sm:$0xff]  ;;  %v175_v8 = vld [vmem:[%s497_s1 + $0x40] sm:$0xff]  ;;  %v174_v9 = vld [vmem:[%s497_s1 + $0x38] sm:$0xff]  ;;  %s161_s22 = scalar_lea.vmem %s496_s0, %s322_s15  ;;  %s165_s28 = scalar_lea.vmem %s499_s3, %s322_s15 }
   0xe   : > { %346 = vmatprep.subr.mxu0 %v399_v1  ;;  %v173_v10 = vld [vmem:[%s497_s1 + $0x30] sm:$0xff]  ;;  %v172_v11 = vld [vmem:[%s497_s1 + $0x28] sm:$0xff]  ;;  %v171_v12 = vld [vmem:[%s497_s1 + $0x20] sm:$0xff] }
   0xf   : > { %347 = vmatpush3.msra.mxu0 %v181_v2  ;;  %v170_v13 = vld [vmem:[%s497_s1 + $0x18] sm:$0xff]  ;;  %v169_v14 = vld [vmem:[%s497_s1 + $0x10] sm:$0xff]  ;;  %v168_v15 = vld [vmem:[%s497_s1 + $0x8] sm:$0xff] }
  0x10   : > { %348 = vmatprep.subr.mxu0 %v399_v1  ;;  %v167_v16 = vld [vmem:[%s497_s1] sm:$0xff] }
  0x11   : > { %349 = vmatpush3.msra.mxu0 %v180_v3  ;;  %v166_v17 = vld [vmem:[%s161_s22] sm:$0xff] }
  0x12   : > { %350 = vmatprep.subr.mxu0 %v399_v1  ;;  %v324_v18 = vld [vmem:[%s498_s2] ss:$0 sm:$0xff] }
  0x13   : > { %351 = vmatpush3.msra.mxu0 %v179_v4 }
  0x14   : > { %352 = vmatprep.subr.mxu0 %v399_v1 }
  0x15   : > { %353 = vmatpush3.msra.mxu0 %v178_v5 }
  0x16   : > { %354 = vmatprep.subr.mxu0 %v399_v1 }
  0x17   : > { %355 = vmatpush3.msra.mxu0 %v177_v6 }
  0x18   : > { %356 = vmatprep.subr.mxu0 %v399_v1 }
  0x19   : > { %357 = vmatpush3.msra.mxu0 %v176_v7 }
  0x1a   : > { %358 = vmatprep.subr.mxu0 %v399_v1 }
  0x1b   : > { %359 = vmatpush3.msra.mxu0 %v175_v8 }
  0x1c   : > { %360 = vmatprep.subr.mxu0 %v399_v1 }
  0x1d   : > { %361 = vmatpush3.msra.mxu0 %v174_v9 }
  0x1e   : > { %362 = vmatprep.subr.mxu0 %v399_v1 }
  0x1f   : > { %363 = vmatpush3.msra.mxu0 %v173_v10 }
  0x20   : > { %364 = vmatprep.subr.mxu0 %v399_v1 }
  0x21   : > { %365 = vmatpush3.msra.mxu0 %v172_v11 }
  0x22   : > { %366 = vmatprep.subr.mxu0 %v399_v1 }
  0x23   : > { %367 = vmatpush3.msra.mxu0 %v171_v12 }
  0x24   : > { %368 = vmatprep.subr.mxu0 %v399_v1 }
  0x25   : > { %369 = vmatpush3.msra.mxu0 %v170_v13 }
  0x26   : > { %370 = vmatprep.subr.mxu0 %v399_v1 }
  0x27   : > { %371 = vmatpush3.msra.mxu0 %v169_v14 }
  0x28   : > { %372 = vmatprep.subr.mxu0 %v399_v1 }
  0x29   : > { %373 = vmatpush3.msra.mxu0 %v168_v15 }
  0x2a   : > { %374 = vmatprep.subr.mxu0 %v399_v1 }
  0x2b   : > { %375 = vmatpush3.msra.mxu0 %v167_v16 }
  0x2c   : > { %377 = vmatmul.mubr.f32.vlgmr.msra.gmra.mxu0 %v166_v17 }
  0xec   : > { %v256_v19 = vpop.f32.mrf.mxu0 }
  0xed   : > { %v257_v20 = vadd.f32 %v324_v18, %v256_v19 }
  0xee   : > { %v378_v21 = vpop.f32.mrf.mxu0 }
  0xef   : > { %389 = vtanh.f32 %v257_v20 }
  0xfc   : > { %v390_v22 = vpop.eup %389 }
  0xfd   : > { %v261_v23 = vmul.f32 16.0, %v390_v22 }
  0xff   : > { %v262_v24 = vfloor.f32 %v261_v23 }
 0x101   : > { %263 = vst [vmem:[%s165_s28] sm:$0xff] %v262_v24 }
 0x102 PF: > { %s13_s12 = sadd.s32 1, %s397_s12  }
 0x103   : > { %p10_p4 = scmp.ge.s32.totalorder %s13_s12, 4  }
 0x105   :  { %12 = sbr.rel (!%p10_p4) target bundleno = 1 (0x1), region = 62 }

// kernel: _lambda_.36
= control target key start
LH: loop header
LB: loop body
LE: loop exit
PB: predicated region body
PF: predicated region fallthrough
CT: control target
= control target key end

     0   :  { %s460_s18 = smov 0   ;;  %s492_s0 = inlined_call_operand.vmem [shape: f32[16,8], index: 0, kind: input, shape index: {}]   ;;  %s493_s1 = inlined_call_operand.vmem [shape: f32[8,128], index: 1, kind: input, shape index: {}]   ;;  %s494_s2 = inlined_call_operand.vmem [shape: f32[1,128], index: 2, kind: input, shape index: {}]   ;;  %s495_s3 = inlined_call_operand.vmem [shape: f32[1,128], index: 3, kind: input, shape index: {}]   ;;  %s496_s4 = inlined_call_operand.vmem [shape: f32[1,128], index: 4, kind: input, shape index: {}]   ;;  %s497_s5 = inlined_call_operand.vmem [shape: f32[16,128], index: 5, kind: output, shape index: {}]  }
   0x1 LB: > { %s388_s19 = sadd.s32 4294967295, %s426_s18   ;;  %p392_p0 = scmp.ge.s32.totalorder %s426_s18, 1  ;;  %s426_s18 = sphi %s460_s18, %s15_s18  }
   0x2   : > { %p186_p1 = scmp.lt.s32.totalorder %s426_s18, 3 }
   0x4   : > { %p187_p2 = pnand %p392_p0, %p186_p1 }
   0x5   : > { %p212_p3 = scmp.lt.s32.totalorder (!%p187_p2), %s388_s19, 1 }
   0x6   : > { %190 = sbr.rel (%p187_p2) target bundleno = 520 (0x208), region = 40 }
   0xb   : > { %v221_v0 = vld [vmem:[%s493_s1] sm:$0xff]  ;;  %v428_v1 = vmov 0.0   ;;  %vm429_vm0 = vmmov 0   ;;  %s499_s19 = smov (!%p212_p3, %s388_s19), 1  ;;  %vm229_vm1 = vcmask 64512  }
   0xc   : > { %403 = vmatprep.subr.mxu0 %v428_v1  ;;  %405 = vmatprep.mubr.msk.f32.mxu0 %vm429_vm0, %v428_v1  ;;  %s393_s22 = sshll.u32 %s499_s19, 3  ;;  %v395_v3 = vld [vmem:[%s494_s2] ss:$0 sm:$0xff] }
   0xd   : > { %404 = vmatpush3.msra.mxu0 %v221_v0  ;;  %s215_s25 = scalar_lea.vmem %s492_s0, %s393_s22  ;;  %v397_v17 = vld [vmem:[%s495_s3] ss:$0 sm:$0xff]  ;;  %s219_s9 = scalar_lea.vmem %s497_s5, %s393_s22 }
   0xe   : > { %v220_v2 = vld [vmem:[%s215_s25] sm:$0xff] }
   0xf   : > { %406 = vmatmul.mubr.msk.f32.vlgmr.msra.gmra.mxu0 %vm229_vm1, %v220_v2  ;;  %v398_v19 = vld [vmem:[%s496_s4] ss:$0 sm:$0xff] }
  0xcf   : > { %v299_v4 = vpop.f32.mrf.mxu0 }
  0xd0   : > { %v300_v5 = vadd.f32 %v395_v3, %v299_v4 }
  0xd1   : > { %v407_v6 = vpop.f32.mrf.mxu0 }
  0xd2   : > { %vm303_vm2 = vcmp.ge.f32.partialorder %v300_v5, 0.0  ;;  %v304_v7 = vmul.f32 0.01, %v300_v5 }
  0xd4   : > { %v305_v8 = vsel %vm303_vm2, %v300_v5, %v304_v7 }
  0xd5   : > { %306 = vadd.xlane.f32.xlu0 %v305_v8 }
 0x15e   : > { %v307_v9 = vpop.xlane.xlu0 %306 }
 0x15f   : > { %v309_v10 = vmul.f32 0.0078125, %v307_v9 }
 0x161   : > { %v310_v11 = vsub.f32 %v305_v8, %v309_v10 }
 0x163   : > { %v311_v12 = vmul.f32 %v310_v11, %v310_v11 }
 0x165   : > { %312 = vadd.xlane.f32.xlu0 %v311_v12 }
 0x1ee   : > { %v313_v13 = vpop.xlane.xlu0 %312 }
 0x1ef   : > { %v314_v14 = vmul.f32 0.0078125, %v313_v13 }
 0x1f1   : > { %v315_v15 = vadd.f32 1e-05, %v314_v14 }
 0x1f3   : > { %418 = vrsqrt.f32 %v315_v15 }
 0x200   : > { %v419_v16 = vpop.eup %418 }
 0x201   : > { %v317_v18 = vmul.f32 %v419_v16, %v310_v11 }
 0x203   : > { %v325_v20 = vmul.f32 %v397_v17, %v317_v18 }
 0x205   : > { %v333_v21 = vadd.f32 %v398_v19, %v325_v20 }
 0x207   : > { %334 = vst [vmem:[%s219_s9] sm:$0xff] %v333_v21 }
 0x208 PF: > { %s15_s18 = sadd.s32 1, %s426_s18  }
 0x209   : > { %p12_p4 = scmp.ge.s32.totalorder %s15_s18, 4  }
 0x20b   :  { %14 = sbr.rel (!%p12_p4) target bundleno = 1 (0x1), region = 70 }

// kernel: _lambda_.32
= control target key start
LH: loop header
LB: loop body
LE: loop exit
PB: predicated region body
PF: predicated region fallthrough
CT: control target
= control target key end

     0   :  { %s1005_s24 = smov 0   ;;  %s1374_s0 = inlined_call_operand.vmem [shape: f32[2,8,128], index: 0, kind: input, shape index: {}]   ;;  %s1375_s1 = inlined_call_operand.vmem [shape: f32[1,128], index: 1, kind: input, shape index: {}]   ;;  %s1376_s2 = inlined_call_operand.vmem [shape: f32[1,128], index: 2, kind: input, shape index: {}]   ;;  %s1377_s3 = inlined_call_operand.vmem [shape: f32[128,384], index: 3, kind: input, shape index: {}]   ;;  %s1378_s4 = inlined_call_operand.vmem [shape: f32[1,384], index: 4, kind: input, shape index: {}]   ;;  %s1379_s5 = inlined_call_operand.vmem [shape: f32[384,128], index: 5, kind: input, shape index: {}]   ;;  %s1380_s6 = inlined_call_operand.vmem [shape: f32[1,128], index: 6, kind: input, shape index: {}]   ;;  %s1381_s7 = inlined_call_operand.vmem [shape: f32[2,8,128], index: 7, kind: output, shape index: {}]  }
   0x1 LB: > { %s780_s25 = sadd.s32 4294967295, %s961_s24   ;;  %p784_p0 = scmp.ge.s32.totalorder %s961_s24, 1  ;;  %s961_s24 = sphi %s1005_s24, %s17_s24  }
   0x2   : > { %p236_p1 = scmp.lt.s32.totalorder %s961_s24, 3 }
   0x4   : > { %p237_p2 = pnand %p784_p0, %p236_p1 }
   0x5   : > { %p266_p3 = scmp.lt.s32.totalorder (!%p237_p2), %s780_s25, 1 }
   0x6   : > { %240 = sbr.rel (%p237_p2) target bundleno = 759 (0x2f7), region = 48 }
   0xb   : > { %s1383_s25 = smov (!%p266_p3, %s780_s25), 1  ;;  %v349_v1 = vld [vmem:[%s1377_s3 + $0x170] sm:$0xff]  ;;  %v348_v2 = vld [vmem:[%s1377_s3 + $0x168] sm:$0xff]  ;;  %v350_v3 = vld [vmem:[%s1377_s3 + $0x178] sm:$0xff]  ;;  %v963_v4 = vmov 0.0   ;;  %vm964_vm0 = vmmov 0  }
   0xc   : > { %s785_s26 = sshll.u32 %s1383_s25, 3  ;;  %368 = vmatprep.subr.mxu0 %v349_v1  ;;  %861 = vmatprep.subr.mxu1 %v963_v4  ;;  %v346_v5 = vld [vmem:[%s1377_s3 + $0x158] sm:$0xff]  ;;  %v345_v6 = vld [vmem:[%s1377_s3 + $0x150] sm:$0xff]  ;;  %v347_v7 = vld [vmem:[%s1377_s3 + $0x160] sm:$0xff] }
   0xd   : > { %s269_s29 = scalar_lea.vmem %s1374_s0, %s785_s26  ;;  %369 = vmatpush1.msra.mxu0 %v348_v2  ;;  %862 = vmatpush3.msra.mxu1 %v350_v3  ;;  %v343_v8 = vld [vmem:[%s1377_s3 + $0x140] sm:$0xff]  ;;  %v342_v9 = vld [vmem:[%s1377_s3 + $0x138] sm:$0xff]  ;;  %v344_v10 = vld [vmem:[%s1377_s3 + $0x148] sm:$0xff]  ;;  %s273_s9 = scalar_lea.vmem %s1381_s7, %s785_s26 }
   0xe   : > { %v1021_v0 = vld [vmem:[%s269_s29] sm:$0xff]  ;;  %370 = vmatprep.subr.mxu0 %v346_v5  ;;  %863 = vmatprep.subr.mxu1 %v963_v4  ;;  %v340_v11 = vld [vmem:[%s1377_s3 + $0x128] sm:$0xff]  ;;  %v341_v13 = vld [vmem:[%s1377_s3 + $0x130] sm:$0xff] }
   0xf   : > { %275 = vadd.xlane.f32.xlu0 %v1021_v0  ;;  %371 = vmatpush1.msra.mxu0 %v345_v6  ;;  %v339_v12 = vld [vmem:[%s1377_s3 + $0x120] sm:$0xff]  ;;  %v337_v18 = vld [vmem:[%s1377_s3 + $0x110] sm:$0xff]  ;;  %v336_v19 = vld [vmem:[%s1377_s3 + $0x108] sm:$0xff] }
  0x10   : > { %864 = vmatpush3.msra.mxu1 %v347_v7  ;;  %372 = vmatprep.subr.mxu0 %v343_v8  ;;  %v338_v20 = vld [vmem:[%s1377_s3 + $0x118] sm:$0xff]  ;;  %v333_v22 = vld [vmem:[%s1377_s3 + $0xf0] sm:$0xff]  ;;  %v335_v23 = vld [vmem:[%s1377_s3 + $0x100] sm:$0xff] }
  0x11   : > { %865 = vmatprep.subr.mxu1 %v963_v4  ;;  %373 = vmatpush1.msra.mxu0 %v342_v9  ;;  %v334_v21 = vld [vmem:[%s1377_s3 + $0xf8] sm:$0xff]  ;;  %v331_v24 = vld [vmem:[%s1377_s3 + $0xe0] sm:$0xff]  ;;  %v332_v26 = vld [vmem:[%s1377_s3 + $0xe8] sm:$0xff] }
  0x12   : > { %866 = vmatpush3.msra.mxu1 %v344_v10  ;;  %374 = vmatprep.subr.mxu0 %v340_v11  ;;  %v330_v25 = vld [vmem:[%s1377_s3 + $0xd8] sm:$0xff]  ;;  %v328_v27 = vld [vmem:[%s1377_s3 + $0xc8] sm:$0xff]  ;;  %v327_v28 = vld [vmem:[%s1377_s3 + $0xc0] sm:$0xff] }
  0x13   : > { %867 = vmatprep.subr.mxu1 %v963_v4  ;;  %375 = vmatpush1.msra.mxu0 %v339_v12  ;;  %v329_v29 = vld [vmem:[%s1377_s3 + $0xd0] sm:$0xff]  ;;  %v324_v31 = vld [vmem:[%s1377_s3 + $0xa8] sm:$0xff]  ;;  %v326_v32 = vld [vmem:[%s1377_s3 + $0xb8] sm:$0xff] }
  0x14   : > { %868 = vmatpush3.msra.mxu1 %v341_v13  ;;  %432 = vmatprep.mubr.f32.mxu0 %v963_v4  ;;  %v325_v30 = vld [vmem:[%s1377_s3 + $0xb0] sm:$0xff]  ;;  %v322_v33 = vld [vmem:[%s1377_s3 + $0x98] sm:$0xff]  ;;  %v323_v35 = vld [vmem:[%s1377_s3 + $0xa0] sm:$0xff] }
  0x15   : > { %869 = vmatprep.subr.mxu1 %v963_v4  ;;  %376 = vmatprep.subr.mxu0 %v337_v18  ;;  %v321_v34 = vld [vmem:[%s1377_s3 + $0x90] sm:$0xff]  ;;  %v319_v36 = vld [vmem:[%s1377_s3 + $0x80] sm:$0xff]  ;;  %v318_v37 = vld [vmem:[%s1377_s3 + $0x78] sm:$0xff] }
  0x16   : > { %377 = vmatpush1.msra.mxu0 %v336_v19  ;;  %870 = vmatpush3.msra.mxu1 %v338_v20  ;;  %v320_v38 = vld [vmem:[%s1377_s3 + $0x88] sm:$0xff]  ;;  %v315_v40 = vld [vmem:[%s1377_s3 + $0x60] sm:$0xff]  ;;  %v317_v41 = vld [vmem:[%s1377_s3 + $0x70] sm:$0xff] }
  0x17   : > { %378 = vmatprep.subr.mxu0 %v334_v21  ;;  %871 = vmatprep.subr.mxu1 %v963_v4  ;;  %v316_v39 = vld [vmem:[%s1377_s3 + $0x68] sm:$0xff]  ;;  %v313_v42 = vld [vmem:[%s1377_s3 + $0x50] sm:$0xff]  ;;  %v314_v44 = vld [vmem:[%s1377_s3 + $0x58] sm:$0xff] }
  0x18   : > { %379 = vmatpush1.msra.mxu0 %v333_v22  ;;  %872 = vmatpush3.msra.mxu1 %v335_v23  ;;  %v312_v43 = vld [vmem:[%s1377_s3 + $0x48] sm:$0xff]  ;;  %v310_v45 = vld [vmem:[%s1377_s3 + $0x38] sm:$0xff]  ;;  %v309_v46 = vld [vmem:[%s1377_s3 + $0x30] sm:$0xff] }
  0x19   : > { %380 = vmatprep.subr.mxu0 %v331_v24  ;;  %873 = vmatprep.subr.mxu1 %v963_v4  ;;  %v311_v47 = vld [vmem:[%s1377_s3 + $0x40] sm:$0xff]  ;;  %v306_v49 = vld [vmem:[%s1377_s3 + $0x18] sm:$0xff]  ;;  %v308_v50 = vld [vmem:[%s1377_s3 + $0x28] sm:$0xff] }
  0x1a   : > { %381 = vmatpush1.msra.mxu0 %v330_v25  ;;  %874 = vmatpush3.msra.mxu1 %v332_v26  ;;  %v307_v48 = vld [vmem:[%s1377_s3 + $0x20] sm:$0xff]  ;;  %v304_v51 = vld [vmem:[%s1377_s3 + $0x8] sm:$0xff]  ;;  %v305_v53 = vld [vmem:[%s1377_s3 + $0x10] sm:$0xff] }
  0x1b   : > { %382 = vmatprep.subr.mxu0 %v328_v27  ;;  %875 = vmatprep.subr.mxu1 %v963_v4  ;;  %v303_v52 = vld [vmem:[%s1377_s3] sm:$0xff]  ;;  %v577_v63 = vld [vmem:[%s1379_s5 + $0x178] sm:$0xff]  ;;  %v576_v2 = vld [vmem:[%s1379_s5 + $0x170] sm:$0xff] }
  0x1c   : > { %383 = vmatpush1.msra.mxu0 %v327_v28  ;;  %876 = vmatpush3.msra.mxu1 %v329_v29  ;;  %v787_v58 = vld [vmem:[%s1375_s1] ss:$0 sm:$0xff]  ;;  %v561_v1 = vld [vmem:[%s1379_s5 + $0xf8] sm:$0xff]  ;;  %v560_v5 = vld [vmem:[%s1379_s5 + $0xf0] sm:$0xff] }
  0x1d   : > { %384 = vmatprep.subr.mxu0 %v325_v30  ;;  %877 = vmatprep.subr.mxu1 %v963_v4  ;;  %v788_v60 = vld [vmem:[%s1376_s2] ss:$0 sm:$0xff]  ;;  %v545_v3 = vld [vmem:[%s1379_s5 + $0x78] sm:$0xff]  ;;  %v575_v6 = vld [vmem:[%s1379_s5 + $0x168] sm:$0xff] }
  0x1e   : > { %385 = vmatpush1.msra.mxu0 %v324_v31  ;;  %878 = vmatpush3.msra.mxu1 %v326_v32  ;;  %v544_v7 = vld [vmem:[%s1379_s5 + $0x70] sm:$0xff]  ;;  %v559_v8 = vld [vmem:[%s1379_s5 + $0xe8] sm:$0xff]  ;;  %v574_v9 = vld [vmem:[%s1379_s5 + $0x160] sm:$0xff] }
  0x1f   : > { %386 = vmatprep.subr.mxu0 %v322_v33  ;;  %879 = vmatprep.subr.mxu1 %v963_v4  ;;  %v543_v10 = vld [vmem:[%s1379_s5 + $0x68] sm:$0xff]  ;;  %v558_v11 = vld [vmem:[%s1379_s5 + $0xe0] sm:$0xff]  ;;  %v573_v12 = vld [vmem:[%s1379_s5 + $0x158] sm:$0xff] }
  0x20   : > { %387 = vmatpush1.msra.mxu0 %v321_v34  ;;  %880 = vmatpush3.msra.mxu1 %v323_v35  ;;  %v542_v13 = vld [vmem:[%s1379_s5 + $0x60] sm:$0xff]  ;;  %v571_v18 = vld [vmem:[%s1379_s5 + $0x148] sm:$0xff]  ;;  %v540_v19 = vld [vmem:[%s1379_s5 + $0x50] sm:$0xff] }
  0x21   : > { %388 = vmatprep.subr.mxu0 %v319_v36  ;;  %881 = vmatprep.subr.mxu1 %v963_v4  ;;  %v555_v20 = vld [vmem:[%s1379_s5 + $0xc8] sm:$0xff]  ;;  %v570_v21 = vld [vmem:[%s1379_s5 + $0x140] sm:$0xff]  ;;  %v569_v24 = vld [vmem:[%s1379_s5 + $0x138] sm:$0xff] }
  0x22   : > { %389 = vmatpush1.msra.mxu0 %v318_v37  ;;  %882 = vmatpush3.msra.mxu1 %v320_v38  ;;  %v539_v22 = vld [vmem:[%s1379_s5 + $0x48] sm:$0xff]  ;;  %v554_v23 = vld [vmem:[%s1379_s5 + $0xc0] sm:$0xff]  ;;  %v553_v26 = vld [vmem:[%s1379_s5 + $0xb8] sm:$0xff] }
  0x23   : > { %390 = vmatprep.subr.mxu0 %v316_v39  ;;  %883 = vmatprep.subr.mxu1 %v963_v4  ;;  %v538_v25 = vld [vmem:[%s1379_s5 + $0x40] sm:$0xff]  ;;  %v568_v27 = vld [vmem:[%s1379_s5 + $0x130] sm:$0xff]  ;;  %v537_v28 = vld [vmem:[%s1379_s5 + $0x38] sm:$0xff] }
  0x24   : > { %391 = vmatpush1.msra.mxu0 %v315_v40  ;;  %884 = vmatpush3.msra.mxu1 %v317_v41  ;;  %v552_v29 = vld [vmem:[%s1379_s5 + $0xb0] sm:$0xff]  ;;  %v567_v30 = vld [vmem:[%s1379_s5 + $0x128] sm:$0xff]  ;;  %v566_v33 = vld [vmem:[%s1379_s5 + $0x120] sm:$0xff] }
  0x25   : > { %392 = vmatprep.subr.mxu0 %v313_v42  ;;  %885 = vmatprep.subr.mxu1 %v963_v4  ;;  %v536_v31 = vld [vmem:[%s1379_s5 + $0x30] sm:$0xff]  ;;  %v551_v32 = vld [vmem:[%s1379_s5 + $0xa8] sm:$0xff]  ;;  %v550_v35 = vld [vmem:[%s1379_s5 + $0xa0] sm:$0xff] }
  0x26   : > { %393 = vmatpush1.msra.mxu0 %v312_v43  ;;  %886 = vmatpush3.msra.mxu1 %v314_v44  ;;  %v535_v34 = vld [vmem:[%s1379_s5 + $0x28] sm:$0xff]  ;;  %v565_v36 = vld [vmem:[%s1379_s5 + $0x118] sm:$0xff]  ;;  %v534_v37 = vld [vmem:[%s1379_s5 + $0x20] sm:$0xff] }
  0x27   : > { %394 = vmatprep.subr.mxu0 %v310_v45  ;;  %887 = vmatprep.subr.mxu1 %v963_v4  ;;  %v549_v38 = vld [vmem:[%s1379_s5 + $0x98] sm:$0xff]  ;;  %v564_v39 = vld [vmem:[%s1379_s5 + $0x110] sm:$0xff]  ;;  %v563_v42 = vld [vmem:[%s1379_s5 + $0x108] sm:$0xff] }
  0x28   : > { %395 = vmatpush1.msra.mxu0 %v309_v46  ;;  %888 = vmatpush3.msra.mxu1 %v311_v47  ;;  %v533_v40 = vld [vmem:[%s1379_s5 + $0x18] sm:$0xff]  ;;  %v548_v41 = vld [vmem:[%s1379_s5 + $0x90] sm:$0xff]  ;;  %v547_v44 = vld [vmem:[%s1379_s5 + $0x88] sm:$0xff] }
  0x29   : > { %396 = vmatprep.subr.mxu0 %v307_v48  ;;  %889 = vmatprep.subr.mxu1 %v963_v4  ;;  %v532_v43 = vld [vmem:[%s1379_s5 + $0x10] sm:$0xff]  ;;  %v562_v45 = vld [vmem:[%s1379_s5 + $0x100] sm:$0xff]  ;;  %v531_v46 = vld [vmem:[%s1379_s5 + $0x8] sm:$0xff]  ;;  %v353_v48 = vlaneseq }
  0x2a   : > { %397 = vmatpush1.msra.mxu0 %v306_v49  ;;  %890 = vmatpush3.msra.mxu1 %v308_v50  ;;  %v546_v47 = vld [vmem:[%s1379_s5 + $0x80] sm:$0xff] }
  0x2b   : > { %398 = vmatprep.subr.mxu0 %v304_v51  ;;  %891 = vmatprep.subr.mxu1 %v963_v4  ;;  %v354_v49 = vshrl.u32 %v353_v48, 7 }
  0x2c   : > { %399 = vmatpush1.msra.mxu0 %v303_v52  ;;  %892 = vmatpush3.msra.mxu1 %v305_v53  ;;  %v351_v52 = vld [vmem:[%s1378_s4] sm:$0x7] }
  0x2d   : > { %893 = vmatprep.mubr.msk.f32.mxu1 %vm964_vm0, %v963_v4  ;;  %896 = vmatprep.subr.mxu1 %v963_v4  ;;  %v355_v50 = vsub.s32 0, %v354_v49  ;;  %v363_v51 = vsub.s32 2, %v354_v49  ;;  %v359_v53 = vsub.s32 1, %v354_v49 }
  0x2e   : > { %809 = vmatprep.subr.mxu0 %v561_v1 }
  0x98   : > { %v276_v14 = vpop.xlane.xlu0 %275 }
  0x99   : > { %v278_v15 = vmul.f32 0.0078125, %v276_v14  ;;  %v557_v14 = vld [vmem:[%s1379_s5 + $0xd8] sm:$0xff] }
  0x9b   : > { %v1067_v16 = vsub.f32 %v1021_v0, %v278_v15  ;;  %v572_v15 = vld [vmem:[%s1379_s5 + $0x150] sm:$0xff] }
  0x9d   : > { %v280_v17 = vmul.f32 %v1067_v16, %v1067_v16 }
  0x9f   : > { %281 = vadd.xlane.f32.xlu0 %v280_v17  ;;  %v556_v17 = vld [vmem:[%s1379_s5 + $0xd0] sm:$0xff] }
 0x128   : > { %v282_v54 = vpop.xlane.xlu0 %281 }
 0x129   : > { %v283_v55 = vmul.f32 0.0078125, %v282_v54  ;;  %v356_v54 = vrot.slane %v351_v52, %v355_v50 }
 0x12b   : > { %v284_v56 = vadd.f32 1e-05, %v283_v55  ;;  %v364_v55 = vrot.slane %v351_v52, %v363_v51 }
 0x12d   : > { %941 = vrsqrt.f32 %v284_v56  ;;  %v360_v56 = vrot.slane %v351_v52, %v359_v53 }
 0x13a   : > { %v942_v57 = vpop.eup %941 }
 0x13b   : > { %v286_v59 = vmul.f32 %v942_v57, %v1067_v16  ;;  %v541_v16 = vld [vmem:[%s1379_s5 + $0x58] sm:$0xff] }
 0x13d   : > { %v294_v61 = vmul.f32 %v787_v58, %v286_v59 }
 0x13f   : > { %v302_v62 = vadd.f32 %v788_v60, %v294_v61 }
 0x141   : > { %433 = vmatmul.mubr.f32.vlgmr.msra.gmra.mxu0 %v302_v62  ;;  %894 = vmatmul.mubr.f32.vlgmr.msra.gmra.mxu1 %v302_v62 }
 0x142   : > { %928 = vmatprep.mubr.msk.f32.mxu1 %vm964_vm0, %v963_v4  ;;  %897 = vmatpush3.msra.mxu1 %v577_v63 }
 0x143   : > { %898 = vmatprep.subr.mxu1 %v963_v4  ;;  %810 = vmatpush3.msra.mxu0 %v545_v3 }
 0x144   : > { %899 = vmatpush3.msra.mxu1 %v576_v2  ;;  %811 = vmatprep.subr.mxu0 %v560_v5 }
 0x145   : > { %900 = vmatprep.subr.mxu1 %v963_v4  ;;  %812 = vmatpush3.msra.mxu0 %v544_v7 }
 0x146   : > { %901 = vmatpush3.msra.mxu1 %v575_v6  ;;  %813 = vmatprep.subr.mxu0 %v559_v8 }
 0x147   : > { %902 = vmatprep.subr.mxu1 %v963_v4  ;;  %814 = vmatpush3.msra.mxu0 %v543_v10 }
 0x148   : > { %903 = vmatpush3.msra.mxu1 %v574_v9  ;;  %815 = vmatprep.subr.mxu0 %v558_v11 }
 0x149   : > { %904 = vmatprep.subr.mxu1 %v963_v4  ;;  %816 = vmatpush3.msra.mxu0 %v542_v13 }
 0x14a   : > { %905 = vmatpush3.msra.mxu1 %v573_v12  ;;  %817 = vmatprep.subr.mxu0 %v557_v14 }
 0x14b   : > { %906 = vmatprep.subr.mxu1 %v963_v4  ;;  %818 = vmatpush3.msra.mxu0 %v541_v16 }
 0x14c   : > { %907 = vmatpush3.msra.mxu1 %v572_v15  ;;  %819 = vmatprep.subr.mxu0 %v556_v17 }
 0x14d   : > { %908 = vmatprep.subr.mxu1 %v963_v4  ;;  %820 = vmatpush3.msra.mxu0 %v540_v19 }
 0x14e   : > { %909 = vmatpush3.msra.mxu1 %v571_v18  ;;  %821 = vmatprep.subr.mxu0 %v555_v20 }
 0x14f   : > { %910 = vmatprep.subr.mxu1 %v963_v4  ;;  %822 = vmatpush3.msra.mxu0 %v539_v22 }
 0x150   : > { %911 = vmatpush3.msra.mxu1 %v570_v21  ;;  %823 = vmatprep.subr.mxu0 %v554_v23  ;;  %v789_v23 = vld [vmem:[%s1380_s6] ss:$0 sm:$0xff] }
 0x151   : > { %912 = vmatprep.subr.mxu1 %v963_v4  ;;  %824 = vmatpush3.msra.mxu0 %v538_v25 }
 0x152   : > { %913 = vmatpush3.msra.mxu1 %v569_v24  ;;  %825 = vmatprep.subr.mxu0 %v553_v26 }
 0x153   : > { %914 = vmatprep.subr.mxu1 %v963_v4  ;;  %826 = vmatpush3.msra.mxu0 %v537_v28 }
 0x154   : > { %915 = vmatpush3.msra.mxu1 %v568_v27  ;;  %827 = vmatprep.subr.mxu0 %v552_v29 }
 0x155   : > { %916 = vmatprep.subr.mxu1 %v963_v4  ;;  %828 = vmatpush3.msra.mxu0 %v536_v31 }
 0x156   : > { %917 = vmatpush3.msra.mxu1 %v567_v30  ;;  %829 = vmatprep.subr.mxu0 %v551_v32 }
 0x157   : > { %918 = vmatprep.subr.mxu1 %v963_v4  ;;  %830 = vmatpush3.msra.mxu0 %v535_v34 }
 0x158   : > { %919 = vmatpush3.msra.mxu1 %v566_v33  ;;  %831 = vmatprep.subr.mxu0 %v550_v35 }
 0x159   : > { %920 = vmatprep.subr.mxu1 %v963_v4  ;;  %832 = vmatpush3.msra.mxu0 %v534_v37 }
 0x15a   : > { %921 = vmatpush3.msra.mxu1 %v565_v36  ;;  %833 = vmatprep.subr.mxu0 %v549_v38 }
 0x15b   : > { %922 = vmatprep.subr.mxu1 %v963_v4  ;;  %834 = vmatpush3.msra.mxu0 %v533_v40 }
 0x15c   : > { %923 = vmatpush3.msra.mxu1 %v564_v39  ;;  %835 = vmatprep.subr.mxu0 %v548_v41 }
 0x15d   : > { %924 = vmatprep.subr.mxu1 %v963_v4  ;;  %836 = vmatpush3.msra.mxu0 %v532_v43 }
 0x15e   : > { %925 = vmatpush3.msra.mxu1 %v563_v42  ;;  %837 = vmatprep.subr.mxu0 %v547_v44 }
 0x15f   : > { %926 = vmatprep.subr.mxu1 %v963_v4  ;;  %838 = vmatpush3.msra.mxu0 %v531_v46  ;;  %v530_v4 = vld [vmem:[%s1379_s5] sm:$0xff] }
 0x160   : > { %927 = vmatpush3.msra.mxu1 %v562_v45  ;;  %839 = vmatprep.subr.mxu0 %v546_v47 }
 0x161   : > { %840 = vmatpush3.msra.mxu0 %v530_v4 }
 0x201   : > { %v434_v57 = vpop.f32.mrf.mxu0  ;;  %v505_v58 = vpop.f32.mrf.mxu1 }
 0x202   : > { %v435_v59 = vadd.f32 %v434_v57, %v356_v54  ;;  %v506_v60 = vadd.f32 %v505_v58, %v364_v55 }
 0x203   : > { %v436_v61 = vpop.f32.mrf.mxu0  ;;  %v895_v62 = vpop.f32.mrf.mxu1 }
 0x204   : > { %v509_v63 = vsub.f32 0.0, %v435_v59  ;;  %v511_v1 = vsub.f32 0.0, %v506_v60  ;;  %v437_v2 = vadd.f32 %v436_v61, %v360_v56 }
 0x206   : > { %v512_v3 = vmul.f32 1.442695, %v509_v63  ;;  %v516_v5 = vmul.f32 1.442695, %v511_v1  ;;  %v510_v6 = vsub.f32 0.0, %v437_v2 }
 0x208   : > { %943 = vpow2.f32 %v512_v3  ;;  %v514_v7 = vmul.f32 1.442695, %v510_v6 }
 0x209   : > { %945 = vpow2.f32 %v516_v5 }
 0x20a   : > { %947 = vpow2.f32 %v514_v7 }
 0x215   : > { %v944_v8 = vpop.eup %943 }
 0x216   : > { %v946_v9 = vpop.eup %945  ;;  %v518_v10 = vadd.f32 1.0, %v944_v8 }
 0x217   : > { %v948_v11 = vpop.eup %947  ;;  %v520_v12 = vadd.f32 1.0, %v946_v9 }
 0x218   : > { %949 = vrcp.f32 %v518_v10  ;;  %v519_v13 = vadd.f32 1.0, %v948_v11 }
 0x219   : > { %951 = vrcp.f32 %v520_v12 }
 0x21a   : > { %953 = vrcp.f32 %v519_v13 }
 0x225   : > { %v950_v14 = vpop.eup %949 }
 0x226   : > { %v952_v15 = vpop.eup %951  ;;  %v527_v19 = vmul.f32 %v950_v14, %v435_v59 }
 0x227   : > { %v954_v16 = vpop.eup %953  ;;  %v529_v17 = vmul.f32 %v952_v15, %v506_v60 }
 0x228   : > { %v528_v18 = vmul.f32 %v954_v16, %v437_v2 }
 0x229   : > { %929 = vmatmul.mubr.f32.vlgmr.msra.gmra.mxu1 %v529_v17 }
 0x22a   : > { %649 = vmatprep.mubr.f32.mxu0 %v528_v18 }
 0x22b   : > { %650 = vmatmul.mubr.f32.vlgmr.msra.gmra.mxu0 %v527_v19 }
 0x2e9   : > { %v721_v20 = vpop.f32.mrf.mxu1 }
 0x2eb   : > { %v930_v21 = vpop.f32.mrf.mxu1  ;;  %v841_v22 = vpop.f32.mrf.mxu0 }
 0x2ed   : > { %v842_v24 = vpop.f32.mrf.mxu0 }
 0x2ee   : > { %v843_v25 = vadd.f32 %v842_v24, %v841_v22 }
 0x2f0   : > { %v652_v26 = vadd.f32 %v843_v25, %v789_v23 }
 0x2f2   : > { %v722_v27 = vadd.f32 %v721_v20, %v652_v26 }
 0x2f4   : > { %v725_v28 = vadd.f32 %v722_v27, %v1021_v0 }
 0x2f6   : > { %726 = vst [vmem:[%s273_s9] sm:$0xff] %v725_v28 }
 0x2f7 PF: > { %s17_s24 = sadd.s32 1, %s961_s24  }
 0x2f8   : > { %p14_p4 = scmp.ge.s32.totalorder %s17_s24, 4  }
 0x2fa   :  { %16 = sbr.rel (!%p14_p4) target bundleno = 1 (0x1), region = 78 }

// kernel: _lambda_.37
= control target key start
LH: loop header
LB: loop body
LE: loop exit
PB: predicated region body
PF: predicated region fallthrough
CT: control target
= control target key end

     0   :  { %s346_s9 = smov 0   ;;  %s463_s0 = inlined_call_operand.vmem [shape: f32[16,128], index: 0, kind: input, shape index: {}]   ;;  %s464_s1 = inlined_call_operand.vmem [shape: f32[128,256], index: 1, kind: input, shape index: {}]   ;;  %s465_s2 = inlined_call_operand.vmem [shape: f32[16,256], index: 2, kind: output, shape index: {}]  }
   0x1 LB: > { %s302_s10 = sadd.s32 4294967295, %s328_s9   ;;  %p306_p0 = scmp.ge.s32.totalorder %s328_s9, 1  ;;  %s328_s9 = sphi %s346_s9, %s12_s9  }
   0x2   : > { %p111_p1 = scmp.lt.s32.totalorder %s328_s9, 3 }
   0x4   : > { %p112_p2 = pnand %p306_p0, %p111_p1 }
   0x5   : > { %p132_p3 = scmp.lt.s32.totalorder (!%p112_p2), %s302_s10, 1 }
   0x6   : > { %115 = sbr.rel (%p112_p2) target bundleno = 240 (0xf0), region = 28 }
   0xb   : > { %v173_v0 = vld [vmem:[%s464_s1 + $0xf8] sm:$0xff]  ;;  %v172_v1 = vld [vmem:[%s464_s1 + $0xf0] sm:$0xff]  ;;  %v171_v2 = vld [vmem:[%s464_s1 + $0xe8] sm:$0xff]  ;;  %v330_v4 = vmov 0.0   ;;  %s467_s10 = smov (!%p132_p3, %s302_s10), 1 }
   0xc   : > { %174 = vmatprep.subr.mxu0 %v173_v0  ;;  %v170_v3 = vld [vmem:[%s464_s1 + $0xe0] sm:$0xff]  ;;  %238 = vmatprep.mubr.f32.mxu0 %v330_v4  ;;  %v169_v5 = vld [vmem:[%s464_s1 + $0xd8] sm:$0xff]  ;;  %v168_v6 = vld [vmem:[%s464_s1 + $0xd0] sm:$0xff]  ;;  %s307_s13 = sshll.u32 %s467_s10, 3  ;;  %s312_s27 = sshll.u32 %s467_s10, 4 }
   0xd   : > { %175 = vmatpush1.msra.mxu0 %v172_v1  ;;  %v167_v7 = vld [vmem:[%s464_s1 + $0xc8] sm:$0xff]  ;;  %v166_v8 = vld [vmem:[%s464_s1 + $0xc0] sm:$0xff]  ;;  %v165_v9 = vld [vmem:[%s464_s1 + $0xb8] sm:$0xff]  ;;  %s135_s22 = scalar_lea.vmem %s463_s0, %s307_s13  ;;  %s140_s30 = scalar_lea.vmem %s465_s2, %s312_s27 }
   0xe   : > { %176 = vmatprep.subr.mxu0 %v171_v2  ;;  %v164_v10 = vld [vmem:[%s464_s1 + $0xb0] sm:$0xff]  ;;  %v163_v11 = vld [vmem:[%s464_s1 + $0xa8] sm:$0xff]  ;;  %v162_v12 = vld [vmem:[%s464_s1 + $0xa0] sm:$0xff] }
   0xf   : > { %177 = vmatpush1.msra.mxu0 %v170_v3  ;;  %v161_v13 = vld [vmem:[%s464_s1 + $0x98] sm:$0xff]  ;;  %v160_v14 = vld [vmem:[%s464_s1 + $0x90] sm:$0xff]  ;;  %v159_v15 = vld [vmem:[%s464_s1 + $0x88] sm:$0xff] }
  0x10   : > { %178 = vmatprep.subr.mxu0 %v169_v5  ;;  %v158_v16 = vld [vmem:[%s464_s1 + $0x80] sm:$0xff]  ;;  %v157_v17 = vld [vmem:[%s464_s1 + $0x78] sm:$0xff]  ;;  %v156_v18 = vld [vmem:[%s464_s1 + $0x70] sm:$0xff] }
  0x11   : > { %179 = vmatpush1.msra.mxu0 %v168_v6  ;;  %v155_v19 = vld [vmem:[%s464_s1 + $0x68] sm:$0xff]  ;;  %v154_v20 = vld [vmem:[%s464_s1 + $0x60] sm:$0xff]  ;;  %v153_v21 = vld [vmem:[%s464_s1 + $0x58] sm:$0xff] }
  0x12   : > { %180 = vmatprep.subr.mxu0 %v167_v7  ;;  %v152_v22 = vld [vmem:[%s464_s1 + $0x50] sm:$0xff]  ;;  %v151_v23 = vld [vmem:[%s464_s1 + $0x48] sm:$0xff]  ;;  %v150_v24 = vld [vmem:[%s464_s1 + $0x40] sm:$0xff] }
  0x13   : > { %181 = vmatpush1.msra.mxu0 %v166_v8  ;;  %v149_v25 = vld [vmem:[%s464_s1 + $0x38] sm:$0xff]  ;;  %v148_v26 = vld [vmem:[%s464_s1 + $0x30] sm:$0xff]  ;;  %v147_v27 = vld [vmem:[%s464_s1 + $0x28] sm:$0xff] }
  0x14   : > { %182 = vmatprep.subr.mxu0 %v165_v9  ;;  %v146_v28 = vld [vmem:[%s464_s1 + $0x20] sm:$0xff]  ;;  %v145_v29 = vld [vmem:[%s464_s1 + $0x18] sm:$0xff]  ;;  %v144_v30 = vld [vmem:[%s464_s1 + $0x10] sm:$0xff] }
  0x15   : > { %183 = vmatpush1.msra.mxu0 %v164_v10  ;;  %v143_v31 = vld [vmem:[%s464_s1 + $0x8] sm:$0xff]  ;;  %v142_v32 = vld [vmem:[%s464_s1] sm:$0xff] }
  0x16   : > { %184 = vmatprep.subr.mxu0 %v163_v11  ;;  %v141_v33 = vld [vmem:[%s135_s22] sm:$0xff] }
  0x17   : > { %185 = vmatpush1.msra.mxu0 %v162_v12 }
  0x18   : > { %186 = vmatprep.subr.mxu0 %v161_v13 }
  0x19   : > { %187 = vmatpush1.msra.mxu0 %v160_v14 }
  0x1a   : > { %188 = vmatprep.subr.mxu0 %v159_v15 }
  0x1b   : > { %189 = vmatpush1.msra.mxu0 %v158_v16 }
  0x1c   : > { %190 = vmatprep.subr.mxu0 %v157_v17 }
  0x1d   : > { %191 = vmatpush1.msra.mxu0 %v156_v18 }
  0x1e   : > { %192 = vmatprep.subr.mxu0 %v155_v19 }
  0x1f   : > { %193 = vmatpush1.msra.mxu0 %v154_v20 }
  0x20   : > { %194 = vmatprep.subr.mxu0 %v153_v21 }
  0x21   : > { %195 = vmatpush1.msra.mxu0 %v152_v22 }
  0x22   : > { %196 = vmatprep.subr.mxu0 %v151_v23 }
  0x23   : > { %197 = vmatpush1.msra.mxu0 %v150_v24 }
  0x24   : > { %198 = vmatprep.subr.mxu0 %v149_v25 }
  0x25   : > { %199 = vmatpush1.msra.mxu0 %v148_v26 }
  0x26   : > { %200 = vmatprep.subr.mxu0 %v147_v27 }
  0x27   : > { %201 = vmatpush1.msra.mxu0 %v146_v28 }
  0x28   : > { %202 = vmatprep.subr.mxu0 %v145_v29 }
  0x29   : > { %203 = vmatpush1.msra.mxu0 %v144_v30 }
  0x2a   : > { %204 = vmatprep.subr.mxu0 %v143_v31 }
  0x2b   : > { %205 = vmatpush1.msra.mxu0 %v142_v32 }
  0x2c   : > { %239 = vmatmul.mubr.f32.vlgmr.msra.gmra.mxu0 %v141_v33 }
  0xec   : > { %v240_v34 = vpop.f32.mrf.mxu0 }
  0xed   : > { %245 = vst [vmem:[%s140_s30] sm:$0xff] %v240_v34 }
  0xee   : > { %v242_v35 = vpop.f32.mrf.mxu0 }
  0xef   : > { %246 = vst [vmem:[%s140_s30 + $0x8] sm:$0xff] %v242_v35 }
  0xf0 PF: > { %s12_s9 = sadd.s32 1, %s328_s9  }
  0xf1   : > { %p9_p4 = scmp.ge.s32.totalorder %s12_s9, 4  }
  0xf3   :  { %11 = sbr.rel (!%p9_p4) target bundleno = 1 (0x1), region = 58 }

// kernel: _lambda_.42
= control target key start
LH: loop header
LB: loop body
LE: loop exit
PB: predicated region body
PF: predicated region fallthrough
CT: control target
= control target key end

     0   :  { %s400_s9 = smov 0   ;;  %s519_s0 = inlined_call_operand.vmem [shape: f32[32,128], index: 0, kind: input, shape index: {}]   ;;  %s520_s1 = inlined_call_operand.vmem [shape: f32[128,256], index: 1, kind: input, shape index: {}]   ;;  %s521_s2 = inlined_call_operand.vmem [shape: f32[32,256], index: 2, kind: output, shape index: {}]  }
   0x1 LB: > { %s322_s10 = sadd.s32 4294967295, %s382_s9   ;;  %p326_p0 = scmp.ge.s32.totalorder %s382_s9, 1  ;;  %s382_s9 = sphi %s400_s9, %s12_s9  }
   0x2   : > { %p113_p1 = scmp.lt.s32.totalorder %s382_s9, 3 }
   0x4   : > { %p114_p2 = pnand %p326_p0, %p113_p1 }
   0x5   : > { %s327_s19 = sshll.u32 (!%p114_p2), %s322_s10, 1 }
   0x6   : > { %117 = sbr.rel (%p114_p2) target bundleno = 241 (0xf1), region = 28  ;;  %p137_p3 = scmp.lt.s32.totalorder (!%p114_p2), %s327_s19, 3 }
   0xb   : > { %v182_v0 = vld [vmem:[%s520_s1 + $0xf8] sm:$0xff]  ;;  %v181_v1 = vld [vmem:[%s520_s1 + $0xf0] sm:$0xff]  ;;  %v180_v2 = vld [vmem:[%s520_s1 + $0xe8] sm:$0xff]  ;;  %s523_s19 = smov (!%p137_p3, %s327_s19), 3  ;;  %v384_v34 = vmov 0.0  }
   0xc   : > { %183 = vmatprep.subr.mxu0 %v182_v0  ;;  %335 = vmatprep.subr.mxu1 %v182_v0  ;;  %v179_v3 = vld [vmem:[%s520_s1 + $0xe0] sm:$0xff]  ;;  %v178_v4 = vld [vmem:[%s520_s1 + $0xd8] sm:$0xff]  ;;  %v177_v5 = vld [vmem:[%s520_s1 + $0xd0] sm:$0xff]  ;;  %s328_s15 = sshll.u32 %s523_s19, 3  ;;  %s334_s27 = sshll.u32 %s523_s19, 4 }
   0xd   : > { %184 = vmatpush1.msra.mxu0 %v181_v1  ;;  %351 = vmatpush1.msra.mxu1 %v181_v1  ;;  %v176_v6 = vld [vmem:[%s520_s1 + $0xc8] sm:$0xff]  ;;  %v175_v7 = vld [vmem:[%s520_s1 + $0xc0] sm:$0xff]  ;;  %v174_v8 = vld [vmem:[%s520_s1 + $0xb8] sm:$0xff]  ;;  %s140_s25 = scalar_lea.vmem %s519_s0, %s328_s15  ;;  %s147_s30 = scalar_lea.vmem %s521_s2, %s334_s27 }
   0xe   : > { %185 = vmatprep.subr.mxu0 %v180_v2  ;;  %336 = vmatprep.subr.mxu1 %v180_v2  ;;  %v173_v9 = vld [vmem:[%s520_s1 + $0xb0] sm:$0xff]  ;;  %v172_v10 = vld [vmem:[%s520_s1 + $0xa8] sm:$0xff]  ;;  %v171_v11 = vld [vmem:[%s520_s1 + $0xa0] sm:$0xff] }
   0xf   : > { %186 = vmatpush1.msra.mxu0 %v179_v3  ;;  %352 = vmatpush1.msra.mxu1 %v179_v3  ;;  %v170_v12 = vld [vmem:[%s520_s1 + $0x98] sm:$0xff]  ;;  %v169_v13 = vld [vmem:[%s520_s1 + $0x90] sm:$0xff]  ;;  %v168_v14 = vld [vmem:[%s520_s1 + $0x88] sm:$0xff] }
  0x10   : > { %187 = vmatprep.subr.mxu0 %v178_v4  ;;  %337 = vmatprep.subr.mxu1 %v178_v4  ;;  %v167_v15 = vld [vmem:[%s520_s1 + $0x80] sm:$0xff]  ;;  %v166_v16 = vld [vmem:[%s520_s1 + $0x78] sm:$0xff]  ;;  %v165_v17 = vld [vmem:[%s520_s1 + $0x70] sm:$0xff] }
  0x11   : > { %188 = vmatpush1.msra.mxu0 %v177_v5  ;;  %353 = vmatpush1.msra.mxu1 %v177_v5  ;;  %v164_v18 = vld [vmem:[%s520_s1 + $0x68] sm:$0xff]  ;;  %v163_v19 = vld [vmem:[%s520_s1 + $0x60] sm:$0xff]  ;;  %v162_v20 = vld [vmem:[%s520_s1 + $0x58] sm:$0xff] }
  0x12   : > { %189 = vmatprep.subr.mxu0 %v176_v6  ;;  %338 = vmatprep.subr.mxu1 %v176_v6  ;;  %v161_v21 = vld [vmem:[%s520_s1 + $0x50] sm:$0xff]  ;;  %v160_v22 = vld [vmem:[%s520_s1 + $0x48] sm:$0xff]  ;;  %v159_v23 = vld [vmem:[%s520_s1 + $0x40] sm:$0xff] }
  0x13   : > { %190 = vmatpush1.msra.mxu0 %v175_v7  ;;  %354 = vmatpush1.msra.mxu1 %v175_v7  ;;  %v158_v24 = vld [vmem:[%s520_s1 + $0x38] sm:$0xff]  ;;  %v157_v25 = vld [vmem:[%s520_s1 + $0x30] sm:$0xff]  ;;  %v156_v26 = vld [vmem:[%s520_s1 + $0x28] sm:$0xff] }
  0x14   : > { %191 = vmatprep.subr.mxu0 %v174_v8  ;;  %339 = vmatprep.subr.mxu1 %v174_v8  ;;  %v155_v27 = vld [vmem:[%s520_s1 + $0x20] sm:$0xff]  ;;  %v154_v28 = vld [vmem:[%s520_s1 + $0x18] sm:$0xff]  ;;  %v153_v29 = vld [vmem:[%s520_s1 + $0x10] sm:$0xff] }
  0x15   : > { %192 = vmatpush1.msra.mxu0 %v173_v9  ;;  %355 = vmatpush1.msra.mxu1 %v173_v9  ;;  %v152_v30 = vld [vmem:[%s520_s1 + $0x8] sm:$0xff]  ;;  %v151_v31 = vld [vmem:[%s520_s1] sm:$0xff] }
  0x16   : > { %193 = vmatprep.subr.mxu0 %v172_v10  ;;  %340 = vmatprep.subr.mxu1 %v172_v10  ;;  %v149_v32 = vld [vmem:[%s140_s25] sm:$0xff]  ;;  %v150_v33 = vld [vmem:[%s140_s25 + $0x8] sm:$0xff] }
  0x17   : > { %194 = vmatpush1.msra.mxu0 %v171_v11  ;;  %356 = vmatpush1.msra.mxu1 %v171_v11 }
  0x18   : > { %195 = vmatprep.subr.mxu0 %v170_v12  ;;  %341 = vmatprep.subr.mxu1 %v170_v12 }
  0x19   : > { %196 = vmatpush1.msra.mxu0 %v169_v13  ;;  %357 = vmatpush1.msra.mxu1 %v169_v13 }
  0x1a   : > { %197 = vmatprep.subr.mxu0 %v168_v14  ;;  %342 = vmatprep.subr.mxu1 %v168_v14 }
  0x1b   : > { %198 = vmatpush1.msra.mxu0 %v167_v15  ;;  %358 = vmatpush1.msra.mxu1 %v167_v15 }
  0x1c   : > { %199 = vmatprep.subr.mxu0 %v166_v16  ;;  %343 = vmatprep.subr.mxu1 %v166_v16 }
  0x1d   : > { %200 = vmatpush1.msra.mxu0 %v165_v17  ;;  %359 = vmatpush1.msra.mxu1 %v165_v17 }
  0x1e   : > { %201 = vmatprep.subr.mxu0 %v164_v18  ;;  %344 = vmatprep.subr.mxu1 %v164_v18 }
  0x1f   : > { %202 = vmatpush1.msra.mxu0 %v163_v19  ;;  %360 = vmatpush1.msra.mxu1 %v163_v19 }
  0x20   : > { %203 = vmatprep.subr.mxu0 %v162_v20  ;;  %345 = vmatprep.subr.mxu1 %v162_v20 }
  0x21   : > { %204 = vmatpush1.msra.mxu0 %v161_v21  ;;  %361 = vmatpush1.msra.mxu1 %v161_v21 }
  0x22   : > { %205 = vmatprep.subr.mxu0 %v160_v22  ;;  %346 = vmatprep.subr.mxu1 %v160_v22 }
  0x23   : > { %206 = vmatpush1.msra.mxu0 %v159_v23  ;;  %362 = vmatpush1.msra.mxu1 %v159_v23 }
  0x24   : > { %207 = vmatprep.subr.mxu0 %v158_v24  ;;  %347 = vmatprep.subr.mxu1 %v158_v24 }
  0x25   : > { %208 = vmatpush1.msra.mxu0 %v157_v25  ;;  %363 = vmatpush1.msra.mxu1 %v157_v25 }
  0x26   : > { %209 = vmatprep.subr.mxu0 %v156_v26  ;;  %348 = vmatprep.subr.mxu1 %v156_v26 }
  0x27   : > { %210 = vmatpush1.msra.mxu0 %v155_v27  ;;  %364 = vmatpush1.msra.mxu1 %v155_v27 }
  0x28   : > { %211 = vmatprep.subr.mxu0 %v154_v28  ;;  %349 = vmatprep.subr.mxu1 %v154_v28 }
  0x29   : > { %212 = vmatpush1.msra.mxu0 %v153_v29  ;;  %365 = vmatpush1.msra.mxu1 %v153_v29 }
  0x2a   : > { %213 = vmatprep.subr.mxu0 %v152_v30  ;;  %350 = vmatprep.subr.mxu1 %v152_v30 }
  0x2b   : > { %214 = vmatpush1.msra.mxu0 %v151_v31  ;;  %366 = vmatpush1.msra.mxu1 %v151_v31 }
  0x2c   : > { %247 = vmatprep.mubr.f32.mxu0 %v384_v34  ;;  %253 = vmatprep.mubr.f32.mxu1 %v384_v34 }
  0x2d   : > { %248 = vmatmul.mubr.f32.vlgmr.msra.gmra.mxu0 %v149_v32  ;;  %254 = vmatmul.mubr.f32.vlgmr.msra.gmra.mxu1 %v150_v33 }
  0xed   : > { %v249_v35 = vpop.f32.mrf.mxu0  ;;  %v255_v36 = vpop.f32.mrf.mxu1 }
  0xee   : > { %260 = vst [vmem:[%s147_s30] sm:$0xff] %v249_v35  ;;  %262 = vst [vmem:[%s147_s30 + $0x10] sm:$0xff] %v255_v36 }
  0xef   : > { %v251_v37 = vpop.f32.mrf.mxu0  ;;  %v257_v38 = vpop.f32.mrf.mxu1 }
  0xf0   : > { %261 = vst [vmem:[%s147_s30 + $0x8] sm:$0xff] %v251_v37  ;;  %263 = vst [vmem:[%s147_s30 + $0x18] sm:$0xff] %v257_v38 }
  0xf1 PF: > { %s12_s9 = sadd.s32 1, %s382_s9  }
  0xf2   : > { %p9_p4 = scmp.ge.s32.totalorder %s12_s9, 4  }
  0xf4   :  { %11 = sbr.rel (!%p9_p4) target bundleno = 1 (0x1), region = 58 }

// kernel: _lambda_.47
= control target key start
LH: loop header
LB: loop body
LE: loop exit
PB: predicated region body
PF: predicated region fallthrough
CT: control target
= control target key end

     0   :  { %s484_s9 = smov 0   ;;  %s558_s0 = inlined_call_operand.vmem [shape: f32[64,128], index: 0, kind: input, shape index: {}]   ;;  %s559_s1 = inlined_call_operand.vmem [shape: f32[128,128], index: 1, kind: input, shape index: {}]   ;;  %s560_s2 = inlined_call_operand.vmem [shape: f32[64,128], index: 2, kind: output, shape index: {}]  }
   0x1 LB: > { %s336_s10 = sadd.s32 4294967295, %s467_s9   ;;  %p340_p0 = scmp.ge.s32.totalorder %s467_s9, 1  ;;  %s467_s9 = sphi %s484_s9, %s12_s9  }
   0x2   : > { %p113_p1 = scmp.lt.s32.totalorder %s467_s9, 3 }
   0x4   : > { %p114_p2 = pnand %p340_p0, %p113_p1 }
   0x5   : > { %s341_s27 = sshll.u32 (!%p114_p2), %s336_s10, 2 }
   0x6   : > { %117 = sbr.rel (%p114_p2) target bundleno = 278 (0x116), region = 28  ;;  %p136_p3 = scmp.lt.s32.totalorder (!%p114_p2), %s341_s27, 7 }
   0xb   : > { %v166_v0 = vld [vmem:[%s559_s1 + $0x78] sm:$0xff]  ;;  %v165_v1 = vld [vmem:[%s559_s1 + $0x70] sm:$0xff]  ;;  %v164_v2 = vld [vmem:[%s559_s1 + $0x68] sm:$0xff]  ;;  %s562_s27 = smov (!%p136_p3, %s341_s27), 7 }
   0xc   : > { %367 = vmatprep.subr.mxu0 %v166_v0  ;;  %405 = vmatprep.subr.mxu1 %v166_v0  ;;  %v163_v3 = vld [vmem:[%s559_s1 + $0x60] sm:$0xff]  ;;  %v162_v4 = vld [vmem:[%s559_s1 + $0x58] sm:$0xff]  ;;  %v161_v5 = vld [vmem:[%s559_s1 + $0x50] sm:$0xff]  ;;  %s342_s13 = sshll.u32 %s562_s27, 3 }
   0xd   : > { %368 = vmatpush3.msra.mxu0 %v166_v0  ;;  %421 = vmatpush3.msra.mxu1 %v166_v0  ;;  %v160_v6 = vld [vmem:[%s559_s1 + $0x48] sm:$0xff]  ;;  %v159_v7 = vld [vmem:[%s559_s1 + $0x40] sm:$0xff]  ;;  %v158_v8 = vld [vmem:[%s559_s1 + $0x38] sm:$0xff]  ;;  %s139_s18 = scalar_lea.vmem %s558_s0, %s342_s13  ;;  %s145_s23 = scalar_lea.vmem %s560_s2, %s342_s13 }
   0xe   : > { %369 = vmatprep.subr.mxu0 %v165_v1  ;;  %406 = vmatprep.subr.mxu1 %v165_v1  ;;  %v157_v9 = vld [vmem:[%s559_s1 + $0x30] sm:$0xff]  ;;  %v156_v10 = vld [vmem:[%s559_s1 + $0x28] sm:$0xff]  ;;  %v155_v11 = vld [vmem:[%s559_s1 + $0x20] sm:$0xff] }
   0xf   : > { %370 = vmatpush3.msra.mxu0 %v165_v1  ;;  %422 = vmatpush3.msra.mxu1 %v165_v1  ;;  %v154_v12 = vld [vmem:[%s559_s1 + $0x18] sm:$0xff]  ;;  %v153_v13 = vld [vmem:[%s559_s1 + $0x10] sm:$0xff]  ;;  %v152_v14 = vld [vmem:[%s559_s1 + $0x8] sm:$0xff] }
  0x10   : > { %371 = vmatprep.subr.mxu0 %v164_v2  ;;  %407 = vmatprep.subr.mxu1 %v164_v2  ;;  %v151_v15 = vld [vmem:[%s559_s1] sm:$0xff]  ;;  %v149_v17 = vld [vmem:[%s139_s18 + $0x10] sm:$0xff]  ;;  %v148_v18 = vld [vmem:[%s139_s18 + $0x8] sm:$0xff] }
  0x11   : > { %372 = vmatpush3.msra.mxu0 %v164_v2  ;;  %423 = vmatpush3.msra.mxu1 %v164_v2  ;;  %v147_v16 = vld [vmem:[%s139_s18] sm:$0xff]  ;;  %v150_v19 = vld [vmem:[%s139_s18 + $0x18] sm:$0xff] }
  0x12   : > { %373 = vmatprep.subr.mxu0 %v163_v3  ;;  %408 = vmatprep.subr.mxu1 %v163_v3 }
  0x13   : > { %374 = vmatpush3.msra.mxu0 %v163_v3  ;;  %424 = vmatpush3.msra.mxu1 %v163_v3 }
  0x14   : > { %375 = vmatprep.subr.mxu0 %v162_v4  ;;  %409 = vmatprep.subr.mxu1 %v162_v4 }
  0x15   : > { %376 = vmatpush3.msra.mxu0 %v162_v4  ;;  %425 = vmatpush3.msra.mxu1 %v162_v4 }
  0x16   : > { %377 = vmatprep.subr.mxu0 %v161_v5  ;;  %410 = vmatprep.subr.mxu1 %v161_v5 }
  0x17   : > { %378 = vmatpush3.msra.mxu0 %v161_v5  ;;  %426 = vmatpush3.msra.mxu1 %v161_v5 }
  0x18   : > { %379 = vmatprep.subr.mxu0 %v160_v6  ;;  %411 = vmatprep.subr.mxu1 %v160_v6 }
  0x19   : > { %380 = vmatpush3.msra.mxu0 %v160_v6  ;;  %427 = vmatpush3.msra.mxu1 %v160_v6 }
  0x1a   : > { %381 = vmatprep.subr.mxu0 %v159_v7  ;;  %412 = vmatprep.subr.mxu1 %v159_v7 }
  0x1b   : > { %382 = vmatpush3.msra.mxu0 %v159_v7  ;;  %428 = vmatpush3.msra.mxu1 %v159_v7 }
  0x1c   : > { %383 = vmatprep.subr.mxu0 %v158_v8  ;;  %413 = vmatprep.subr.mxu1 %v158_v8 }
  0x1d   : > { %384 = vmatpush3.msra.mxu0 %v158_v8  ;;  %429 = vmatpush3.msra.mxu1 %v158_v8 }
  0x1e   : > { %385 = vmatprep.subr.mxu0 %v157_v9  ;;  %414 = vmatprep.subr.mxu1 %v157_v9 }
  0x1f   : > { %386 = vmatpush3.msra.mxu0 %v157_v9  ;;  %430 = vmatpush3.msra.mxu1 %v157_v9 }
  0x20   : > { %387 = vmatprep.subr.mxu0 %v156_v10  ;;  %415 = vmatprep.subr.mxu1 %v156_v10 }
  0x21   : > { %388 = vmatpush3.msra.mxu0 %v156_v10  ;;  %431 = vmatpush3.msra.mxu1 %v156_v10 }
  0x22   : > { %389 = vmatprep.subr.mxu0 %v155_v11  ;;  %416 = vmatprep.subr.mxu1 %v155_v11 }
  0x23   : > { %390 = vmatpush3.msra.mxu0 %v155_v11  ;;  %432 = vmatpush3.msra.mxu1 %v155_v11 }
  0x24   : > { %391 = vmatprep.subr.mxu0 %v154_v12  ;;  %417 = vmatprep.subr.mxu1 %v154_v12 }
  0x25   : > { %392 = vmatpush3.msra.mxu0 %v154_v12  ;;  %433 = vmatpush3.msra.mxu1 %v154_v12 }
  0x26   : > { %393 = vmatprep.subr.mxu0 %v153_v13  ;;  %418 = vmatprep.subr.mxu1 %v153_v13 }
  0x27   : > { %394 = vmatpush3.msra.mxu0 %v153_v13  ;;  %434 = vmatpush3.msra.mxu1 %v153_v13 }
  0x28   : > { %395 = vmatprep.subr.mxu0 %v152_v14  ;;  %419 = vmatprep.subr.mxu1 %v152_v14 }
  0x29   : > { %396 = vmatpush3.msra.mxu0 %v152_v14  ;;  %435 = vmatpush3.msra.mxu1 %v152_v14 }
  0x2a   : > { %397 = vmatprep.subr.mxu0 %v151_v15  ;;  %420 = vmatprep.subr.mxu1 %v151_v15 }
  0x2b   : > { %398 = vmatpush3.msra.mxu0 %v151_v15  ;;  %436 = vmatpush3.msra.mxu1 %v151_v15 }
  0x2c   : > { %399 = vmatprep.mubr.f32.mxu0 %v147_v16  ;;  %402 = vmatprep.mubr.f32.mxu1 %v149_v17 }
  0x2d   : > { %400 = vmatmul.mubr.f32.vlgmr.msra.gmra.mxu0 %v148_v18  ;;  %403 = vmatmul.mubr.f32.vlgmr.msra.gmra.mxu1 %v150_v19 }
  0xed   : > { %v401_v20 = vpop.f32.mrf.mxu0  ;;  %v404_v21 = vpop.f32.mrf.mxu1 }
  0xee   : > { %v253_v22 = vsub.f32 0.0, %v401_v20  ;;  %v255_v23 = vsub.f32 0.0, %v404_v21 }
  0xef   : > { %v233_v24 = vpop.f32.mrf.mxu0  ;;  %v243_v25 = vpop.f32.mrf.mxu1 }
  0xf0   : > { %v258_v26 = vmul.f32 1.442695, %v253_v22  ;;  %v262_v27 = vmul.f32 1.442695, %v255_v23  ;;  %v252_v28 = vsub.f32 0.0, %v233_v24  ;;  %v254_v29 = vsub.f32 0.0, %v243_v25 }
  0xf2   : > { %445 = vpow2.f32 %v258_v26  ;;  %v256_v30 = vmul.f32 1.442695, %v252_v28  ;;  %v260_v31 = vmul.f32 1.442695, %v254_v29 }
  0xf3   : > { %447 = vpow2.f32 %v262_v27 }
  0xf4   : > { %449 = vpow2.f32 %v256_v30 }
  0xf5   : > { %451 = vpow2.f32 %v260_v31 }
  0xff   : > { %v446_v32 = vpop.eup %445 }
 0x100   : > { %v448_v33 = vpop.eup %447  ;;  %v265_v35 = vadd.f32 1.0, %v446_v32 }
 0x101   : > { %v450_v34 = vpop.eup %449  ;;  %v267_v38 = vadd.f32 1.0, %v448_v33 }
 0x102   : > { %v452_v36 = vpop.eup %451  ;;  %v264_v37 = vadd.f32 1.0, %v450_v34 }
 0x103   : > { %v266_v39 = vadd.f32 1.0, %v452_v36 }
 0x104   : > { %453 = vrcp.f32 %v264_v37 }
 0x105   : > { %455 = vrcp.f32 %v265_v35 }
 0x106   : > { %457 = vrcp.f32 %v266_v39 }
 0x107   : > { %459 = vrcp.f32 %v267_v38 }
 0x111   : > { %v454_v40 = vpop.eup %453 }
 0x112   : > { %v456_v41 = vpop.eup %455  ;;  %276 = vst [vmem:[%s145_s23] sm:$0xff] %v454_v40 }
 0x113   : > { %v458_v42 = vpop.eup %457  ;;  %277 = vst [vmem:[%s145_s23 + $0x8] sm:$0xff] %v456_v41 }
 0x114   : > { %v460_v43 = vpop.eup %459  ;;  %278 = vst [vmem:[%s145_s23 + $0x10] sm:$0xff] %v458_v42 }
 0x115   : > { %279 = vst [vmem:[%s145_s23 + $0x18] sm:$0xff] %v460_v43 }
 0x116 PF: > { %s12_s9 = sadd.s32 1, %s467_s9  }
 0x117   : > { %p9_p4 = scmp.ge.s32.totalorder %s12_s9, 4  }
 0x119   :  { %11 = sbr.rel (!%p9_p4) target bundleno = 1 (0x1), region = 58 }

// kernel: _lambda_.43
= control target key start
LH: loop header
LB: loop body
LE: loop exit
PB: predicated region body
PF: predicated region fallthrough
CT: control target
= control target key end

     0   :  { %s1260_s30 = smov 0   ;;  %s1558_s0 = inlined_call_operand.vmem [shape: f32[2,32,128], index: 0, kind: input, shape index: {}]   ;;  %s1559_s1 = inlined_call_operand.vmem [shape: f32[1,128], index: 1, kind: input, shape index: {}]   ;;  %s1560_s2 = inlined_call_operand.vmem [shape: f32[1,128], index: 2, kind: input, shape index: {}]   ;;  %s1561_s3 = inlined_call_operand.vmem [shape: f32[128,128], index: 3, kind: input, shape index: {}]   ;;  %s1562_s4 = inlined_call_operand.vmem [shape: f32[128,128], index: 4, kind: input, shape index: {}]   ;;  %s1563_s5 = inlined_call_operand.vmem [shape: f32[32,128], index: 5, kind: input, shape index: {}]   ;;  %s1564_s6 = inlined_call_operand.vmem [shape: f32[32,128], index: 6, kind: input, shape index: {}]   ;;  %s1565_s7 = inlined_call_operand.vmem [shape: f32[128,128], index: 7, kind: input, shape index: {}]   ;;  %s1566_s8 = inlined_call_operand.vmem [shape: f32[128,128], index: 8, kind: input, shape index: {}]   ;;  %s1567_s9 = inlined_call_operand.vmem [shape: f32[2,32,128], index: 9, kind: output, shape index: {}]  }
   0x1 LB: > { %s923_s10 = sadd.s32 4294967295, %s1208_s30   ;;  %p927_p0 = scmp.ge.s32.totalorder %s1208_s30, 1  ;;  %s1208_s30 = sphi %s1260_s30, %s19_s30  }
   0x2   : > { %p287_p1 = scmp.lt.s32.totalorder %s1208_s30, 3 }
   0x4   : > { %p288_p2 = pnand %p927_p0, %p287_p1 }
   0x5   : > { %p323_p3 = scmp.lt.s32.totalorder (!%p288_p2), %s923_s10, 1 }
   0x6   : > { %291 = sbr.rel (%p288_p2) target bundleno = 1293 (0x50d), region = 56 }
   0xb   : > { %s1569_s10 = smov (!%p323_p3, %s923_s10), 1  ;;  %v419_v4 = vld [vmem:[%s1561_s3 + $0x78] sm:$0xff]  ;;  %v418_v5 = vld [vmem:[%s1561_s3 + $0x70] sm:$0xff]  ;;  %v417_v22 = vld [vmem:[%s1561_s3 + $0x68] sm:$0xff] }
   0xc   : > { %s936_s11 = sshll.u32 %s1569_s10, 5  ;;  %1018 = vmatprep.subr.mxu0 %v419_v4  ;;  %v416_v23 = vld [vmem:[%s1561_s3 + $0x60] sm:$0xff]  ;;  %v415_v24 = vld [vmem:[%s1561_s3 + $0x58] sm:$0xff]  ;;  %v414_v25 = vld [vmem:[%s1561_s3 + $0x50] sm:$0xff] }
   0xd   : > { %s327_s14 = scalar_lea.vmem %s1558_s0, %s936_s11  ;;  %1019 = vmatpush3.msra.mxu0 %v419_v4  ;;  %v413_v26 = vld [vmem:[%s1561_s3 + $0x48] sm:$0xff]  ;;  %v412_v27 = vld [vmem:[%s1561_s3 + $0x40] sm:$0xff]  ;;  %v411_v28 = vld [vmem:[%s1561_s3 + $0x38] sm:$0xff]  ;;  %s332_s21 = scalar_lea.vmem %s1567_s9, %s936_s11 }
   0xe   : > { %v1276_v0 = vld [vmem:[%s327_s14] sm:$0xff]  ;;  %v1278_v1 = vld [vmem:[%s327_s14 + $0x10] sm:$0xff]  ;;  %v1282_v2 = vld [vmem:[%s327_s14 + $0x8] sm:$0xff]  ;;  %1020 = vmatprep.subr.mxu0 %v418_v5 }
   0xf   : > { %337 = vadd.xlane.f32.xlu0 %v1276_v0  ;;  %341 = vadd.xlane.f32.xlu1 %v1278_v1  ;;  %v1284_v3 = vld [vmem:[%s327_s14 + $0x18] sm:$0xff]  ;;  %v410_v29 = vld [vmem:[%s1561_s3 + $0x30] sm:$0xff]  ;;  %v409_v30 = vld [vmem:[%s1561_s3 + $0x28] sm:$0xff] }
  0x10   : > { %1021 = vmatpush3.msra.mxu0 %v418_v5  ;;  %v408_v31 = vld [vmem:[%s1561_s3 + $0x20] sm:$0xff]  ;;  %v407_v32 = vld [vmem:[%s1561_s3 + $0x18] sm:$0xff]  ;;  %v406_v33 = vld [vmem:[%s1561_s3 + $0x10] sm:$0xff] }
  0x11   : > { %1022 = vmatprep.subr.mxu0 %v417_v22  ;;  %v405_v34 = vld [vmem:[%s1561_s3 + $0x8] sm:$0xff]  ;;  %v404_v35 = vld [vmem:[%s1561_s3] sm:$0xff]  ;;  %v528_v36 = vld [vmem:[%s1565_s7 + $0x78] sm:$0xff] }
  0x12   : > { %1023 = vmatpush3.msra.mxu0 %v417_v22  ;;  %v527_v37 = vld [vmem:[%s1565_s7 + $0x70] sm:$0xff]  ;;  %1056 = vmatprep.subr.mxu1 %v528_v36  ;;  %v526_v38 = vld [vmem:[%s1565_s7 + $0x68] sm:$0xff]  ;;  %v525_v39 = vld [vmem:[%s1565_s7 + $0x60] sm:$0xff] }
  0x13   : > { %339 = vadd.xlane.f32.xlu0 %v1282_v2  ;;  %343 = vadd.xlane.f32.xlu1 %v1284_v3  ;;  %v524_v40 = vld [vmem:[%s1565_s7 + $0x58] sm:$0xff]  ;;  %v523_v41 = vld [vmem:[%s1565_s7 + $0x50] sm:$0xff]  ;;  %v522_v42 = vld [vmem:[%s1565_s7 + $0x48] sm:$0xff] }
  0x14   : > { %1024 = vmatprep.subr.mxu0 %v416_v23  ;;  %1057 = vmatpush3.msra.mxu1 %v528_v36  ;;  %v521_v43 = vld [vmem:[%s1565_s7 + $0x40] sm:$0xff]  ;;  %v520_v44 = vld [vmem:[%s1565_s7 + $0x38] sm:$0xff]  ;;  %v519_v45 = vld [vmem:[%s1565_s7 + $0x30] sm:$0xff] }
  0x15   : > { %1025 = vmatpush3.msra.mxu0 %v416_v23  ;;  %1058 = vmatprep.subr.mxu1 %v527_v37  ;;  %v518_v46 = vld [vmem:[%s1565_s7 + $0x28] sm:$0xff]  ;;  %v517_v47 = vld [vmem:[%s1565_s7 + $0x20] sm:$0xff]  ;;  %v516_v48 = vld [vmem:[%s1565_s7 + $0x18] sm:$0xff] }
  0x16   : > { %1026 = vmatprep.subr.mxu0 %v415_v24  ;;  %1059 = vmatpush3.msra.mxu1 %v527_v37  ;;  %v515_v49 = vld [vmem:[%s1565_s7 + $0x10] sm:$0xff]  ;;  %v932_v63 = vld [vmem:[%s1559_s1] ss:$0 sm:$0xff]  ;;  %v514_v23 = vld [vmem:[%s1565_s7 + $0x8] sm:$0xff] }
  0x17   : > { %1027 = vmatpush3.msra.mxu0 %v415_v24  ;;  %1060 = vmatprep.subr.mxu1 %v526_v38  ;;  %v933_v5 = vld [vmem:[%s1560_s2] ss:$0 sm:$0xff] }
  0x18   : > { %1028 = vmatprep.subr.mxu0 %v414_v25  ;;  %1061 = vmatpush3.msra.mxu1 %v526_v38  ;;  %v614_v36 = vld [vmem:[%s1564_s6] sm:$0xff] }
  0x19   : > { %1029 = vmatpush3.msra.mxu0 %v414_v25  ;;  %1062 = vmatprep.subr.mxu1 %v525_v39 }
  0x1a   : > { %1030 = vmatprep.subr.mxu0 %v413_v26  ;;  %1063 = vmatpush3.msra.mxu1 %v525_v39  ;;  %v508_v39 = vld [vmem:[%s1563_s5 + $0x18] sm:$0xff] }
  0x1b   : > { %1031 = vmatpush3.msra.mxu0 %v413_v26  ;;  %1064 = vmatprep.subr.mxu1 %v524_v40  ;;  %v665_v26 = vld [vmem:[%s1566_s8 + $0x78] sm:$0xff] }
  0x1c   : > { %1032 = vmatprep.subr.mxu0 %v412_v27  ;;  %1065 = vmatpush3.msra.mxu1 %v524_v40 }
  0x1d   : > { %1033 = vmatpush3.msra.mxu0 %v412_v27  ;;  %1066 = vmatprep.subr.mxu1 %v523_v41  ;;  %v664_v27 = vld [vmem:[%s1566_s8 + $0x70] sm:$0xff] }
  0x1e   : > { %1034 = vmatprep.subr.mxu0 %v411_v28  ;;  %1067 = vmatpush3.msra.mxu1 %v523_v41  ;;  %v617_v41 = vld [vmem:[%s1564_s6 + $0x18] sm:$0xff] }
  0x1f   : > { %1035 = vmatpush3.msra.mxu0 %v411_v28  ;;  %1068 = vmatprep.subr.mxu1 %v522_v42  ;;  %v663_v28 = vld [vmem:[%s1566_s8 + $0x68] sm:$0xff] }
  0x20   : > { %1036 = vmatprep.subr.mxu0 %v410_v29  ;;  %1069 = vmatpush3.msra.mxu1 %v522_v42 }
  0x21   : > { %1037 = vmatpush3.msra.mxu0 %v410_v29  ;;  %1070 = vmatprep.subr.mxu1 %v521_v43  ;;  %v662_v29 = vld [vmem:[%s1566_s8 + $0x60] sm:$0xff] }
  0x22   : > { %1038 = vmatprep.subr.mxu0 %v409_v30  ;;  %1071 = vmatpush3.msra.mxu1 %v521_v43 }
  0x23   : > { %1039 = vmatpush3.msra.mxu0 %v409_v30  ;;  %1072 = vmatprep.subr.mxu1 %v520_v44  ;;  %v661_v30 = vld [vmem:[%s1566_s8 + $0x58] sm:$0xff] }
  0x24   : > { %1040 = vmatprep.subr.mxu0 %v408_v31  ;;  %1073 = vmatpush3.msra.mxu1 %v520_v44 }
  0x25   : > { %1041 = vmatpush3.msra.mxu0 %v408_v31  ;;  %1074 = vmatprep.subr.mxu1 %v519_v45  ;;  %v660_v31 = vld [vmem:[%s1566_s8 + $0x50] sm:$0xff] }
  0x26   : > { %1042 = vmatprep.subr.mxu0 %v407_v32  ;;  %1075 = vmatpush3.msra.mxu1 %v519_v45  ;;  %v507_v45 = vld [vmem:[%s1563_s5 + $0x10] sm:$0xff] }
  0x27   : > { %1043 = vmatpush3.msra.mxu0 %v407_v32  ;;  %1076 = vmatprep.subr.mxu1 %v518_v46  ;;  %v506_v32 = vld [vmem:[%s1563_s5 + $0x8] sm:$0xff] }
  0x28   : > { %1044 = vmatprep.subr.mxu0 %v406_v33  ;;  %1077 = vmatpush3.msra.mxu1 %v518_v46 }
  0x29   : > { %1045 = vmatpush3.msra.mxu0 %v406_v33  ;;  %1078 = vmatprep.subr.mxu1 %v517_v47  ;;  %v615_v33 = vld [vmem:[%s1564_s6 + $0x8] sm:$0xff] }
  0x2a   : > { %1046 = vmatprep.subr.mxu0 %v405_v34  ;;  %1079 = vmatpush3.msra.mxu1 %v517_v47  ;;  %v616_v47 = vld [vmem:[%s1564_s6 + $0x10] sm:$0xff] }
  0x2b   : > { %1047 = vmatpush3.msra.mxu0 %v405_v34  ;;  %1080 = vmatprep.subr.mxu1 %v516_v48  ;;  %v505_v34 = vld [vmem:[%s1563_s5] sm:$0xff] }
  0x2c   : > { %1048 = vmatprep.subr.mxu0 %v404_v35  ;;  %1081 = vmatpush3.msra.mxu1 %v516_v48 }
  0x2d   : > { %1049 = vmatpush3.msra.mxu0 %v404_v35  ;;  %1082 = vmatprep.subr.mxu1 %v515_v49 }
  0x2e   : > { %1083 = vmatpush3.msra.mxu1 %v515_v49  ;;  %1094 = vmatprep.subr.mxu0 %v665_v26 }
  0x2f   : > { %1084 = vmatprep.subr.mxu1 %v514_v23 }
  0x30   : > { %1085 = vmatpush3.msra.mxu1 %v514_v23 }
  0x98   : > { %v338_v6 = vpop.xlane.xlu0 %337  ;;  %v342_v7 = vpop.xlane.xlu1 %341 }
  0x99   : > { %v346_v8 = vmul.f32 0.0078125, %v338_v6  ;;  %v348_v9 = vmul.f32 0.0078125, %v342_v7 }
  0x9b   : > { %v1295_v10 = vsub.f32 %v1276_v0, %v346_v8  ;;  %v1298_v11 = vsub.f32 %v1278_v1, %v348_v9 }
  0x9c   : > { %v340_v12 = vpop.xlane.xlu0 %339  ;;  %v344_v13 = vpop.xlane.xlu1 %343 }
  0x9d   : > { %v347_v14 = vmul.f32 0.0078125, %v340_v12  ;;  %v354_v15 = vmul.f32 %v1295_v10, %v1295_v10  ;;  %v349_v16 = vmul.f32 0.0078125, %v344_v13  ;;  %v356_v19 = vmul.f32 %v1298_v11, %v1298_v11 }
  0x9f   : > { %v1303_v17 = vsub.f32 %v1282_v2, %v347_v14  ;;  %358 = vadd.xlane.f32.xlu0 %v354_v15  ;;  %v1306_v18 = vsub.f32 %v1284_v3, %v349_v16 }
  0xa1   : > { %v355_v20 = vmul.f32 %v1303_v17, %v1303_v17  ;;  %v357_v21 = vmul.f32 %v1306_v18, %v1306_v18 }
  0xa3   : > { %362 = vadd.xlane.f32.xlu0 %v356_v19  ;;  %360 = vadd.xlane.f32.xlu1 %v355_v20 }
  0xa7   : > { %364 = vadd.xlane.f32.xlu1 %v357_v21 }
 0x128   : > { %v359_v50 = vpop.xlane.xlu0 %358 }
 0x129   : > { %v366_v51 = vmul.f32 0.0078125, %v359_v50 }
 0x12b   : > { %v370_v52 = vadd.f32 1e-05, %v366_v51 }
 0x12c   : > { %v361_v53 = vpop.xlane.xlu1 %360  ;;  %v363_v54 = vpop.xlane.xlu0 %362 }
 0x12d   : > { %1178 = vrsqrt.f32 %v370_v52  ;;  %v367_v55 = vmul.f32 0.0078125, %v361_v53  ;;  %v368_v56 = vmul.f32 0.0078125, %v363_v54 }
 0x12f   : > { %v371_v57 = vadd.f32 1e-05, %v367_v55  ;;  %v372_v58 = vadd.f32 1e-05, %v368_v56 }
 0x130   : > { %v365_v59 = vpop.xlane.xlu1 %364 }
 0x131   : > { %1180 = vrsqrt.f32 %v371_v57  ;;  %v369_v60 = vmul.f32 0.0078125, %v365_v59 }
 0x132   : > { %1182 = vrsqrt.f32 %v372_v58 }
 0x133   : > { %v373_v61 = vadd.f32 1e-05, %v369_v60  ;;  %v659_v60 = vld [vmem:[%s1566_s8 + $0x48] sm:$0xff] }
 0x135   : > { %1184 = vrsqrt.f32 %v373_v61  ;;  %v658_v61 = vld [vmem:[%s1566_s8 + $0x40] sm:$0xff] }
 0x13a   : > { %v1179_v62 = vpop.eup %1178 }
 0x13b   : > { %v378_v4 = vmul.f32 %v1179_v62, %v1295_v10  ;;  %v657_v62 = vld [vmem:[%s1566_s8 + $0x38] sm:$0xff] }
 0x13d   : > { %v389_v6 = vmul.f32 %v932_v63, %v378_v4  ;;  %v655_v4 = vld [vmem:[%s1566_s8 + $0x28] sm:$0xff] }
 0x13e   : > { %v1181_v7 = vpop.eup %1180 }
 0x13f   : > { %v1183_v8 = vpop.eup %1182  ;;  %v400_v9 = vadd.f32 %v933_v5, %v389_v6  ;;  %v379_v12 = vmul.f32 %v1181_v7, %v1303_v17  ;;  %v653_v6 = vld [vmem:[%s1566_s8 + $0x18] sm:$0xff]  ;;  %v652_v7 = vld [vmem:[%s1566_s8 + $0x10] sm:$0xff] }
 0x140   : > { %v380_v13 = vmul.f32 %v1183_v8, %v1298_v11  ;;  %v513_v11 = vld [vmem:[%s1565_s7] sm:$0xff]  ;;  %v651_v8 = vld [vmem:[%s1566_s8 + $0x8] sm:$0xff] }
 0x141   : > { %1050 = vmatprep.mubr.f32.mxu0 %v400_v9  ;;  %v390_v14 = vmul.f32 %v932_v63, %v379_v12  ;;  %1086 = vmatprep.subr.mxu1 %v513_v11  ;;  %v650_v9 = vld [vmem:[%s1566_s8] sm:$0xff]  ;;  %v774_v12 = vld [vmem:[%s1562_s4 + $0x78] sm:$0xff] }
 0x142   : > { %v1185_v15 = vpop.eup %1184  ;;  %v391_v16 = vmul.f32 %v932_v63, %v380_v13  ;;  %1087 = vmatpush3.msra.mxu1 %v513_v11  ;;  %v773_v13 = vld [vmem:[%s1562_s4 + $0x70] sm:$0xff] }
 0x143   : > { %v401_v19 = vadd.f32 %v933_v5, %v390_v14  ;;  %v381_v20 = vmul.f32 %v1185_v15, %v1306_v18  ;;  %1132 = vmatprep.subr.mxu1 %v774_v12  ;;  %v772_v14 = vld [vmem:[%s1562_s4 + $0x68] sm:$0xff]  ;;  %v771_v15 = vld [vmem:[%s1562_s4 + $0x60] sm:$0xff] }
 0x144   : > { %v402_v10 = vadd.f32 %v933_v5, %v391_v16  ;;  %v770_v16 = vld [vmem:[%s1562_s4 + $0x58] sm:$0xff] }
 0x145   : > { %1051 = vmatmul.mubr.f32.vlgmr.msra.gmra.mxu0 %v401_v19  ;;  %v392_v21 = vmul.f32 %v932_v63, %v381_v20  ;;  %v656_v63 = vld [vmem:[%s1566_s8 + $0x30] sm:$0xff] }
 0x146   : > { %1053 = vmatprep.mubr.f32.mxu0 %v402_v10  ;;  %1095 = vmatpush3.msra.mxu0 %v665_v26  ;;  %v769_v19 = vld [vmem:[%s1562_s4 + $0x50] sm:$0xff] }
 0x147   : > { %v403_v22 = vadd.f32 %v933_v5, %v392_v21  ;;  %1096 = vmatprep.subr.mxu0 %v664_v27  ;;  %v654_v5 = vld [vmem:[%s1566_s8 + $0x20] sm:$0xff] }
 0x148   : > { %1097 = vmatpush3.msra.mxu0 %v664_v27 }
 0x149   : > { %1054 = vmatmul.mubr.f32.gmra.mxu0 %v403_v22  ;;  %1098 = vmatprep.subr.mxu0 %v663_v28 }
 0x14a   : > { %1099 = vmatpush3.msra.mxu0 %v663_v28 }
 0x14b   : > { %1100 = vmatprep.subr.mxu0 %v662_v29 }
 0x14c   : > { %1101 = vmatpush3.msra.mxu0 %v662_v29 }
 0x14d   : > { %1102 = vmatprep.subr.mxu0 %v661_v30 }
 0x14e   : > { %1103 = vmatpush3.msra.mxu0 %v661_v30 }
 0x14f   : > { %1104 = vmatprep.subr.mxu0 %v660_v31 }
 0x150   : > { %1105 = vmatpush3.msra.mxu0 %v660_v31 }
 0x151   : > { %1106 = vmatprep.subr.mxu0 %v659_v60 }
 0x152   : > { %1107 = vmatpush3.msra.mxu0 %v659_v60 }
 0x153   : > { %1108 = vmatprep.subr.mxu0 %v658_v61 }
 0x154   : > { %1109 = vmatpush3.msra.mxu0 %v658_v61 }
 0x155   : > { %1110 = vmatprep.subr.mxu0 %v657_v62 }
 0x156   : > { %1111 = vmatpush3.msra.mxu0 %v657_v62 }
 0x157   : > { %1112 = vmatprep.subr.mxu0 %v656_v63 }
 0x158   : > { %1113 = vmatpush3.msra.mxu0 %v656_v63 }
 0x159   : > { %1114 = vmatprep.subr.mxu0 %v655_v4 }
 0x15a   : > { %1115 = vmatpush3.msra.mxu0 %v655_v4 }
 0x15b   : > { %1116 = vmatprep.subr.mxu0 %v654_v5 }
 0x15c   : > { %1117 = vmatpush3.msra.mxu0 %v654_v5 }
 0x15d   : > { %1118 = vmatprep.subr.mxu0 %v653_v6 }
 0x15e   : > { %1119 = vmatpush3.msra.mxu0 %v653_v6 }
 0x15f   : > { %1120 = vmatprep.subr.mxu0 %v652_v7 }
 0x160   : > { %1121 = vmatpush3.msra.mxu0 %v652_v7 }
 0x161   : > { %1122 = vmatprep.subr.mxu0 %v651_v8 }
 0x162   : > { %1123 = vmatpush3.msra.mxu0 %v651_v8 }
 0x163   : > { %1124 = vmatprep.subr.mxu0 %v650_v9 }
 0x164   : > { %1125 = vmatpush3.msra.mxu0 %v650_v9 }
 0x205   : > { %v1052_v17 = vpop.f32.mrf.mxu0 }
 0x206   : > { %v510_v37 = vmul.f32 %v1052_v17, %v506_v32  ;;  %v768_v32 = vld [vmem:[%s1562_s4 + $0x48] sm:$0xff] }
 0x207   : > { %v486_v18 = vpop.f32.mrf.mxu0 }
 0x208   : > { %1088 = vmatprep.mubr.f32.mxu1 %v486_v18  ;;  %v509_v42 = vmul.f32 %v505_v34, %v486_v18  ;;  %v766_v34 = vld [vmem:[%s1562_s4 + $0x38] sm:$0xff] }
 0x209   : > { %v1055_v24 = vpop.f32.mrf.mxu0  ;;  %1089 = vmatmul.mubr.f32.vlgmr.msra.gmra.mxu1 %v1052_v17 }
 0x20a   : > { %v512_v48 = vmul.f32 %v1055_v24, %v508_v39  ;;  %1133 = vmatpush3.msra.mxu1 %v774_v12  ;;  %v761_v39 = vld [vmem:[%s1562_s4 + $0x10] sm:$0xff] }
 0x20b   : > { %v496_v25 = vpop.f32.mrf.mxu0  ;;  %1134 = vmatprep.subr.mxu1 %v773_v13 }
 0x20c   : > { %1091 = vmatprep.mubr.f32.mxu1 %v496_v25  ;;  %v511_v53 = vmul.f32 %v507_v45, %v496_v25  ;;  %1135 = vmatpush3.msra.mxu1 %v773_v13 }
 0x20d   : > { %1092 = vmatmul.mubr.f32.gmra.mxu1 %v1055_v24  ;;  %1136 = vmatprep.subr.mxu1 %v772_v14 }
 0x20e   : > { %1137 = vmatpush3.msra.mxu1 %v772_v14 }
 0x20f   : > { %1138 = vmatprep.subr.mxu1 %v771_v15 }
 0x210   : > { %1139 = vmatpush3.msra.mxu1 %v771_v15 }
 0x211   : > { %1140 = vmatprep.subr.mxu1 %v770_v16 }
 0x212   : > { %1141 = vmatpush3.msra.mxu1 %v770_v16 }
 0x213   : > { %1142 = vmatprep.subr.mxu1 %v769_v19 }
 0x214   : > { %1143 = vmatpush3.msra.mxu1 %v769_v19 }
 0x215   : > { %1144 = vmatprep.subr.mxu1 %v768_v32 }
 0x216   : > { %1145 = vmatpush3.msra.mxu1 %v768_v32 }
 0x2c9   : > { %v1090_v35 = vpop.f32.mrf.mxu1 }
 0x2ca   : > { %v619_v38 = vmul.f32 %v1090_v35, %v615_v33  ;;  %v767_v33 = vld [vmem:[%s1562_s4 + $0x40] sm:$0xff]  ;;  %v765_v35 = vld [vmem:[%s1562_s4 + $0x30] sm:$0xff] }
 0x2cb   : > { %v595_v40 = vpop.f32.mrf.mxu1  ;;  %1146 = vmatprep.subr.mxu1 %v767_v33 }
 0x2cc   : > { %v618_v43 = vmul.f32 %v614_v36, %v595_v40  ;;  %v623_v44 = vadd.f32 %v619_v38, %v510_v37  ;;  %1147 = vmatpush3.msra.mxu1 %v767_v33  ;;  %v764_v36 = vld [vmem:[%s1562_s4 + $0x28] sm:$0xff]  ;;  %v763_v37 = vld [vmem:[%s1562_s4 + $0x20] sm:$0xff]  ;;  %v762_v38 = vld [vmem:[%s1562_s4 + $0x18] sm:$0xff] }
 0x2cd   : > { %v1093_v46 = vpop.f32.mrf.mxu1  ;;  %1148 = vmatprep.subr.mxu1 %v766_v34  ;;  %v760_v40 = vld [vmem:[%s1562_s4 + $0x8] sm:$0xff] }
 0x2ce   : > { %v621_v49 = vmul.f32 %v1093_v46, %v617_v41  ;;  %v1456_v50 = vmul.f32 0.25, %v623_v44  ;;  %v622_v51 = vadd.f32 %v618_v43, %v509_v42  ;;  %1149 = vmatpush3.msra.mxu1 %v766_v34  ;;  %v759_v41 = vld [vmem:[%s1562_s4] sm:$0xff] }
 0x2cf   : > { %v605_v52 = vpop.f32.mrf.mxu1  ;;  %1150 = vmatprep.subr.mxu1 %v765_v35 }
 0x2d0   : > { %v620_v54 = vmul.f32 %v616_v47, %v605_v52  ;;  %632 = vmax.xlane.f32.xlu1 %v1456_v50  ;;  %v626_v55 = vmul.f32 0.25, %v622_v51  ;;  %v625_v56 = vadd.f32 %v621_v49, %v512_v48  ;;  %1151 = vmatpush3.msra.mxu1 %v765_v35 }
 0x2d1   : > { %1152 = vmatprep.subr.mxu1 %v764_v36 }
 0x2d2   : > { %630 = vmax.xlane.f32.xlu0 %v626_v55  ;;  %v1459_v57 = vmul.f32 0.25, %v625_v56  ;;  %v624_v58 = vadd.f32 %v620_v54, %v511_v53  ;;  %1153 = vmatpush3.msra.mxu1 %v764_v36 }
 0x2d3   : > { %1154 = vmatprep.subr.mxu1 %v763_v37 }
 0x2d4   : > { %636 = vmax.xlane.f32.xlu1 %v1459_v57  ;;  %v1462_v59 = vmul.f32 0.25, %v624_v58  ;;  %1155 = vmatpush3.msra.mxu1 %v763_v37 }
 0x2d5   : > { %1156 = vmatprep.subr.mxu1 %v762_v38 }
 0x2d6   : > { %634 = vmax.xlane.f32.xlu0 %v1462_v59  ;;  %1157 = vmatpush3.msra.mxu1 %v762_v38 }
 0x2d7   : > { %1158 = vmatprep.subr.mxu1 %v761_v39 }
 0x2d8   : > { %1159 = vmatpush3.msra.mxu1 %v761_v39 }
 0x2d9   : > { %1160 = vmatprep.subr.mxu1 %v760_v40 }
 0x2da   : > { %1161 = vmatpush3.msra.mxu1 %v760_v40 }
 0x2db   : > { %1162 = vmatprep.subr.mxu1 %v759_v41 }
 0x2dc   : > { %1163 = vmatpush3.msra.mxu1 %v759_v41 }
 0x359   : > { %v633_v20 = vpop.xlane.xlu1 %632 }
 0x35a   : > { %v639_v10 = vsub.f32 %v1456_v50, %v633_v20 }
 0x35b   : > { %v631_v21 = vpop.xlane.xlu0 %630 }
 0x35c   : > { %v638_v22 = vsub.f32 %v626_v55, %v631_v21  ;;  %v644_v23 = vmul.f32 1.442695, %v639_v10 }
 0x35d   : > { %v637_v11 = vpop.xlane.xlu1 %636 }
 0x35e   : > { %v642_v17 = vmul.f32 1.442695, %v638_v22  ;;  %v641_v18 = vsub.f32 %v1459_v57, %v637_v11 }
 0x35f   : > { %v635_v24 = vpop.xlane.xlu0 %634 }
 0x360   : > { %1186 = vpow2.f32 %v642_v17  ;;  %v640_v25 = vsub.f32 %v1462_v59, %v635_v24  ;;  %v648_v26 = vmul.f32 1.442695, %v641_v18 }
 0x361   : > { %1188 = vpow2.f32 %v644_v23 }
 0x362   : > { %v646_v27 = vmul.f32 1.442695, %v640_v25 }
 0x364   : > { %1190 = vpow2.f32 %v646_v27 }
 0x365   : > { %1192 = vpow2.f32 %v648_v26 }
 0x36d   : > { %v1187_v28 = vpop.eup %1186 }
 0x36e   : > { %v1189_v29 = vpop.eup %1188  ;;  %1126 = vmatprep.mubr.f32.mxu0 %v1187_v28 }
 0x36f   : > { %1127 = vmatmul.mubr.f32.vlgmr.msra.gmra.mxu0 %v1189_v29 }
 0x371   : > { %v1191_v30 = vpop.eup %1190 }
 0x372   : > { %v1193_v31 = vpop.eup %1192  ;;  %1129 = vmatprep.mubr.f32.mxu0 %v1191_v30 }
 0x373   : > { %1130 = vmatmul.mubr.f32.gmra.mxu0 %v1193_v31 }
 0x42f   : > { %v1128_v42 = vpop.f32.mrf.mxu0 }
 0x430   : > { %1194 = vrcp.f32 %v1128_v42 }
 0x431   : > { %v732_v43 = vpop.f32.mrf.mxu0 }
 0x432   : > { %1196 = vrcp.f32 %v732_v43 }
 0x433   : > { %v1131_v44 = vpop.f32.mrf.mxu0 }
 0x434   : > { %1198 = vrcp.f32 %v1131_v44 }
 0x435   : > { %v742_v45 = vpop.f32.mrf.mxu0 }
 0x436   : > { %1200 = vrcp.f32 %v742_v45 }
 0x43d   : > { %v1195_v46 = vpop.eup %1194 }
 0x43e   : > { %v754_v49 = vmul.f32 %v1195_v46, %v1189_v29 }
 0x43f   : > { %v1197_v47 = vpop.eup %1196 }
 0x440   : > { %v752_v48 = vmul.f32 %v1197_v47, %v1187_v28 }
 0x441   : > { %v1199_v50 = vpop.eup %1198 }
 0x442   : > { %1164 = vmatprep.mubr.f32.mxu1 %v752_v48  ;;  %v758_v53 = vmul.f32 %v1199_v50, %v1193_v31 }
 0x443   : > { %v1201_v51 = vpop.eup %1200  ;;  %1165 = vmatmul.mubr.f32.vlgmr.msra.gmra.mxu1 %v754_v49 }
 0x444   : > { %v756_v52 = vmul.f32 %v1201_v51, %v1191_v30 }
 0x446   : > { %1167 = vmatprep.mubr.f32.mxu1 %v756_v52 }
 0x447   : > { %1168 = vmatmul.mubr.f32.gmra.mxu1 %v758_v53 }
 0x503   : > { %v1166_v54 = vpop.f32.mrf.mxu1 }
 0x504   : > { %v861_v55 = vadd.f32 %v1166_v54, %v1282_v2 }
 0x505   : > { %v841_v56 = vpop.f32.mrf.mxu1 }
 0x506   : > { %865 = vst [vmem:[%s332_s21 + $0x8] sm:$0xff] %v861_v55  ;;  %v860_v57 = vadd.f32 %v841_v56, %v1276_v0 }
 0x507   : > { %v1169_v58 = vpop.f32.mrf.mxu1 }
 0x508   : > { %864 = vst [vmem:[%s332_s21] sm:$0xff] %v860_v57  ;;  %v863_v59 = vadd.f32 %v1169_v58, %v1284_v3 }
 0x509   : > { %v851_v60 = vpop.f32.mrf.mxu1 }
 0x50a   : > { %867 = vst [vmem:[%s332_s21 + $0x18] sm:$0xff] %v863_v59  ;;  %v862_v61 = vadd.f32 %v851_v60, %v1278_v1 }
 0x50c   : > { %866 = vst [vmem:[%s332_s21 + $0x10] sm:$0xff] %v862_v61 }
 0x50d PF: > { %s19_s30 = sadd.s32 1, %s1208_s30  }
 0x50e   : > { %p16_p4 = scmp.ge.s32.totalorder %s19_s30, 4  }
 0x510   :  { %18 = sbr.rel (!%p16_p4) target bundleno = 1 (0x1), region = 86 }

// kernel: _lambda_.44
= control target key start
LH: loop header
LB: loop body
LE: loop exit
PB: predicated region body
PF: predicated region fallthrough
CT: control target
= control target key end

     0   :  { %s1251_s24 = smov 0   ;;  %s1663_s0 = inlined_call_operand.vmem [shape: f32[2,32,128], index: 0, kind: input, shape index: {}]   ;;  %s1664_s1 = inlined_call_operand.vmem [shape: f32[1,128], index: 1, kind: input, shape index: {}]   ;;  %s1665_s2 = inlined_call_operand.vmem [shape: f32[1,128], index: 2, kind: input, shape index: {}]   ;;  %s1666_s3 = inlined_call_operand.vmem [shape: f32[128,384], index: 3, kind: input, shape index: {}]   ;;  %s1667_s4 = inlined_call_operand.vmem [shape: f32[1,384], index: 4, kind: input, shape index: {}]   ;;  %s1668_s5 = inlined_call_operand.vmem [shape: f32[384,128], index: 5, kind: input, shape index: {}]   ;;  %s1669_s6 = inlined_call_operand.vmem [shape: f32[1,128], index: 6, kind: input, shape index: {}]   ;;  %s1670_s7 = inlined_call_operand.vmem [shape: f32[2,32,128], index: 7, kind: output, shape index: {}]  }
   0x1 LB: > { %s961_s25 = sadd.s32 4294967295, %s1208_s24   ;;  %p965_p0 = scmp.ge.s32.totalorder %s1208_s24, 1  ;;  %s1208_s24 = sphi %s1251_s24, %s17_s24  }
   0x2   : > { %p237_p1 = scmp.lt.s32.totalorder %s1208_s24, 3 }
   0x4   : > { %p238_p2 = pnand %p965_p0, %p237_p1 }
   0x5   : > { %p269_p3 = scmp.lt.s32.totalorder (!%p238_p2), %s961_s25, 1 }
   0x6   : > { %241 = sbr.rel (%p238_p2) target bundleno = 772 (0x304), region = 48 }
   0xb   : > { %s1672_s25 = smov (!%p269_p3, %s961_s25), 1  ;;  %v396_v4 = vld [vmem:[%s1666_s3 + $0x170] sm:$0xff]  ;;  %v395_v5 = vld [vmem:[%s1666_s3 + $0x168] sm:$0xff]  ;;  %v393_v6 = vld [vmem:[%s1666_s3 + $0x158] sm:$0xff] }
   0xc   : > { %s975_s26 = sshll.u32 %s1672_s25, 5  ;;  %415 = vmatprep.subr.mxu0 %v396_v4  ;;  %v392_v7 = vld [vmem:[%s1666_s3 + $0x150] sm:$0xff]  ;;  %v397_v8 = vld [vmem:[%s1666_s3 + $0x178] sm:$0xff]  ;;  %v390_v9 = vld [vmem:[%s1666_s3 + $0x140] sm:$0xff] }
   0xd   : > { %s273_s29 = scalar_lea.vmem %s1663_s0, %s975_s26  ;;  %416 = vmatpush1.msra.mxu0 %v395_v5  ;;  %1061 = vmatprep.subr.mxu1 %v397_v8  ;;  %v394_v10 = vld [vmem:[%s1666_s3 + $0x160] sm:$0xff]  ;;  %v389_v11 = vld [vmem:[%s1666_s3 + $0x138] sm:$0xff]  ;;  %v387_v12 = vld [vmem:[%s1666_s3 + $0x128] sm:$0xff]  ;;  %s278_s9 = scalar_lea.vmem %s1670_s7, %s975_s26 }
   0xe   : > { %v1267_v0 = vld [vmem:[%s273_s29] sm:$0xff]  ;;  %v1269_v1 = vld [vmem:[%s273_s29 + $0x10] sm:$0xff]  ;;  %v1273_v2 = vld [vmem:[%s273_s29 + $0x8] sm:$0xff]  ;;  %417 = vmatprep.subr.mxu0 %v393_v6  ;;  %1062 = vmatpush3.msra.mxu1 %v397_v8  ;;  %v1210_v6 = vmov 0.0  }
   0xf   : > { %283 = vadd.xlane.f32.xlu0 %v1267_v0  ;;  %287 = vadd.xlane.f32.xlu1 %v1269_v1  ;;  %v1275_v3 = vld [vmem:[%s273_s29 + $0x18] sm:$0xff]  ;;  %v386_v13 = vld [vmem:[%s1666_s3 + $0x120] sm:$0xff]  ;;  %v384_v30 = vld [vmem:[%s1666_s3 + $0x110] sm:$0xff] }
  0x10   : > { %418 = vmatpush1.msra.mxu0 %v392_v7  ;;  %1063 = vmatprep.subr.mxu1 %v394_v10  ;;  %v391_v31 = vld [vmem:[%s1666_s3 + $0x148] sm:$0xff]  ;;  %v381_v33 = vld [vmem:[%s1666_s3 + $0xf8] sm:$0xff]  ;;  %v388_v34 = vld [vmem:[%s1666_s3 + $0x130] sm:$0xff] }
  0x11   : > { %419 = vmatprep.subr.mxu0 %v390_v9  ;;  %1064 = vmatpush3.msra.mxu1 %v394_v10  ;;  %v383_v32 = vld [vmem:[%s1666_s3 + $0x108] sm:$0xff]  ;;  %v380_v35 = vld [vmem:[%s1666_s3 + $0xf0] sm:$0xff]  ;;  %v378_v36 = vld [vmem:[%s1666_s3 + $0xe0] sm:$0xff] }
  0x12   : > { %420 = vmatpush1.msra.mxu0 %v389_v11  ;;  %1065 = vmatprep.subr.mxu1 %v391_v31  ;;  %v385_v37 = vld [vmem:[%s1666_s3 + $0x118] sm:$0xff]  ;;  %v375_v39 = vld [vmem:[%s1666_s3 + $0xc8] sm:$0xff]  ;;  %v382_v40 = vld [vmem:[%s1666_s3 + $0x100] sm:$0xff] }
  0x13   : > { %285 = vadd.xlane.f32.xlu0 %v1273_v2  ;;  %289 = vadd.xlane.f32.xlu1 %v1275_v3  ;;  %v377_v38 = vld [vmem:[%s1666_s3 + $0xd8] sm:$0xff]  ;;  %v374_v41 = vld [vmem:[%s1666_s3 + $0xc0] sm:$0xff]  ;;  %v372_v42 = vld [vmem:[%s1666_s3 + $0xb0] sm:$0xff] }
  0x14   : > { %421 = vmatprep.subr.mxu0 %v387_v12  ;;  %1066 = vmatpush3.msra.mxu1 %v391_v31  ;;  %v379_v43 = vld [vmem:[%s1666_s3 + $0xe8] sm:$0xff]  ;;  %v369_v45 = vld [vmem:[%s1666_s3 + $0x98] sm:$0xff]  ;;  %v376_v46 = vld [vmem:[%s1666_s3 + $0xd0] sm:$0xff] }
  0x15   : > { %422 = vmatpush1.msra.mxu0 %v386_v13  ;;  %1067 = vmatprep.subr.mxu1 %v388_v34  ;;  %v371_v44 = vld [vmem:[%s1666_s3 + $0xa8] sm:$0xff]  ;;  %v368_v47 = vld [vmem:[%s1666_s3 + $0x90] sm:$0xff]  ;;  %v366_v48 = vld [vmem:[%s1666_s3 + $0x80] sm:$0xff] }
  0x16   : > { %423 = vmatprep.subr.mxu0 %v384_v30  ;;  %1068 = vmatpush3.msra.mxu1 %v388_v34  ;;  %v373_v49 = vld [vmem:[%s1666_s3 + $0xb8] sm:$0xff]  ;;  %v363_v51 = vld [vmem:[%s1666_s3 + $0x68] sm:$0xff]  ;;  %v370_v52 = vld [vmem:[%s1666_s3 + $0xa0] sm:$0xff] }
  0x17   : > { %424 = vmatpush1.msra.mxu0 %v383_v32  ;;  %1069 = vmatprep.subr.mxu1 %v385_v37  ;;  %v365_v50 = vld [vmem:[%s1666_s3 + $0x78] sm:$0xff]  ;;  %v362_v53 = vld [vmem:[%s1666_s3 + $0x60] sm:$0xff]  ;;  %v360_v54 = vld [vmem:[%s1666_s3 + $0x50] sm:$0xff] }
  0x18   : > { %425 = vmatprep.subr.mxu0 %v381_v33  ;;  %1070 = vmatpush3.msra.mxu1 %v385_v37  ;;  %v367_v55 = vld [vmem:[%s1666_s3 + $0x88] sm:$0xff]  ;;  %v357_v57 = vld [vmem:[%s1666_s3 + $0x38] sm:$0xff]  ;;  %v364_v58 = vld [vmem:[%s1666_s3 + $0x70] sm:$0xff] }
  0x19   : > { %426 = vmatpush1.msra.mxu0 %v380_v35  ;;  %1071 = vmatprep.subr.mxu1 %v382_v40  ;;  %v359_v56 = vld [vmem:[%s1666_s3 + $0x48] sm:$0xff]  ;;  %v356_v59 = vld [vmem:[%s1666_s3 + $0x30] sm:$0xff]  ;;  %v354_v60 = vld [vmem:[%s1666_s3 + $0x20] sm:$0xff] }
  0x1a   : > { %427 = vmatprep.subr.mxu0 %v378_v36  ;;  %1072 = vmatpush3.msra.mxu1 %v382_v40  ;;  %v361_v61 = vld [vmem:[%s1666_s3 + $0x58] sm:$0xff]  ;;  %v351_v63 = vld [vmem:[%s1666_s3 + $0x8] sm:$0xff]  ;;  %v358_v4 = vld [vmem:[%s1666_s3 + $0x40] sm:$0xff] }
  0x1b   : > { %428 = vmatpush1.msra.mxu0 %v377_v38  ;;  %1073 = vmatprep.subr.mxu1 %v379_v43  ;;  %v353_v62 = vld [vmem:[%s1666_s3 + $0x18] sm:$0xff]  ;;  %v350_v5 = vld [vmem:[%s1666_s3] sm:$0xff]  ;;  %v355_v7 = vld [vmem:[%s1666_s3 + $0x28] sm:$0xff] }
  0x1c   : > { %429 = vmatprep.subr.mxu0 %v375_v39  ;;  %1074 = vmatpush3.msra.mxu1 %v379_v43  ;;  %v352_v8 = vld [vmem:[%s1666_s3 + $0x10] sm:$0xff]  ;;  %v702_v43 = vld [vmem:[%s1668_s5 + $0xe8] sm:$0xff] }
  0x1d   : > { %430 = vmatpush1.msra.mxu0 %v374_v41  ;;  %1075 = vmatprep.subr.mxu1 %v376_v46 }
  0x1e   : > { %431 = vmatprep.subr.mxu0 %v372_v42  ;;  %1076 = vmatpush3.msra.mxu1 %v376_v46  ;;  %v687_v42 = vld [vmem:[%s1668_s5 + $0x70] sm:$0xff]  ;;  %v701_v46 = vld [vmem:[%s1668_s5 + $0xe0] sm:$0xff] }
  0x1f   : > { %432 = vmatpush1.msra.mxu0 %v371_v44  ;;  %1077 = vmatprep.subr.mxu1 %v373_v49  ;;  %v720_v44 = vld [vmem:[%s1668_s5 + $0x178] sm:$0xff] }
  0x20   : > { %433 = vmatprep.subr.mxu0 %v369_v45  ;;  %1078 = vmatpush3.msra.mxu1 %v373_v49  ;;  %v686_v45 = vld [vmem:[%s1668_s5 + $0x68] sm:$0xff]  ;;  %v700_v49 = vld [vmem:[%s1668_s5 + $0xd8] sm:$0xff] }
  0x21   : > { %434 = vmatpush1.msra.mxu0 %v368_v47  ;;  %1079 = vmatprep.subr.mxu1 %v370_v52  ;;  %v719_v47 = vld [vmem:[%s1668_s5 + $0x170] sm:$0xff] }
  0x22   : > { %435 = vmatprep.subr.mxu0 %v366_v48  ;;  %1080 = vmatpush3.msra.mxu1 %v370_v52  ;;  %v685_v48 = vld [vmem:[%s1668_s5 + $0x60] sm:$0xff]  ;;  %v699_v52 = vld [vmem:[%s1668_s5 + $0xd0] sm:$0xff] }
  0x23   : > { %436 = vmatpush1.msra.mxu0 %v365_v50  ;;  %1081 = vmatprep.subr.mxu1 %v367_v55  ;;  %v718_v50 = vld [vmem:[%s1668_s5 + $0x168] sm:$0xff] }
  0x24   : > { %437 = vmatprep.subr.mxu0 %v363_v51  ;;  %1082 = vmatpush3.msra.mxu1 %v367_v55  ;;  %v684_v51 = vld [vmem:[%s1668_s5 + $0x58] sm:$0xff]  ;;  %v698_v55 = vld [vmem:[%s1668_s5 + $0xc8] sm:$0xff] }
  0x25   : > { %438 = vmatpush1.msra.mxu0 %v362_v53  ;;  %1083 = vmatprep.subr.mxu1 %v364_v58  ;;  %v717_v53 = vld [vmem:[%s1668_s5 + $0x160] sm:$0xff] }
  0x26   : > { %439 = vmatprep.subr.mxu0 %v360_v54  ;;  %1084 = vmatpush3.msra.mxu1 %v364_v58  ;;  %v683_v54 = vld [vmem:[%s1668_s5 + $0x50] sm:$0xff]  ;;  %v697_v58 = vld [vmem:[%s1668_s5 + $0xc0] sm:$0xff] }
  0x27   : > { %440 = vmatpush1.msra.mxu0 %v359_v56  ;;  %1085 = vmatprep.subr.mxu1 %v361_v61  ;;  %v716_v56 = vld [vmem:[%s1668_s5 + $0x158] sm:$0xff] }
  0x28   : > { %441 = vmatprep.subr.mxu0 %v357_v57  ;;  %1086 = vmatpush3.msra.mxu1 %v361_v61  ;;  %v682_v57 = vld [vmem:[%s1668_s5 + $0x48] sm:$0xff]  ;;  %v696_v61 = vld [vmem:[%s1668_s5 + $0xb8] sm:$0xff] }
  0x29   : > { %442 = vmatpush1.msra.mxu0 %v356_v59  ;;  %1087 = vmatprep.subr.mxu1 %v358_v4  ;;  %v715_v59 = vld [vmem:[%s1668_s5 + $0x150] sm:$0xff] }
  0x2a   : > { %443 = vmatprep.subr.mxu0 %v354_v60  ;;  %479 = vmatprep.mubr.f32.mxu0 %v1210_v6  ;;  %v681_v60 = vld [vmem:[%s1668_s5 + $0x40] sm:$0xff] }
  0x2b   : > { %444 = vmatpush1.msra.mxu0 %v353_v62  ;;  %1088 = vmatpush3.msra.mxu1 %v358_v4  ;;  %v714_v62 = vld [vmem:[%s1668_s5 + $0x148] sm:$0xff]  ;;  %v695_v4 = vld [vmem:[%s1668_s5 + $0xb0] sm:$0xff] }
  0x2c   : > { %445 = vmatprep.subr.mxu0 %v351_v63  ;;  %1089 = vmatprep.subr.mxu1 %v355_v7  ;;  %v680_v63 = vld [vmem:[%s1668_s5 + $0x38] sm:$0xff] }
  0x2d   : > { %446 = vmatpush1.msra.mxu0 %v350_v5  ;;  %1090 = vmatpush3.msra.mxu1 %v355_v7  ;;  %v713_v5 = vld [vmem:[%s1668_s5 + $0x140] sm:$0xff]  ;;  %v694_v7 = vld [vmem:[%s1668_s5 + $0xa8] sm:$0xff] }
  0x2e   : > { %1091 = vmatprep.subr.mxu1 %v352_v8 }
  0x2f   : > { %1092 = vmatpush3.msra.mxu1 %v352_v8  ;;  %v712_v8 = vld [vmem:[%s1668_s5 + $0x138] sm:$0xff] }
  0x30   : > { %1099 = vmatprep.subr.mxu1 %v720_v44 }
  0x98   : > { %v284_v14 = vpop.xlane.xlu0 %283  ;;  %v288_v15 = vpop.xlane.xlu1 %287 }
  0x99   : > { %v292_v16 = vmul.f32 0.0078125, %v284_v14  ;;  %v294_v17 = vmul.f32 0.0078125, %v288_v15 }
  0x9b   : > { %v1310_v18 = vsub.f32 %v1267_v0, %v292_v16  ;;  %v1313_v19 = vsub.f32 %v1269_v1, %v294_v17 }
  0x9c   : > { %v286_v20 = vpop.xlane.xlu0 %285  ;;  %v290_v21 = vpop.xlane.xlu1 %289 }
  0x9d   : > { %v293_v22 = vmul.f32 0.0078125, %v286_v20  ;;  %v300_v23 = vmul.f32 %v1310_v18, %v1310_v18  ;;  %v295_v24 = vmul.f32 0.0078125, %v290_v21  ;;  %v302_v27 = vmul.f32 %v1313_v19, %v1313_v19 }
  0x9f   : > { %v1318_v25 = vsub.f32 %v1273_v2, %v293_v22  ;;  %304 = vadd.xlane.f32.xlu0 %v300_v23  ;;  %v1321_v26 = vsub.f32 %v1275_v3, %v295_v24  ;;  %v970_v24 = vld [vmem:[%s1664_s1] ss:$0 sm:$0xff] }
  0xa1   : > { %v301_v28 = vmul.f32 %v1318_v25, %v1318_v25  ;;  %v303_v29 = vmul.f32 %v1321_v26, %v1321_v26 }
  0xa3   : > { %308 = vadd.xlane.f32.xlu0 %v302_v27  ;;  %306 = vadd.xlane.f32.xlu1 %v301_v28  ;;  %v971_v28 = vld [vmem:[%s1665_s2] ss:$0 sm:$0xff] }
  0xa7   : > { %310 = vadd.xlane.f32.xlu1 %v303_v29 }
 0x128   : > { %v305_v9 = vpop.xlane.xlu0 %304 }
 0x129   : > { %v312_v10 = vmul.f32 0.0078125, %v305_v9  ;;  %v678_v9 = vld [vmem:[%s1668_s5 + $0x28] sm:$0xff] }
 0x12b   : > { %v316_v11 = vadd.f32 1e-05, %v312_v10  ;;  %v693_v10 = vld [vmem:[%s1668_s5 + $0xa0] sm:$0xff] }
 0x12c   : > { %v307_v12 = vpop.xlane.xlu1 %306  ;;  %v309_v13 = vpop.xlane.xlu0 %308 }
 0x12d   : > { %1146 = vrsqrt.f32 %v316_v11  ;;  %v313_v14 = vmul.f32 0.0078125, %v307_v12  ;;  %v314_v15 = vmul.f32 0.0078125, %v309_v13  ;;  %v711_v11 = vld [vmem:[%s1668_s5 + $0x130] sm:$0xff]  ;;  %v677_v12 = vld [vmem:[%s1668_s5 + $0x20] sm:$0xff]  ;;  %v692_v13 = vld [vmem:[%s1668_s5 + $0x98] sm:$0xff] }
 0x12f   : > { %v317_v16 = vadd.f32 1e-05, %v313_v14  ;;  %v318_v17 = vadd.f32 1e-05, %v314_v15  ;;  %v710_v14 = vld [vmem:[%s1668_s5 + $0x128] sm:$0xff]  ;;  %v676_v15 = vld [vmem:[%s1668_s5 + $0x18] sm:$0xff] }
 0x130   : > { %v311_v20 = vpop.xlane.xlu1 %310 }
 0x131   : > { %1148 = vrsqrt.f32 %v317_v16  ;;  %v315_v21 = vmul.f32 0.0078125, %v311_v20  ;;  %v691_v16 = vld [vmem:[%s1668_s5 + $0x90] sm:$0xff] }
 0x132   : > { %1150 = vrsqrt.f32 %v318_v17  ;;  %v709_v17 = vld [vmem:[%s1668_s5 + $0x120] sm:$0xff]  ;;  %v675_v20 = vld [vmem:[%s1668_s5 + $0x10] sm:$0xff] }
 0x133   : > { %v319_v22 = vadd.f32 1e-05, %v315_v21  ;;  %v690_v21 = vld [vmem:[%s1668_s5 + $0x88] sm:$0xff] }
 0x135   : > { %1152 = vrsqrt.f32 %v319_v22  ;;  %v708_v22 = vld [vmem:[%s1668_s5 + $0x118] sm:$0xff] }
 0x13a   : > { %v1147_v23 = vpop.eup %1146 }
 0x13b   : > { %v324_v27 = vmul.f32 %v1147_v23, %v1310_v18  ;;  %v674_v23 = vld [vmem:[%s1668_s5 + $0x8] sm:$0xff] }
 0x13d   : > { %v335_v29 = vmul.f32 %v970_v24, %v324_v27  ;;  %v707_v27 = vld [vmem:[%s1668_s5 + $0x110] sm:$0xff] }
 0x13e   : > { %v1149_v30 = vpop.eup %1148 }
 0x13f   : > { %v1151_v31 = vpop.eup %1150  ;;  %v346_v32 = vadd.f32 %v971_v28, %v335_v29  ;;  %v325_v33 = vmul.f32 %v1149_v30, %v1318_v25  ;;  %v688_v25 = vld [vmem:[%s1668_s5 + $0x78] sm:$0xff]  ;;  %v706_v29 = vld [vmem:[%s1668_s5 + $0x108] sm:$0xff]  ;;  %v705_v30 = vld [vmem:[%s1668_s5 + $0x100] sm:$0xff] }
 0x140   : > { %v326_v34 = vmul.f32 %v1151_v31, %v1313_v19  ;;  %v704_v19 = vld [vmem:[%s1668_s5 + $0xf8] sm:$0xff]  ;;  %v400_v31 = vlaneseq }
 0x141   : > { %480 = vmatmul.mubr.f32.vlgmr.msra.gmra.mxu0 %v346_v32  ;;  %1093 = vmatprep.mubr.f32.mxu1 %v346_v32  ;;  %v336_v35 = vmul.f32 %v970_v24, %v325_v33 }
 0x142   : > { %v1153_v36 = vpop.eup %1152  ;;  %485 = vmatprep.mubr.f32.mxu0 %v1210_v6  ;;  %v337_v37 = vmul.f32 %v970_v24, %v326_v34  ;;  %997 = vmatprep.subr.mxu0 %v704_v19  ;;  %v401_v32 = vshrl.u32 %v400_v31, 7  ;;  %v398_v34 = vld [vmem:[%s1667_s4] sm:$0x7] }
 0x143   : > { %v347_v38 = vadd.f32 %v971_v28, %v336_v35  ;;  %v327_v18 = vmul.f32 %v1153_v36, %v1321_v26  ;;  %998 = vmatpush3.msra.mxu0 %v688_v25  ;;  %v703_v26 = vld [vmem:[%s1668_s5 + $0xf0] sm:$0xff] }
 0x144   : > { %v348_v39 = vadd.f32 %v971_v28, %v337_v37  ;;  %999 = vmatprep.subr.mxu0 %v703_v26  ;;  %v402_v33 = vsub.s32 0, %v401_v32  ;;  %v406_v35 = vsub.s32 1, %v401_v32  ;;  %v410_v37 = vsub.s32 2, %v401_v32 }
 0x145   : > { %486 = vmatmul.mubr.f32.gmra.mxu0 %v347_v38  ;;  %1094 = vmatmul.mubr.f32.vlgmr.msra.gmra.mxu1 %v347_v38  ;;  %v338_v40 = vmul.f32 %v970_v24, %v327_v18  ;;  %v689_v24 = vld [vmem:[%s1668_s5 + $0x80] sm:$0xff] }
 0x146   : > { %1096 = vmatprep.mubr.f32.mxu1 %v348_v39  ;;  %491 = vmatprep.mubr.f32.mxu0 %v1210_v6  ;;  %v403_v36 = vrot.slane %v398_v34, %v402_v33  ;;  %v407_v38 = vrot.slane %v398_v34, %v406_v35 }
 0x147   : > { %v349_v41 = vadd.f32 %v971_v28, %v338_v40  ;;  %1000 = vmatpush3.msra.mxu0 %v687_v42  ;;  %1100 = vmatpush3.msra.mxu1 %v720_v44  ;;  %v673_v28 = vld [vmem:[%s1668_s5] sm:$0xff]  ;;  %v411_v40 = vrot.slane %v398_v34, %v410_v37 }
 0x148   : > { %1001 = vmatprep.subr.mxu0 %v702_v43  ;;  %1101 = vmatprep.subr.mxu1 %v719_v47 }
 0x149   : > { %492 = vmatmul.mubr.f32.gmra.mxu0 %v348_v39  ;;  %1097 = vmatmul.mubr.f32.gmra.mxu1 %v349_v41 }
 0x14a   : > { %497 = vmatprep.mubr.f32.mxu0 %v1210_v6  ;;  %1002 = vmatpush3.msra.mxu0 %v686_v45  ;;  %v679_v6 = vld [vmem:[%s1668_s5 + $0x30] sm:$0xff] }
 0x14b   : > { %1003 = vmatprep.subr.mxu0 %v701_v46  ;;  %1102 = vmatpush3.msra.mxu1 %v719_v47 }
 0x14c   : > { %1004 = vmatpush3.msra.mxu0 %v685_v48  ;;  %1103 = vmatprep.subr.mxu1 %v718_v50 }
 0x14d   : > { %498 = vmatmul.mubr.f32.gmra.mxu0 %v349_v41  ;;  %1005 = vmatprep.subr.mxu0 %v700_v49 }
 0x14e   : > { %1006 = vmatpush3.msra.mxu0 %v684_v51  ;;  %1104 = vmatpush3.msra.mxu1 %v718_v50 }
 0x14f   : > { %1007 = vmatprep.subr.mxu0 %v699_v52  ;;  %1105 = vmatprep.subr.mxu1 %v717_v53 }
 0x150   : > { %1008 = vmatpush3.msra.mxu0 %v683_v54  ;;  %1106 = vmatpush3.msra.mxu1 %v717_v53 }
 0x151   : > { %1009 = vmatprep.subr.mxu0 %v698_v55  ;;  %1107 = vmatprep.subr.mxu1 %v716_v56 }
 0x152   : > { %1010 = vmatpush3.msra.mxu0 %v682_v57  ;;  %1108 = vmatpush3.msra.mxu1 %v716_v56 }
 0x153   : > { %1011 = vmatprep.subr.mxu0 %v697_v58  ;;  %1109 = vmatprep.subr.mxu1 %v715_v59 }
 0x154   : > { %1012 = vmatpush3.msra.mxu0 %v681_v60  ;;  %1110 = vmatpush3.msra.mxu1 %v715_v59 }
 0x155   : > { %1013 = vmatprep.subr.mxu0 %v696_v61  ;;  %1111 = vmatprep.subr.mxu1 %v714_v62 }
 0x156   : > { %1014 = vmatpush3.msra.mxu0 %v680_v63  ;;  %1112 = vmatpush3.msra.mxu1 %v714_v62 }
 0x157   : > { %1015 = vmatprep.subr.mxu0 %v695_v4  ;;  %1113 = vmatprep.subr.mxu1 %v713_v5 }
 0x158   : > { %1016 = vmatpush3.msra.mxu0 %v679_v6  ;;  %1114 = vmatpush3.msra.mxu1 %v713_v5 }
 0x159   : > { %1017 = vmatprep.subr.mxu0 %v694_v7  ;;  %1115 = vmatprep.subr.mxu1 %v712_v8 }
 0x15a   : > { %1018 = vmatpush3.msra.mxu0 %v678_v9  ;;  %1116 = vmatpush3.msra.mxu1 %v712_v8 }
 0x15b   : > { %1019 = vmatprep.subr.mxu0 %v693_v10  ;;  %1117 = vmatprep.subr.mxu1 %v711_v11 }
 0x15c   : > { %1020 = vmatpush3.msra.mxu0 %v677_v12  ;;  %1118 = vmatpush3.msra.mxu1 %v711_v11 }
 0x15d   : > { %1021 = vmatprep.subr.mxu0 %v692_v13  ;;  %1119 = vmatprep.subr.mxu1 %v710_v14 }
 0x15e   : > { %1022 = vmatpush3.msra.mxu0 %v676_v15  ;;  %1120 = vmatpush3.msra.mxu1 %v710_v14 }
 0x15f   : > { %1023 = vmatprep.subr.mxu0 %v691_v16  ;;  %1121 = vmatprep.subr.mxu1 %v709_v17 }
 0x160   : > { %1024 = vmatpush3.msra.mxu0 %v675_v20  ;;  %1122 = vmatpush3.msra.mxu1 %v709_v17 }
 0x161   : > { %1025 = vmatprep.subr.mxu0 %v690_v21  ;;  %1123 = vmatprep.subr.mxu1 %v708_v22 }
 0x162   : > { %1026 = vmatpush3.msra.mxu0 %v674_v23  ;;  %1124 = vmatpush3.msra.mxu1 %v708_v22 }
 0x163   : > { %1027 = vmatprep.subr.mxu0 %v689_v24  ;;  %1125 = vmatprep.subr.mxu1 %v707_v27 }
 0x164   : > { %1028 = vmatpush3.msra.mxu0 %v673_v28  ;;  %1126 = vmatpush3.msra.mxu1 %v707_v27 }
 0x165   : > { %1127 = vmatprep.subr.mxu1 %v706_v29 }
 0x166   : > { %1128 = vmatpush3.msra.mxu1 %v706_v29 }
 0x167   : > { %1129 = vmatprep.subr.mxu1 %v705_v30 }
 0x168   : > { %1130 = vmatpush3.msra.mxu1 %v705_v30 }
 0x201   : > { %v481_v18 = vpop.f32.mrf.mxu0 }
 0x202   : > { %v1600_v39 = vadd.f32 %v481_v18, %v403_v36 }
 0x203   : > { %v483_v41 = vpop.f32.mrf.mxu0 }
 0x204   : > { %v589_v19 = vsub.f32 0.0, %v1600_v39  ;;  %v1603_v25 = vadd.f32 %v483_v41, %v407_v38 }
 0x205   : > { %v487_v26 = vpop.f32.mrf.mxu0  ;;  %v1095_v42 = vpop.f32.mrf.mxu1 }
 0x206   : > { %v601_v43 = vmul.f32 1.442695, %v589_v19  ;;  %v590_v44 = vsub.f32 0.0, %v1603_v25  ;;  %v1606_v45 = vadd.f32 %v487_v26, %v403_v36  ;;  %v1608_v46 = vadd.f32 %v1095_v42, %v411_v40 }
 0x207   : > { %v489_v47 = vpop.f32.mrf.mxu0  ;;  %v570_v48 = vpop.f32.mrf.mxu1 }
 0x208   : > { %1154 = vpow2.f32 %v601_v43  ;;  %v603_v49 = vmul.f32 1.442695, %v590_v44  ;;  %v592_v50 = vsub.f32 0.0, %v1606_v45  ;;  %v594_v51 = vsub.f32 0.0, %v1608_v46 }
 0x209   : > { %v1612_v52 = vadd.f32 %v489_v47, %v407_v38  ;;  %v1614_v53 = vadd.f32 %v570_v48, %v411_v40  ;;  %v493_v54 = vpop.f32.mrf.mxu0  ;;  %v1098_v55 = vpop.f32.mrf.mxu1 }
 0x20a   : > { %1156 = vpow2.f32 %v603_v49  ;;  %v607_v56 = vmul.f32 1.442695, %v592_v50  ;;  %v611_v57 = vmul.f32 1.442695, %v594_v51  ;;  %v1616_v58 = vadd.f32 %v493_v54, %v403_v36 }
 0x20b   : > { %v593_v59 = vsub.f32 0.0, %v1612_v52  ;;  %v591_v60 = vsub.f32 0.0, %v1614_v53  ;;  %v1620_v61 = vadd.f32 %v1098_v55, %v411_v40  ;;  %v495_v62 = vpop.f32.mrf.mxu0  ;;  %v580_v63 = vpop.f32.mrf.mxu1 }
 0x20c   : > { %1158 = vpow2.f32 %v607_v56  ;;  %v595_v4 = vsub.f32 0.0, %v1616_v58  ;;  %v1623_v5 = vadd.f32 %v495_v62, %v407_v38  ;;  %v1625_v6 = vadd.f32 %v580_v63, %v411_v40 }
 0x20d   : > { %1160 = vpow2.f32 %v611_v57  ;;  %v609_v7 = vmul.f32 1.442695, %v593_v59  ;;  %v605_v8 = vmul.f32 1.442695, %v591_v60  ;;  %v600_v9 = vsub.f32 0.0, %v1620_v61  ;;  %v499_v10 = vpop.f32.mrf.mxu0 }
 0x20e   : > { %v613_v11 = vmul.f32 1.442695, %v595_v4  ;;  %v596_v12 = vsub.f32 0.0, %v1623_v5  ;;  %v597_v13 = vsub.f32 0.0, %v1625_v6  ;;  %v1630_v14 = vadd.f32 %v499_v10, %v403_v36 }
 0x20f   : > { %1162 = vpow2.f32 %v609_v7  ;;  %v623_v15 = vmul.f32 1.442695, %v600_v9  ;;  %v501_v16 = vpop.f32.mrf.mxu0 }
 0x210   : > { %1164 = vpow2.f32 %v605_v8  ;;  %v615_v17 = vmul.f32 1.442695, %v596_v12  ;;  %v617_v20 = vmul.f32 1.442695, %v597_v13  ;;  %v598_v21 = vsub.f32 0.0, %v1630_v14 }
 0x211   : > { %1166 = vpow2.f32 %v613_v11  ;;  %v1633_v22 = vadd.f32 %v501_v16, %v407_v38 }
 0x212   : > { %1168 = vpow2.f32 %v623_v15  ;;  %v619_v23 = vmul.f32 1.442695, %v598_v21 }
 0x213   : > { %1170 = vpow2.f32 %v615_v17  ;;  %v599_v24 = vsub.f32 0.0, %v1633_v22 }
 0x214   : > { %1172 = vpow2.f32 %v617_v20 }
 0x215   : > { %v1155_v27 = vpop.eup %1154  ;;  %1174 = vpow2.f32 %v619_v23  ;;  %v621_v28 = vmul.f32 1.442695, %v599_v24 }
 0x216   : > { %v625_v29 = vadd.f32 1.0, %v1155_v27 }
 0x217   : > { %v1157_v30 = vpop.eup %1156  ;;  %1176 = vpow2.f32 %v621_v28 }
 0x218   : > { %v626_v31 = vadd.f32 1.0, %v1157_v30  ;;  %1178 = vrcp.f32 %v625_v29 }
 0x219   : > { %v1159_v32 = vpop.eup %1158 }
 0x21a   : > { %v1161_v33 = vpop.eup %1160  ;;  %1180 = vrcp.f32 %v626_v31  ;;  %v628_v34 = vadd.f32 1.0, %v1159_v32 }
 0x21b   : > { %v630_v35 = vadd.f32 1.0, %v1161_v33 }
 0x21c   : > { %v1163_v36 = vpop.eup %1162  ;;  %1182 = vrcp.f32 %v628_v34 }
 0x21d   : > { %v1165_v37 = vpop.eup %1164  ;;  %v629_v38 = vadd.f32 1.0, %v1163_v36  ;;  %1184 = vrcp.f32 %v630_v35 }
 0x21e   : > { %v1167_v18 = vpop.eup %1166  ;;  %v627_v40 = vadd.f32 1.0, %v1165_v37 }
 0x21f   : > { %v1169_v41 = vpop.eup %1168  ;;  %1186 = vrcp.f32 %v629_v38  ;;  %v631_v19 = vadd.f32 1.0, %v1167_v18 }
 0x220   : > { %v1171_v26 = vpop.eup %1170  ;;  %1188 = vrcp.f32 %v627_v40  ;;  %v636_v42 = vadd.f32 1.0, %v1169_v41 }
 0x221   : > { %v1173_v43 = vpop.eup %1172  ;;  %1190 = vrcp.f32 %v631_v19  ;;  %v632_v44 = vadd.f32 1.0, %v1171_v26 }
 0x222   : > { %v1175_v47 = vpop.eup %1174  ;;  %1192 = vrcp.f32 %v636_v42  ;;  %v633_v48 = vadd.f32 1.0, %v1173_v43 }
 0x223   : > { %1194 = vrcp.f32 %v632_v44  ;;  %v634_v49 = vadd.f32 1.0, %v1175_v47 }
 0x224   : > { %v1177_v50 = vpop.eup %1176  ;;  %1196 = vrcp.f32 %v633_v48 }
 0x225   : > { %v635_v51 = vadd.f32 1.0, %v1177_v50  ;;  %v1179_v54 = vpop.eup %1178  ;;  %1198 = vrcp.f32 %v634_v49 }
 0x226   : > { %v661_v57 = vmul.f32 %v1179_v54, %v1600_v39 }
 0x227   : > { %v1181_v55 = vpop.eup %1180  ;;  %1200 = vrcp.f32 %v635_v51 }
 0x228   : > { %v662_v56 = vmul.f32 %v1181_v55, %v1603_v25 }
 0x229   : > { %v1183_v59 = vpop.eup %1182 }
 0x22a   : > { %792 = vmatprep.mubr.f32.mxu0 %v662_v56  ;;  %v1185_v60 = vpop.eup %1184  ;;  %v664_v8 = vmul.f32 %v1183_v59, %v1606_v45 }
 0x22b   : > { %793 = vmatmul.mubr.f32.vlgmr.msra.gmra.mxu0 %v661_v57  ;;  %v666_v11 = vmul.f32 %v1185_v60, %v1608_v46 }
 0x22c   : > { %v1187_v62 = vpop.eup %1186 }
 0x22d   : > { %v1189_v63 = vpop.eup %1188  ;;  %v665_v4 = vmul.f32 %v1187_v62, %v1612_v52 }
 0x22e   : > { %v1191_v7 = vpop.eup %1190  ;;  %v663_v9 = vmul.f32 %v1189_v63, %v1614_v53 }
 0x22f   : > { %v1193_v10 = vpop.eup %1192  ;;  %797 = vmatprep.mubr.f32.mxu0 %v665_v4  ;;  %v667_v13 = vmul.f32 %v1191_v7, %v1616_v58  ;;  %v972_v58 = vld [vmem:[%s1669_s6] ss:$0 sm:$0xff] }
 0x230   : > { %v1195_v25 = vpop.eup %1194  ;;  %1131 = vmatprep.mubr.f32.mxu1 %v663_v9  ;;  %798 = vmatmul.mubr.f32.gmra.mxu0 %v664_v8  ;;  %v672_v45 = vmul.f32 %v1193_v10, %v1620_v61 }
 0x231   : > { %v1197_v39 = vpop.eup %1196  ;;  %v668_v12 = vmul.f32 %v1195_v25, %v1623_v5  ;;  %1132 = vmatmul.mubr.f32.vlgmr.msra.gmra.mxu1 %v666_v11 }
 0x232   : > { %v669_v52 = vmul.f32 %v1197_v39, %v1625_v6  ;;  %v1199_v15 = vpop.eup %1198 }
 0x233   : > { %802 = vmatprep.mubr.f32.mxu0 %v668_v12  ;;  %v670_v16 = vmul.f32 %v1199_v15, %v1630_v14 }
 0x234   : > { %v1201_v53 = vpop.eup %1200  ;;  %1134 = vmatprep.mubr.f32.mxu1 %v669_v52  ;;  %803 = vmatmul.mubr.f32.gmra.mxu0 %v667_v13 }
 0x235   : > { %v671_v46 = vmul.f32 %v1201_v53, %v1633_v22  ;;  %1135 = vmatmul.mubr.f32.gmra.mxu1 %v672_v45 }
 0x237   : > { %807 = vmatprep.mubr.f32.mxu0 %v671_v46 }
 0x238   : > { %808 = vmatmul.mubr.f32.gmra.mxu0 %v670_v16 }
 0x2eb   : > { %v1029_v5 = vpop.f32.mrf.mxu0 }
 0x2ed   : > { %v1030_v17 = vpop.f32.mrf.mxu0 }
 0x2ee   : > { %v1031_v6 = vadd.f32 %v1030_v17, %v1029_v5 }
 0x2f0   : > { %v1032_v61 = vpop.f32.mrf.mxu0  ;;  %v795_v20 = vadd.f32 %v1031_v6, %v972_v58 }
 0x2f1   : > { %v1133_v21 = vpop.f32.mrf.mxu1 }
 0x2f2   : > { %v1033_v23 = vpop.f32.mrf.mxu0 }
 0x2f3   : > { %v1034_v24 = vadd.f32 %v1033_v23, %v1032_v61  ;;  %v879_v27 = vpop.f32.mrf.mxu1 }
 0x2f4   : > { %v880_v22 = vadd.f32 %v879_v27, %v795_v20  ;;  %v1035_v28 = vpop.f32.mrf.mxu0 }
 0x2f5   : > { %v800_v14 = vadd.f32 %v1034_v24, %v972_v58  ;;  %v1136_v30 = vpop.f32.mrf.mxu1 }
 0x2f6   : > { %v898_v29 = vadd.f32 %v880_v22, %v1267_v0  ;;  %v1036_v31 = vpop.f32.mrf.mxu0 }
 0x2f7   : > { %v885_v32 = vadd.f32 %v1133_v21, %v800_v14  ;;  %v1037_v33 = vadd.f32 %v1036_v31, %v1035_v28  ;;  %v889_v37 = vpop.f32.mrf.mxu1 }
 0x2f8   : > { %902 = vst [vmem:[%s278_s9] sm:$0xff] %v898_v29  ;;  %v1038_v34 = vpop.f32.mrf.mxu0 }
 0x2f9   : > { %v899_v35 = vadd.f32 %v885_v32, %v1273_v2  ;;  %v805_v36 = vadd.f32 %v1037_v33, %v972_v58 }
 0x2fa   : > { %v1039_v38 = vpop.f32.mrf.mxu0 }
 0x2fb   : > { %903 = vst [vmem:[%s278_s9 + $0x8] sm:$0xff] %v899_v35  ;;  %v890_v18 = vadd.f32 %v889_v37, %v805_v36  ;;  %v1040_v40 = vadd.f32 %v1039_v38, %v1038_v34 }
 0x2fd   : > { %v900_v41 = vadd.f32 %v890_v18, %v1269_v1  ;;  %v810_v19 = vadd.f32 %v1040_v40, %v972_v58 }
 0x2ff   : > { %904 = vst [vmem:[%s278_s9 + $0x10] sm:$0xff] %v900_v41  ;;  %v895_v26 = vadd.f32 %v1136_v30, %v810_v19 }
 0x301   : > { %v901_v0 = vadd.f32 %v895_v26, %v1275_v3 }
 0x303   : > { %905 = vst [vmem:[%s278_s9 + $0x18] sm:$0xff] %v901_v0 }
 0x304 PF: > { %s17_s24 = sadd.s32 1, %s1208_s24  }
 0x305   : > { %p14_p4 = scmp.ge.s32.totalorder %s17_s24, 4  }
 0x307   :  { %16 = sbr.rel (!%p14_p4) target bundleno = 1 (0x1), region = 78 }

</bundles_post_ra>
